<compile_context>
chip_gen: v7x
topology: tpu7x:2x2x1
jax: 0.10.0
libtpu: 0.0.40
codegen_flags: <defaults>
</compile_context>

<pallas_src>
import functools

import jax
import jax.numpy as jnp
from jax import lax
from jax.experimental import pallas as pl
from jax.experimental.pallas import tpu as pltpu


# --------------------------- fused BiLSTM layer kernel ---------------------------
def _bilstm_layer_kernel(*refs, n_in, nblk, tt, bp, t_real, needs_mask, unroll):
    """One bidirectional LSTM layer; `tt` timesteps of both directions per grid step.

    Activations are 2-D "(time*batch, feature)" slabs.  The 8H gate axis is
    gate-major interleaved [i_f,i_b,f_f,f_b,g_f,g_b,o_f,o_b], so a single
    block-diagonal (2H, 8H) recurrent matmul serves BOTH directions and the gate
    nonlinearities slice 2H-wide.  Cat state layout is [fwd | bwd] (B, 2H).
    """
    xf = refs[0:n_in]                       # fwd-time-indexed input blocks, bf16
    xb = refs[n_in:2 * n_in]                # reverse-time-indexed input blocks, bf16
    wf = refs[2 * n_in:3 * n_in]            # (d_j, 8H) fwd gate cols (bwd cols zero)
    wb = refs[3 * n_in:4 * n_in]            # (d_j, 8H) bwd gate cols (fwd cols zero)
    wbd_ref = refs[4 * n_in]                # (2H, 8H) block-diagonal recurrent weight
    bias_ref = refs[4 * n_in + 1]           # (1, 8H)  b_ih + b_hh, both directions
    hf_ref = refs[4 * n_in + 2]             # (tt*bp, H) out, fwd,  time block k
    hb_ref = refs[4 * n_in + 3]             # (tt*bp, H) out, bwd,  time block nblk-1-k
    h_ref, c_ref, gif_ref, gib_ref = refs[4 * n_in + 4:4 * n_in + 8]

    H = hf_ref.shape[-1]
    H2 = 2 * H
    k = pl.program_id(0)

    @pl.when(k == 0)
    def _():
        # h0 = c0 = 0 as in the PyTorch module.
        h_ref[...] = jnp.zeros_like(h_ref)
        c_ref[...] = jnp.zeros_like(c_ref)

    # Hoisted loads: weights / bias read once, not once per unrolled timestep.
    w_bd = wbd_ref[...]
    bias = bias_ref[...]

    # Bulk per-block input projection for BOTH directions on the otherwise-idle
    # MXU; the result lives only in VMEM scratch (never streamed via HBM).
    def project(x_refs, w_refs):
        acc = None
        for xr, wr in zip(x_refs, w_refs):
            p = jnp.dot(xr[...], wr[...], preferred_element_type=jnp.float32)
            acc = p if acc is None else acc + p
        return acc

    gif_ref[...] = project(xf, wf) + bias   # biases (both dirs) folded in once
    gib_ref[...] = project(xb, wb)          # fwd gate columns here are zero

    if needs_mask:
        col_is_fwd = lax.broadcasted_iota(jnp.int32, (1, H2), 1) < H

    def step(s, carry):
        h, c = carry                                         # (bp, 2H) f32
        # One block-diagonal matmul = both directions' recurrent updates.
        rec = jnp.dot(h.astype(jnp.bfloat16), w_bd,
                      preferred_element_type=jnp.float32)    # (bp, 8H)
        rf = pl.multiple_of(s * bp, bp)                      # fwd rows (local time s)
        rb = pl.multiple_of((tt - 1 - s) * bp, bp)           # bwd rows (local tt-1-s)
        gates = gif_ref[pl.ds(rf, bp), :] + gib_ref[pl.ds(rb, bp), :] + rec
        i = jax.nn.sigmoid(gates[:, 0:H2])
        f = jax.nn.sigmoid(gates[:, H2:2 * H2])
        g = jnp.tanh(gates[:, 2 * H2:3 * H2])
        o = jax.nn.sigmoid(gates[:, 3 * H2:4 * H2])
        c_new = f * c + i * g
        h_new = o * jnp.tanh(c_new)
        if needs_mask:
            # Padded timesteps (global t >= t_real) must not advance the state
            # (the backward direction visits the padded tail before the real steps).
            t_f = k * tt + s
            t_b = (nblk - 1 - k) * tt + (tt - 1 - s)
            valid = jnp.where(col_is_fwd, t_f < t_real, t_b < t_real)
            h_new = jnp.where(valid, h_new, h)
            c_new = jnp.where(valid, c_new, c)
        hf_ref[pl.ds(rf, bp), :] = h_new[:, :H].astype(hf_ref.dtype)
        hb_ref[pl.ds(rb, bp), :] = h_new[:, H:].astype(hb_ref.dtype)
        return h_new, c_new

    h, c = lax.fori_loop(0, tt, step, (h_ref[...], c_ref[...]), unroll=unroll)
    h_ref[...] = h
    c_ref[...] = c


def _choose_time_block(T, bp, d_in_max, H, max_tt=64, vmem_budget_bytes=6 << 20):
    """Largest time block whose streamed blocks + in-kernel gi scratch fit the budget.

    Per timestep: 2 dirs x 2 bufs x bf16 inputs, 2 dirs x 2 bufs x bf16 outputs,
    plus 2 dirs x f32 (8H wide) gate-preactivation scratch.
    TODO(synk): shrink the budget / set vmem_limit_bytes for v7x's 64 MiB VMEM.
    """
    bytes_per_t = bp * (8 * d_in_max + 8 * H + 64 * H)
    tt = max(1, min(max_tt, T, vmem_budget_bytes // max(bytes_per_t, 1)))
    return int(tt)


def bilstm_layer(xs, wf_list, wb_list, w_bd, bias8, *, t_real, tt, bp):
    """One bidirectional LSTM layer.

    xs      : list of 2-D input streams, each (T_pad*bp, D_j) bf16 (time-major rows).
    wf_list : per-stream (D_j, 8H) bf16 weights filling fwd gate columns.
    wb_list : per-stream (D_j, 8H) bf16 weights filling bwd gate columns.
    w_bd    : (2H, 8H) bf16 block-diagonal recurrent weight.
    bias8   : (1, 8H) f32 combined biases.
    Returns (hf, hb), each (T_pad*bp, H) bf16 in original time order.
    """
    n_in = len(xs)
    T_pad = xs[0].shape[0] // bp
    H = w_bd.shape[0] // 2
    nblk = T_pad // tt
    needs_mask = (t_real != T_pad)
    unroll = int(min(tt, 8))

    kernel = functools.partial(
        _bilstm_layer_kernel, n_in=n_in, nblk=nblk, tt=tt, bp=bp,
        t_real=t_real, needs_mask=needs_mask, unroll=unroll)

    in_specs = []
    for x in xs:        # forward-time-indexed blocks
        in_specs.append(pl.BlockSpec((tt * bp, x.shape[-1]), lambda k: (k, 0)))
    for x in xs:        # reverse-time-indexed blocks (same arrays, no explicit flip)
        in_specs.append(pl.BlockSpec((tt * bp, x.shape[-1]),
                                     lambda k: (nblk - 1 - k, 0)))
    for w in list(wf_list) + list(wb_list) + [w_bd, bias8]:   # weights: constant index
        in_specs.append(pl.BlockSpec(w.shape, lambda k: (0, 0)))

    out_specs = [pl.BlockSpec((tt * bp, H), lambda k: (k, 0)),
                 pl.BlockSpec((tt * bp, H), lambda k: (nblk - 1 - k, 0))]

    return pl.pallas_call(
        kernel,
        out_shape=(jax.ShapeDtypeStruct((T_pad * bp, H), jnp.bfloat16),
                   jax.ShapeDtypeStruct((T_pad * bp, H), jnp.bfloat16)),
        grid=(nblk,),
        in_specs=in_specs,
        out_specs=out_specs,
        scratch_shapes=[pltpu.VMEM((bp, 2 * H), jnp.float32),        # h_cat
                        pltpu.VMEM((bp, 2 * H), jnp.float32),        # c_cat
                        pltpu.VMEM((tt * bp, 8 * H), jnp.float32),   # gi fwd block
                        pltpu.VMEM((tt * bp, 8 * H), jnp.float32)],  # gi bwd block
        compiler_params=pltpu.CompilerParams(
            dimension_semantics=("arbitrary",)),                     # serial recurrence
    )(*xs, *xs, *wf_list, *wb_list, w_bd, bias8)


# ------------------------------ weight preparation --------------------------------
def _scatter_gate_cols(w_t, H, direction):
    """(D, 4H) in PyTorch gate order [i,f,g,o] -> (D, 8H) gate-major interleaved
    [i_f,i_b,f_f,f_b,g_f,g_b,o_f,o_b], with this direction's columns filled and the
    other direction's columns zero."""
    D = w_t.shape[0]
    w4 = w_t.reshape(D, 4, H)
    z = jnp.zeros_like(w4)
    parts = (w4, z) if direction == 0 else (z, w4)
    return jnp.stack(parts, axis=2).reshape(D, 8 * H)


def _prep_layer_weights(lp, H, first_layer):
    wf_ih_t = jnp.transpose(lp['fwd']['w_ih'])        # (Din, 4H)
    wb_ih_t = jnp.transpose(lp['bwd']['w_ih'])
    if first_layer:
        wf_list = [_scatter_gate_cols(wf_ih_t, H, 0)]
        wb_list = [_scatter_gate_cols(wb_ih_t, H, 1)]
    else:
        # Layer input is two streams [hf_prev, hb_prev]; split W_ih rows accordingly
        # (avoids materializing a (T,B,2H) concatenated activation).
        wf_list = [_scatter_gate_cols(wf_ih_t[:H], H, 0),
                   _scatter_gate_cols(wf_ih_t[H:], H, 0)]
        wb_list = [_scatter_gate_cols(wb_ih_t[:H], H, 1),
                   _scatter_gate_cols(wb_ih_t[H:], H, 1)]
    w_bd = jnp.concatenate(
        [_scatter_gate_cols(jnp.transpose(lp['fwd']['w_hh']), H, 0),
         _scatter_gate_cols(jnp.transpose(lp['bwd']['w_hh']), H, 1)], axis=0)
    b_f = (lp['fwd']['b_ih'] + lp['fwd']['b_hh']).reshape(4, H)
    b_b = (lp['bwd']['b_ih'] + lp['bwd']['b_hh']).reshape(4, H)
    bias8 = jnp.stack([b_f, b_b], axis=1).reshape(1, 8 * H).astype(jnp.float32)
    wf_list = [w.astype(jnp.bfloat16) for w in wf_list]
    wb_list = [w.astype(jnp.bfloat16) for w in wb_list]
    return wf_list, wb_list, w_bd.astype(jnp.bfloat16), bias8


# ------------------------------- parameter init ----------------------------------
def init_bilstm_params(key, input_size, hidden_size, num_layers, output_size):
    scale = 1.0 / float(hidden_size) ** 0.5
    params = {'layers': []}
    for l in range(num_layers):
        d_in = input_size if l == 0 else 2 * hidden_size
        layer = {}
        for direction in ('fwd', 'bwd'):
            key, k1, k2, k3, k4 = jax.random.split(key, 5)
            layer[direction] = dict(
                w_ih=jax.random.uniform(k1, (4 * hidden_size, d_in),
                                        jnp.float32, -scale, scale),
                w_hh=jax.random.uniform(k2, (4 * hidden_size, hidden_size),
                                        jnp.float32, -scale, scale),
                b_ih=jax.random.uniform(k3, (4 * hidden_size,),
                                        jnp.float32, -scale, scale),
                b_hh=jax.random.uniform(k4, (4 * hidden_size,),
                                        jnp.float32, -scale, scale),
            )
        params['layers'].append(layer)
    key, k1, k2 = jax.random.split(key, 3)
    fscale = 1.0 / float(2 * hidden_size) ** 0.5
    params['fc_w'] = jax.random.uniform(k1, (output_size, 2 * hidden_size),
                                        jnp.float32, -fscale, fscale)
    params['fc_b'] = jax.random.uniform(k2, (output_size,),
                                        jnp.float32, -fscale, fscale)
    return params


# ----------------------------------- forward -------------------------------------
def bilstm_forward(x, params, num_layers):
    """x: (B, T, input_size) batch-first.  Returns (out, hn) like the PyTorch module:
       out: (B, output_size), hn: (num_layers*2, B, hidden_size)."""
    B, T, Din = x.shape
    H = params['layers'][0]['fwd']['w_hh'].shape[1]
    BP = -(-B // 8) * 8                              # pad batch to sublane multiple
    tt = _choose_time_block(T, BP, max(Din, 2 * H), H)
    T_pad = -(-T // tt) * tt                         # pad T to a multiple of tt

    x_tbd = jnp.transpose(x, (1, 0, 2)).astype(jnp.float32)          # (T, B, Din)
    x_tbd = jnp.pad(x_tbd, ((0, T_pad - T), (0, BP - B), (0, 0)))
    streams = [x_tbd.reshape(T_pad * BP, Din).astype(jnp.bfloat16)]  # 2-D slab

    hn_parts = []
    hf = hb = None
    for l in range(num_layers):
        wf_list, wb_list, w_bd, bias8 = _prep_layer_weights(
            params['layers'][l], H, l == 0)
        hf, hb = bilstm_layer(streams, wf_list, wb_list, w_bd, bias8,
                              t_real=T, tt=tt, bp=BP)
        hn_parts.append(hf[(T - 1) * BP:T * BP])     # forward final hidden  (t = T-1)
        hn_parts.append(hb[0:BP])                    # backward final hidden (t = 0)
        streams = [hf, hb]                           # no (T,B,2H) concat between layers

    h_last = jnp.concatenate([hf[(T - 1) * BP:T * BP],
                              hb[(T - 1) * BP:T * BP]], axis=-1).astype(jnp.float32)
    # Final Linear: tiny (B, 2H) x (2H, O) — plain XLA (kernel launch > work at O=4).
    out = jnp.dot(h_last, jnp.transpose(params['fc_w']),
                  preferred_element_type=jnp.float32) + params['fc_b']
    hn = jnp.stack(hn_parts, axis=0).astype(jnp.float32)             # (2*L, BP, H)
    return out[:B], hn[:, :B]


# ------------------------------ pure-JAX reference --------------------------------
def _reference_bilstm(x, params, num_layers):
    """f32 reference with nn.LSTM(bidirectional=True) semantics (for validation)."""
    def run_dir(x_tbd, p, reverse):
        H = p['w_hh'].shape[1]
        w_ih_t, w_hh_t = p['w_ih'].T, p['w_hh'].T
        b = p['b_ih'] + p['b_hh']

        def step(carry, xt):
            h, c = carry
            gates = xt @ w_ih_t + h @ w_hh_t + b
            i = jax.nn.sigmoid(gates[:, :H])
            f = jax.nn.sigmoid(gates[:, H:2 * H])
            g = jnp.tanh(gates[:, 2 * H:3 * H])
            o = jax.nn.sigmoid(gates[:, 3 * H:])
            c = f * c + i * g
            h = o * jnp.tanh(c)
            return (h, c), h

        Bsz = x_tbd.shape[1]
        init = (jnp.zeros((Bsz, H), jnp.float32), jnp.zeros((Bsz, H), jnp.float32))
        _, hs = lax.scan(step, init, x_tbd, reverse=reverse)
        return hs

    layer_in = jnp.transpose(x, (1, 0, 2))
    hn = []
    for l in range(num_layers):
        lp = params['layers'][l]
        hf = run_dir(layer_in, lp['fwd'], False)
        hb = run_dir(layer_in, lp['bwd'], True)
        hn += [hf[-1], hb[0]]
        layer_in = jnp.concatenate([hf, hb], axis=-1)
    out = layer_in[-1] @ params['fc_w'].T + params['fc_b']
    return out, jnp.stack(hn, axis=0)


# ------------------------------------- main ---------------------------------------
if __name__ == "__main__":
    input_size, hidden_size, num_layers, output_size = 16, 32, 2, 4
    B, T = 2, 8

    key = jax.random.PRNGKey(0)
    kx, kp = jax.random.split(key)
    x = jax.random.normal(kx, (B, T, input_size), jnp.float32)
    params = init_bilstm_params(kp, input_size, hidden_size, num_layers, output_size)

    run = jax.jit(functools.partial(bilstm_forward, num_layers=num_layers))
    out, hn = run(x, params)
    jax.block_until_ready((out, hn))

    assert out.shape == (B, output_size)
    assert hn.shape == (num_layers * 2, B, hidden_size)

    # Validate against a pure-JAX float32 reference (bf16 MXU casts bound the drift).
    out_ref, hn_ref = _reference_bilstm(x, params, num_layers)
    assert jnp.allclose(out, out_ref, atol=5e-2, rtol=5e-2), \
        float(jnp.max(jnp.abs(out - out_ref)))
    assert jnp.allclose(hn, hn_ref, atol=5e-2, rtol=5e-2), \
        float(jnp.max(jnp.abs(hn - hn_ref)))

    print("KERNEL_OK")
</pallas_src>

<mosaic_0001>
module attributes {stable_mosaic.version = 11 : i64} {
  func.func @_bilstm_layer_kernel(%arg0: i32, %arg1: memref<64x16xbf16, #tpu.memory_space<vmem>>, %arg2: memref<64x16xbf16, #tpu.memory_space<vmem>>, %arg3: memref<16x256xbf16, #tpu.memory_space<vmem>>, %arg4: memref<16x256xbf16, #tpu.memory_space<vmem>>, %arg5: memref<64x256xbf16, #tpu.memory_space<vmem>>, %arg6: memref<1x256xf32, #tpu.memory_space<vmem>>, %arg7: memref<64x32xbf16, #tpu.memory_space<vmem>>, %arg8: memref<64x32xbf16, #tpu.memory_space<vmem>>, %arg9: memref<8x64xf32, #tpu.memory_space<vmem>>, %arg10: memref<8x64xf32, #tpu.memory_space<vmem>>, %arg11: memref<64x256xf32, #tpu.memory_space<vmem>>, %arg12: memref<64x256xf32, #tpu.memory_space<vmem>>) attributes {dimension_semantics = [#tpu.dimension_semantics<arbitrary>], iteration_bounds = array<i64: 1>, scalar_prefetch = 0 : i64, scratch_operands = 4 : i64, tpu.core_type = #tpu.core_type<tc>, window_params = [{transform_indices = @transform_0, window_bounds = array<i64: 64, 16>}, {transform_indices = @transform_1, window_bounds = array<i64: 64, 16>}, {pipeline_mode = #tpu.pipeline_mode<synchronous>, transform_indices = @transform_2, window_bounds = array<i64: 16, 256>}, {pipeline_mode = #tpu.pipeline_mode<synchronous>, transform_indices = @transform_3, window_bounds = array<i64: 16, 256>}, {pipeline_mode = #tpu.pipeline_mode<synchronous>, transform_indices = @transform_4, window_bounds = array<i64: 64, 256>}, {pipeline_mode = #tpu.pipeline_mode<synchronous>, transform_indices = @transform_5, window_bounds = array<i64: 1, 256>}, {transform_indices = @transform_6, window_bounds = array<i64: 64, 32>}, {transform_indices = @transform_7, window_bounds = array<i64: 64, 32>}]} {
    %c0_i32 = arith.constant 0 : i32
    %0 = arith.cmpi eq, %arg0, %c0_i32 : i32
    %1 = arith.extui %0 : i1 to i32
    %c0_i32_0 = arith.constant 0 : i32
    %2 = arith.cmpi ne, %1, %c0_i32_0 : i32
    scf.if %2 {
      %cst_114 = arith.constant 0.000000e+00 : f32
      %387 = vector.broadcast %cst_114 : f32 to vector<8x64xf32>
      %c0_115 = arith.constant 0 : index
      %c0_116 = arith.constant 0 : index
      %388 = vector.load %arg9[%c0_115, %c0_116] : memref<8x64xf32, #tpu.memory_space<vmem>>, vector<8x64xf32>
      tpu.vector_store %arg9[%c0_115, %c0_116], %387 {strides = array<i32>} : memref<8x64xf32, #tpu.memory_space<vmem>>, vector<8x64xf32>,
      %cst_117 = arith.constant 0.000000e+00 : f32
      %389 = vector.broadcast %cst_117 : f32 to vector<8x64xf32>
      %c0_118 = arith.constant 0 : index
      %c0_119 = arith.constant 0 : index
      %390 = vector.load %arg10[%c0_118, %c0_119] : memref<8x64xf32, #tpu.memory_space<vmem>>, vector<8x64xf32>
      tpu.vector_store %arg10[%c0_118, %c0_119], %389 {strides = array<i32>} : memref<8x64xf32, #tpu.memory_space<vmem>>, vector<8x64xf32>,
    } else {
    }
    %c0 = arith.constant 0 : index
    %c0_1 = arith.constant 0 : index
    %3 = vector.load %arg5[%c0, %c0_1] : memref<64x256xbf16, #tpu.memory_space<vmem>>, vector<64x256xbf16>
    %c0_2 = arith.constant 0 : index
    %c0_3 = arith.constant 0 : index
    %4 = vector.load %arg6[%c0_2, %c0_3] : memref<1x256xf32, #tpu.memory_space<vmem>>, vector<1x256xf32>
    %c0_4 = arith.constant 0 : index
    %c0_5 = arith.constant 0 : index
    %5 = vector.load %arg1[%c0_4, %c0_5] : memref<64x16xbf16, #tpu.memory_space<vmem>>, vector<64x16xbf16>
    %c0_6 = arith.constant 0 : index
    %c0_7 = arith.constant 0 : index
    %6 = vector.load %arg3[%c0_6, %c0_7] : memref<16x256xbf16, #tpu.memory_space<vmem>>, vector<16x256xbf16>
    %cst = arith.constant dense<0.000000e+00> : vector<64x256xf32>
    %7 = tpu.matmul %5, %6, %cst {dimension_numbers = #tpu.dot_dimension_numbers<[1], [0], [0], [1], [0, 0, 1, 1], [], []>} : vector<64x16xbf16>, vector<16x256xbf16>, vector<64x256xf32> -> vector<64x256xf32>
    %8 = vector.broadcast %4 : vector<1x256xf32> to vector<64x256xf32>
    %9 = arith.addf %7, %8 : vector<64x256xf32>
    %c0_8 = arith.constant 0 : index
    %c0_9 = arith.constant 0 : index
    %10 = vector.load %arg11[%c0_8, %c0_9] : memref<64x256xf32, #tpu.memory_space<vmem>>, vector<64x256xf32>
    tpu.vector_store %arg11[%c0_8, %c0_9], %9 {strides = array<i32>} : memref<64x256xf32, #tpu.memory_space<vmem>>, vector<64x256xf32>,
    %c0_10 = arith.constant 0 : index
    %c0_11 = arith.constant 0 : index
    %11 = vector.load %arg2[%c0_10, %c0_11] : memref<64x16xbf16, #tpu.memory_space<vmem>>, vector<64x16xbf16>
    %c0_12 = arith.constant 0 : index
    %c0_13 = arith.constant 0 : index
    %12 = vector.load %arg4[%c0_12, %c0_13] : memref<16x256xbf16, #tpu.memory_space<vmem>>, vector<16x256xbf16>
    %cst_14 = arith.constant dense<0.000000e+00> : vector<64x256xf32>
    %13 = tpu.matmul %11, %12, %cst_14 {dimension_numbers = #tpu.dot_dimension_numbers<[1], [0], [0], [1], [0, 0, 1, 1], [], []>} : vector<64x16xbf16>, vector<16x256xbf16>, vector<64x256xf32> -> vector<64x256xf32>
    %c0_15 = arith.constant 0 : index
    %c0_16 = arith.constant 0 : index
    %14 = vector.load %arg12[%c0_15, %c0_16] : memref<64x256xf32, #tpu.memory_space<vmem>>, vector<64x256xf32>
    tpu.vector_store %arg12[%c0_15, %c0_16], %13 {strides = array<i32>} : memref<64x256xf32, #tpu.memory_space<vmem>>, vector<64x256xf32>,
    %c0_17 = arith.constant 0 : index
    %c0_18 = arith.constant 0 : index
    %15 = vector.load %arg9[%c0_17, %c0_18] : memref<8x64xf32, #tpu.memory_space<vmem>>, vector<8x64xf32>
    %c0_19 = arith.constant 0 : index
    %c0_20 = arith.constant 0 : index
    %16 = vector.load %arg10[%c0_19, %c0_20] : memref<8x64xf32, #tpu.memory_space<vmem>>, vector<8x64xf32>
    %c0_i32_21 = arith.constant 0 : i32
    %17 = arith.truncf %15 : vector<8x64xf32> to vector<8x64xbf16>
    %cst_22 = arith.constant dense<0.000000e+00> : vector<8x256xf32>
    %18 = tpu.matmul %17, %3, %cst_22 {dimension_numbers = #tpu.dot_dimension_numbers<[1], [0], [0], [1], [0, 0, 1, 1], [], []>} : vector<8x64xbf16>, vector<64x256xbf16>, vector<8x256xf32> -> vector<8x256xf32>
    %c8_i32 = arith.constant 8 : i32
    %19 = arith.muli %c0_i32_21, %c8_i32 : i32
    %20 = tpu.assume_multiple %19, 8 : i32
    %c7_i32 = arith.constant 7 : i32
    %21 = arith.subi %c7_i32, %c0_i32_21 : i32
    %c8_i32_23 = arith.constant 8 : i32
    %22 = arith.muli %21, %c8_i32_23 : i32
    %23 = tpu.assume_multiple %22, 8 : i32
    %24 = arith.index_cast %20 : i32 to index
    %c0_24 = arith.constant 0 : index
    %25 = vector.load %arg11[%24, %c0_24] : memref<64x256xf32, #tpu.memory_space<vmem>>, vector<8x256xf32>
    %26 = arith.index_cast %23 : i32 to index
    %c0_25 = arith.constant 0 : index
    %27 = vector.load %arg12[%26, %c0_25] : memref<64x256xf32, #tpu.memory_space<vmem>>, vector<8x256xf32>
    %28 = arith.addf %25, %27 : vector<8x256xf32>
    %29 = arith.addf %28, %18 : vector<8x256xf32>
    %30 = vector.extract_strided_slice %29 {offsets = [0, 0], sizes = [8, 64], strides = [1, 1]} : vector<8x256xf32> to vector<8x64xf32>
    %31 = arith.negf %30 : vector<8x64xf32>
    %32 = math.exp %31 : vector<8x64xf32>
    %cst_26 = arith.constant 1.000000e+00 : f32
    %33 = vector.broadcast %cst_26 : f32 to vector<8x64xf32>
    %34 = arith.addf %33, %32 : vector<8x64xf32>
    %35 = arith.divf %33, %34 : vector<8x64xf32>
    %36 = vector.extract_strided_slice %29 {offsets = [0, 64], sizes = [8, 64], strides = [1, 1]} : vector<8x256xf32> to vector<8x64xf32>
    %37 = arith.negf %36 : vector<8x64xf32>
    %38 = math.exp %37 : vector<8x64xf32>
    %cst_27 = arith.constant 1.000000e+00 : f32
    %39 = vector.broadcast %cst_27 : f32 to vector<8x64xf32>
    %40 = arith.addf %39, %38 : vector<8x64xf32>
    %41 = arith.divf %39, %40 : vector<8x64xf32>
    %42 = vector.extract_strided_slice %29 {offsets = [0, 128], sizes = [8, 64], strides = [1, 1]} : vector<8x256xf32> to vector<8x64xf32>
    %43 = math.tanh %42 : vector<8x64xf32>
    %44 = vector.extract_strided_slice %29 {offsets = [0, 192], sizes = [8, 64], strides = [1, 1]} : vector<8x256xf32> to vector<8x64xf32>
    %45 = arith.negf %44 : vector<8x64xf32>
    %46 = math.exp %45 : vector<8x64xf32>
    %cst_28 = arith.constant 1.000000e+00 : f32
    %47 = vector.broadcast %cst_28 : f32 to vector<8x64xf32>
    %48 = arith.addf %47, %46 : vector<8x64xf32>
    %49 = arith.divf %47, %48 : vector<8x64xf32>
    %50 = arith.mulf %41, %16 : vector<8x64xf32>
    %51 = arith.mulf %35, %43 : vector<8x64xf32>
    %52 = arith.addf %50, %51 : vector<8x64xf32>
    %53 = math.tanh %52 : vector<8x64xf32>
    %54 = arith.mulf %49, %53 : vector<8x64xf32>
    %55 = vector.extract_strided_slice %54 {offsets = [0, 0], sizes = [8, 32], strides = [1, 1]} : vector<8x64xf32> to vector<8x32xf32>
    %56 = arith.truncf %55 : vector<8x32xf32> to vector<8x32xbf16>
    %57 = arith.index_cast %20 : i32 to index
    %c0_29 = arith.constant 0 : index
    %58 = vector.load %arg7[%57, %c0_29] : memref<64x32xbf16, #tpu.memory_space<vmem>>, vector<8x32xbf16>
    tpu.vector_store %arg7[%57, %c0_29], %56 {strides = array<i32>} : memref<64x32xbf16, #tpu.memory_space<vmem>>, vector<8x32xbf16>,
    %59 = vector.extract_strided_slice %54 {offsets = [0, 32], sizes = [8, 32], strides = [1, 1]} : vector<8x64xf32> to vector<8x32xf32>
    %60 = arith.truncf %59 : vector<8x32xf32> to vector<8x32xbf16>
    %61 = arith.index_cast %23 : i32 to index
    %c0_30 = arith.constant 0 : index
    %62 = vector.load %arg8[%61, %c0_30] : memref<64x32xbf16, #tpu.memory_space<vmem>>, vector<8x32xbf16>
    tpu.vector_store %arg8[%61, %c0_30], %60 {strides = array<i32>} : memref<64x32xbf16, #tpu.memory_space<vmem>>, vector<8x32xbf16>,
    %c1_i32 = arith.constant 1 : i32
    %63 = arith.truncf %54 : vector<8x64xf32> to vector<8x64xbf16>
    %cst_31 = arith.constant dense<0.000000e+00> : vector<8x256xf32>
    %64 = tpu.matmul %63, %3, %cst_31 {dimension_numbers = #tpu.dot_dimension_numbers<[1], [0], [0], [1], [0, 0, 1, 1], [], []>} : vector<8x64xbf16>, vector<64x256xbf16>, vector<8x256xf32> -> vector<8x256xf32>
    %c8_i32_32 = arith.constant 8 : i32
    %65 = arith.muli %c1_i32, %c8_i32_32 : i32
    %66 = tpu.assume_multiple %65, 8 : i32
    %c7_i32_33 = arith.constant 7 : i32
    %67 = arith.subi %c7_i32_33, %c1_i32 : i32
    %c8_i32_34 = arith.constant 8 : i32
    %68 = arith.muli %67, %c8_i32_34 : i32
    %69 = tpu.assume_multiple %68, 8 : i32
    %70 = arith.index_cast %66 : i32 to index
    %c0_35 = arith.constant 0 : index
    %71 = vector.load %arg11[%70, %c0_35] : memref<64x256xf32, #tpu.memory_space<vmem>>, vector<8x256xf32>
    %72 = arith.index_cast %69 : i32 to index
    %c0_36 = arith.constant 0 : index
    %73 = vector.load %arg12[%72, %c0_36] : memref<64x256xf32, #tpu.memory_space<vmem>>, vector<8x256xf32>
    %74 = arith.addf %71, %73 : vector<8x256xf32>
    %75 = arith.addf %74, %64 : vector<8x256xf32>
    %76 = vector.extract_strided_slice %75 {offsets = [0, 0], sizes = [8, 64], strides = [1, 1]} : vector<8x256xf32> to vector<8x64xf32>
    %77 = arith.negf %76 : vector<8x64xf32>
    %78 = math.exp %77 : vector<8x64xf32>
    %cst_37 = arith.constant 1.000000e+00 : f32
    %79 = vector.broadcast %cst_37 : f32 to vector<8x64xf32>
    %80 = arith.addf %79, %78 : vector<8x64xf32>
    %81 = arith.divf %79, %80 : vector<8x64xf32>
    %82 = vector.extract_strided_slice %75 {offsets = [0, 64], sizes = [8, 64], strides = [1, 1]} : vector<8x256xf32> to vector<8x64xf32>
    %83 = arith.negf %82 : vector<8x64xf32>
    %84 = math.exp %83 : vector<8x64xf32>
    %cst_38 = arith.constant 1.000000e+00 : f32
    %85 = vector.broadcast %cst_38 : f32 to vector<8x64xf32>
    %86 = arith.addf %85, %84 : vector<8x64xf32>
    %87 = arith.divf %85, %86 : vector<8x64xf32>
    %88 = vector.extract_strided_slice %75 {offsets = [0, 128], sizes = [8, 64], strides = [1, 1]} : vector<8x256xf32> to vector<8x64xf32>
    %89 = math.tanh %88 : vector<8x64xf32>
    %90 = vector.extract_strided_slice %75 {offsets = [0, 192], sizes = [8, 64], strides = [1, 1]} : vector<8x256xf32> to vector<8x64xf32>
    %91 = arith.negf %90 : vector<8x64xf32>
    %92 = math.exp %91 : vector<8x64xf32>
    %cst_39 = arith.constant 1.000000e+00 : f32
    %93 = vector.broadcast %cst_39 : f32 to vector<8x64xf32>
    %94 = arith.addf %93, %92 : vector<8x64xf32>
    %95 = arith.divf %93, %94 : vector<8x64xf32>
    %96 = arith.mulf %87, %52 : vector<8x64xf32>
    %97 = arith.mulf %81, %89 : vector<8x64xf32>
    %98 = arith.addf %96, %97 : vector<8x64xf32>
    %99 = math.tanh %98 : vector<8x64xf32>
    %100 = arith.mulf %95, %99 : vector<8x64xf32>
    %101 = vector.extract_strided_slice %100 {offsets = [0, 0], sizes = [8, 32], strides = [1, 1]} : vector<8x64xf32> to vector<8x32xf32>
    %102 = arith.truncf %101 : vector<8x32xf32> to vector<8x32xbf16>
    %103 = arith.index_cast %66 : i32 to index
    %c0_40 = arith.constant 0 : index
    %104 = vector.load %arg7[%103, %c0_40] : memref<64x32xbf16, #tpu.memory_space<vmem>>, vector<8x32xbf16>
    tpu.vector_store %arg7[%103, %c0_40], %102 {strides = array<i32>} : memref<64x32xbf16, #tpu.memory_space<vmem>>, vector<8x32xbf16>,
    %105 = vector.extract_strided_slice %100 {offsets = [0, 32], sizes = [8, 32], strides = [1, 1]} : vector<8x64xf32> to vector<8x32xf32>
    %106 = arith.truncf %105 : vector<8x32xf32> to vector<8x32xbf16>
    %107 = arith.index_cast %69 : i32 to index
    %c0_41 = arith.constant 0 : index
    %108 = vector.load %arg8[%107, %c0_41] : memref<64x32xbf16, #tpu.memory_space<vmem>>, vector<8x32xbf16>
    tpu.vector_store %arg8[%107, %c0_41], %106 {strides = array<i32>} : memref<64x32xbf16, #tpu.memory_space<vmem>>, vector<8x32xbf16>,
    %c2_i32 = arith.constant 2 : i32
    %109 = arith.truncf %100 : vector<8x64xf32> to vector<8x64xbf16>
    %cst_42 = arith.constant dense<0.000000e+00> : vector<8x256xf32>
    %110 = tpu.matmul %109, %3, %cst_42 {dimension_numbers = #tpu.dot_dimension_numbers<[1], [0], [0], [1], [0, 0, 1, 1], [], []>} : vector<8x64xbf16>, vector<64x256xbf16>, vector<8x256xf32> -> vector<8x256xf32>
    %c8_i32_43 = arith.constant 8 : i32
    %111 = arith.muli %c2_i32, %c8_i32_43 : i32
    %112 = tpu.assume_multiple %111, 8 : i32
    %c7_i32_44 = arith.constant 7 : i32
    %113 = arith.subi %c7_i32_44, %c2_i32 : i32
    %c8_i32_45 = arith.constant 8 : i32
    %114 = arith.muli %113, %c8_i32_45 : i32
    %115 = tpu.assume_multiple %114, 8 : i32
    %116 = arith.index_cast %112 : i32 to index
    %c0_46 = arith.constant 0 : index
    %117 = vector.load %arg11[%116, %c0_46] : memref<64x256xf32, #tpu.memory_space<vmem>>, vector<8x256xf32>
    %118 = arith.index_cast %115 : i32 to index
    %c0_47 = arith.constant 0 : index
    %119 = vector.load %arg12[%118, %c0_47] : memref<64x256xf32, #tpu.memory_space<vmem>>, vector<8x256xf32>
    %120 = arith.addf %117, %119 : vector<8x256xf32>
    %121 = arith.addf %120, %110 : vector<8x256xf32>
    %122 = vector.extract_strided_slice %121 {offsets = [0, 0], sizes = [8, 64], strides = [1, 1]} : vector<8x256xf32> to vector<8x64xf32>
    %123 = arith.negf %122 : vector<8x64xf32>
    %124 = math.exp %123 : vector<8x64xf32>
    %cst_48 = arith.constant 1.000000e+00 : f32
    %125 = vector.broadcast %cst_48 : f32 to vector<8x64xf32>
    %126 = arith.addf %125, %124 : vector<8x64xf32>
    %127 = arith.divf %125, %126 : vector<8x64xf32>
    %128 = vector.extract_strided_slice %121 {offsets = [0, 64], sizes = [8, 64], strides = [1, 1]} : vector<8x256xf32> to vector<8x64xf32>
    %129 = arith.negf %128 : vector<8x64xf32>
    %130 = math.exp %129 : vector<8x64xf32>
    %cst_49 = arith.constant 1.000000e+00 : f32
    %131 = vector.broadcast %cst_49 : f32 to vector<8x64xf32>
    %132 = arith.addf %131, %130 : vector<8x64xf32>
    %133 = arith.divf %131, %132 : vector<8x64xf32>
    %134 = vector.extract_strided_slice %121 {offsets = [0, 128], sizes = [8, 64], strides = [1, 1]} : vector<8x256xf32> to vector<8x64xf32>
    %135 = math.tanh %134 : vector<8x64xf32>
    %136 = vector.extract_strided_slice %121 {offsets = [0, 192], sizes = [8, 64], strides = [1, 1]} : vector<8x256xf32> to vector<8x64xf32>
    %137 = arith.negf %136 : vector<8x64xf32>
    %138 = math.exp %137 : vector<8x64xf32>
    %cst_50 = arith.constant 1.000000e+00 : f32
    %139 = vector.broadcast %cst_50 : f32 to vector<8x64xf32>
    %140 = arith.addf %139, %138 : vector<8x64xf32>
    %141 = arith.divf %139, %140 : vector<8x64xf32>
    %142 = arith.mulf %133, %98 : vector<8x64xf32>
    %143 = arith.mulf %127, %135 : vector<8x64xf32>
    %144 = arith.addf %142, %143 : vector<8x64xf32>
    %145 = math.tanh %144 : vector<8x64xf32>
    %146 = arith.mulf %141, %145 : vector<8x64xf32>
    %147 = vector.extract_strided_slice %146 {offsets = [0, 0], sizes = [8, 32], strides = [1, 1]} : vector<8x64xf32> to vector<8x32xf32>
    %148 = arith.truncf %147 : vector<8x32xf32> to vector<8x32xbf16>
    %149 = arith.index_cast %112 : i32 to index
    %c0_51 = arith.constant 0 : index
    %150 = vector.load %arg7[%149, %c0_51] : memref<64x32xbf16, #tpu.memory_space<vmem>>, vector<8x32xbf16>
    tpu.vector_store %arg7[%149, %c0_51], %148 {strides = array<i32>} : memref<64x32xbf16, #tpu.memory_space<vmem>>, vector<8x32xbf16>,
    %151 = vector.extract_strided_slice %146 {offsets = [0, 32], sizes = [8, 32], strides = [1, 1]} : vector<8x64xf32> to vector<8x32xf32>
    %152 = arith.truncf %151 : vector<8x32xf32> to vector<8x32xbf16>
    %153 = arith.index_cast %115 : i32 to index
    %c0_52 = arith.constant 0 : index
    %154 = vector.load %arg8[%153, %c0_52] : memref<64x32xbf16, #tpu.memory_space<vmem>>, vector<8x32xbf16>
    tpu.vector_store %arg8[%153, %c0_52], %152 {strides = array<i32>} : memref<64x32xbf16, #tpu.memory_space<vmem>>, vector<8x32xbf16>,
    %c3_i32 = arith.constant 3 : i32
    %155 = arith.truncf %146 : vector<8x64xf32> to vector<8x64xbf16>
    %cst_53 = arith.constant dense<0.000000e+00> : vector<8x256xf32>
    %156 = tpu.matmul %155, %3, %cst_53 {dimension_numbers = #tpu.dot_dimension_numbers<[1], [0], [0], [1], [0, 0, 1, 1], [], []>} : vector<8x64xbf16>, vector<64x256xbf16>, vector<8x256xf32> -> vector<8x256xf32>
    %c8_i32_54 = arith.constant 8 : i32
    %157 = arith.muli %c3_i32, %c8_i32_54 : i32
    %158 = tpu.assume_multiple %157, 8 : i32
    %c7_i32_55 = arith.constant 7 : i32
    %159 = arith.subi %c7_i32_55, %c3_i32 : i32
    %c8_i32_56 = arith.constant 8 : i32
    %160 = arith.muli %159, %c8_i32_56 : i32
    %161 = tpu.assume_multiple %160, 8 : i32
    %162 = arith.index_cast %158 : i32 to index
    %c0_57 = arith.constant 0 : index
    %163 = vector.load %arg11[%162, %c0_57] : memref<64x256xf32, #tpu.memory_space<vmem>>, vector<8x256xf32>
    %164 = arith.index_cast %161 : i32 to index
    %c0_58 = arith.constant 0 : index
    %165 = vector.load %arg12[%164, %c0_58] : memref<64x256xf32, #tpu.memory_space<vmem>>, vector<8x256xf32>
    %166 = arith.addf %163, %165 : vector<8x256xf32>
    %167 = arith.addf %166, %156 : vector<8x256xf32>
    %168 = vector.extract_strided_slice %167 {offsets = [0, 0], sizes = [8, 64], strides = [1, 1]} : vector<8x256xf32> to vector<8x64xf32>
    %169 = arith.negf %168 : vector<8x64xf32>
    %170 = math.exp %169 : vector<8x64xf32>
    %cst_59 = arith.constant 1.000000e+00 : f32
    %171 = vector.broadcast %cst_59 : f32 to vector<8x64xf32>
    %172 = arith.addf %171, %170 : vector<8x64xf32>
    %173 = arith.divf %171, %172 : vector<8x64xf32>
    %174 = vector.extract_strided_slice %167 {offsets = [0, 64], sizes = [8, 64], strides = [1, 1]} : vector<8x256xf32> to vector<8x64xf32>
    %175 = arith.negf %174 : vector<8x64xf32>
    %176 = math.exp %175 : vector<8x64xf32>
    %cst_60 = arith.constant 1.000000e+00 : f32
    %177 = vector.broadcast %cst_60 : f32 to vector<8x64xf32>
    %178 = arith.addf %177, %176 : vector<8x64xf32>
    %179 = arith.divf %177, %178 : vector<8x64xf32>
    %180 = vector.extract_strided_slice %167 {offsets = [0, 128], sizes = [8, 64], strides = [1, 1]} : vector<8x256xf32> to vector<8x64xf32>
    %181 = math.tanh %180 : vector<8x64xf32>
    %182 = vector.extract_strided_slice %167 {offsets = [0, 192], sizes = [8, 64], strides = [1, 1]} : vector<8x256xf32> to vector<8x64xf32>
    %183 = arith.negf %182 : vector<8x64xf32>
    %184 = math.exp %183 : vector<8x64xf32>
    %cst_61 = arith.constant 1.000000e+00 : f32
    %185 = vector.broadcast %cst_61 : f32 to vector<8x64xf32>
    %186 = arith.addf %185, %184 : vector<8x64xf32>
    %187 = arith.divf %185, %186 : vector<8x64xf32>
    %188 = arith.mulf %179, %144 : vector<8x64xf32>
    %189 = arith.mulf %173, %181 : vector<8x64xf32>
    %190 = arith.addf %188, %189 : vector<8x64xf32>
    %191 = math.tanh %190 : vector<8x64xf32>
    %192 = arith.mulf %187, %191 : vector<8x64xf32>
    %193 = vector.extract_strided_slice %192 {offsets = [0, 0], sizes = [8, 32], strides = [1, 1]} : vector<8x64xf32> to vector<8x32xf32>
    %194 = arith.truncf %193 : vector<8x32xf32> to vector<8x32xbf16>
    %195 = arith.index_cast %158 : i32 to index
    %c0_62 = arith.constant 0 : index
    %196 = vector.load %arg7[%195, %c0_62] : memref<64x32xbf16, #tpu.memory_space<vmem>>, vector<8x32xbf16>
    tpu.vector_store %arg7[%195, %c0_62], %194 {strides = array<i32>} : memref<64x32xbf16, #tpu.memory_space<vmem>>, vector<8x32xbf16>,
    %197 = vector.extract_strided_slice %192 {offsets = [0, 32], sizes = [8, 32], strides = [1, 1]} : vector<8x64xf32> to vector<8x32xf32>
    %198 = arith.truncf %197 : vector<8x32xf32> to vector<8x32xbf16>
    %199 = arith.index_cast %161 : i32 to index
    %c0_63 = arith.constant 0 : index
    %200 = vector.load %arg8[%199, %c0_63] : memref<64x32xbf16, #tpu.memory_space<vmem>>, vector<8x32xbf16>
    tpu.vector_store %arg8[%199, %c0_63], %198 {strides = array<i32>} : memref<64x32xbf16, #tpu.memory_space<vmem>>, vector<8x32xbf16>,
    %c4_i32 = arith.constant 4 : i32
    %201 = arith.truncf %192 : vector<8x64xf32> to vector<8x64xbf16>
    %cst_64 = arith.constant dense<0.000000e+00> : vector<8x256xf32>
    %202 = tpu.matmul %201, %3, %cst_64 {dimension_numbers = #tpu.dot_dimension_numbers<[1], [0], [0], [1], [0, 0, 1, 1], [], []>} : vector<8x64xbf16>, vector<64x256xbf16>, vector<8x256xf32> -> vector<8x256xf32>
    %c8_i32_65 = arith.constant 8 : i32
    %203 = arith.muli %c4_i32, %c8_i32_65 : i32
    %204 = tpu.assume_multiple %203, 8 : i32
    %c7_i32_66 = arith.constant 7 : i32
    %205 = arith.subi %c7_i32_66, %c4_i32 : i32
    %c8_i32_67 = arith.constant 8 : i32
    %206 = arith.muli %205, %c8_i32_67 : i32
    %207 = tpu.assume_multiple %206, 8 : i32
    %208 = arith.index_cast %204 : i32 to index
    %c0_68 = arith.constant 0 : index
    %209 = vector.load %arg11[%208, %c0_68] : memref<64x256xf32, #tpu.memory_space<vmem>>, vector<8x256xf32>
    %210 = arith.index_cast %207 : i32 to index
    %c0_69 = arith.constant 0 : index
    %211 = vector.load %arg12[%210, %c0_69] : memref<64x256xf32, #tpu.memory_space<vmem>>, vector<8x256xf32>
    %212 = arith.addf %209, %211 : vector<8x256xf32>
    %213 = arith.addf %212, %202 : vector<8x256xf32>
    %214 = vector.extract_strided_slice %213 {offsets = [0, 0], sizes = [8, 64], strides = [1, 1]} : vector<8x256xf32> to vector<8x64xf32>
    %215 = arith.negf %214 : vector<8x64xf32>
    %216 = math.exp %215 : vector<8x64xf32>
    %cst_70 = arith.constant 1.000000e+00 : f32
    %217 = vector.broadcast %cst_70 : f32 to vector<8x64xf32>
    %218 = arith.addf %217, %216 : vector<8x64xf32>
    %219 = arith.divf %217, %218 : vector<8x64xf32>
    %220 = vector.extract_strided_slice %213 {offsets = [0, 64], sizes = [8, 64], strides = [1, 1]} : vector<8x256xf32> to vector<8x64xf32>
    %221 = arith.negf %220 : vector<8x64xf32>
    %222 = math.exp %221 : vector<8x64xf32>
    %cst_71 = arith.constant 1.000000e+00 : f32
    %223 = vector.broadcast %cst_71 : f32 to vector<8x64xf32>
    %224 = arith.addf %223, %222 : vector<8x64xf32>
    %225 = arith.divf %223, %224 : vector<8x64xf32>
    %226 = vector.extract_strided_slice %213 {offsets = [0, 128], sizes = [8, 64], strides = [1, 1]} : vector<8x256xf32> to vector<8x64xf32>
    %227 = math.tanh %226 : vector<8x64xf32>
    %228 = vector.extract_strided_slice %213 {offsets = [0, 192], sizes = [8, 64], strides = [1, 1]} : vector<8x256xf32> to vector<8x64xf32>
    %229 = arith.negf %228 : vector<8x64xf32>
    %230 = math.exp %229 : vector<8x64xf32>
    %cst_72 = arith.constant 1.000000e+00 : f32
    %231 = vector.broadcast %cst_72 : f32 to vector<8x64xf32>
    %232 = arith.addf %231, %230 : vector<8x64xf32>
    %233 = arith.divf %231, %232 : vector<8x64xf32>
    %234 = arith.mulf %225, %190 : vector<8x64xf32>
    %235 = arith.mulf %219, %227 : vector<8x64xf32>
    %236 = arith.addf %234, %235 : vector<8x64xf32>
    %237 = math.tanh %236 : vector<8x64xf32>
    %238 = arith.mulf %233, %237 : vector<8x64xf32>
    %239 = vector.extract_strided_slice %238 {offsets = [0, 0], sizes = [8, 32], strides = [1, 1]} : vector<8x64xf32> to vector<8x32xf32>
    %240 = arith.truncf %239 : vector<8x32xf32> to vector<8x32xbf16>
    %241 = arith.index_cast %204 : i32 to index
    %c0_73 = arith.constant 0 : index
    %242 = vector.load %arg7[%241, %c0_73] : memref<64x32xbf16, #tpu.memory_space<vmem>>, vector<8x32xbf16>
    tpu.vector_store %arg7[%241, %c0_73], %240 {strides = array<i32>} : memref<64x32xbf16, #tpu.memory_space<vmem>>, vector<8x32xbf16>,
    %243 = vector.extract_strided_slice %238 {offsets = [0, 32], sizes = [8, 32], strides = [1, 1]} : vector<8x64xf32> to vector<8x32xf32>
    %244 = arith.truncf %243 : vector<8x32xf32> to vector<8x32xbf16>
    %245 = arith.index_cast %207 : i32 to index
    %c0_74 = arith.constant 0 : index
    %246 = vector.load %arg8[%245, %c0_74] : memref<64x32xbf16, #tpu.memory_space<vmem>>, vector<8x32xbf16>
    tpu.vector_store %arg8[%245, %c0_74], %244 {strides = array<i32>} : memref<64x32xbf16, #tpu.memory_space<vmem>>, vector<8x32xbf16>,
    %c5_i32 = arith.constant 5 : i32
    %247 = arith.truncf %238 : vector<8x64xf32> to vector<8x64xbf16>
    %cst_75 = arith.constant dense<0.000000e+00> : vector<8x256xf32>
    %248 = tpu.matmul %247, %3, %cst_75 {dimension_numbers = #tpu.dot_dimension_numbers<[1], [0], [0], [1], [0, 0, 1, 1], [], []>} : vector<8x64xbf16>, vector<64x256xbf16>, vector<8x256xf32> -> vector<8x256xf32>
    %c8_i32_76 = arith.constant 8 : i32
    %249 = arith.muli %c5_i32, %c8_i32_76 : i32
    %250 = tpu.assume_multiple %249, 8 : i32
    %c7_i32_77 = arith.constant 7 : i32
    %251 = arith.subi %c7_i32_77, %c5_i32 : i32
    %c8_i32_78 = arith.constant 8 : i32
    %252 = arith.muli %251, %c8_i32_78 : i32
    %253 = tpu.assume_multiple %252, 8 : i32
    %254 = arith.index_cast %250 : i32 to index
    %c0_79 = arith.constant 0 : index
    %255 = vector.load %arg11[%254, %c0_79] : memref<64x256xf32, #tpu.memory_space<vmem>>, vector<8x256xf32>
    %256 = arith.index_cast %253 : i32 to index
    %c0_80 = arith.constant 0 : index
    %257 = vector.load %arg12[%256, %c0_80] : memref<64x256xf32, #tpu.memory_space<vmem>>, vector<8x256xf32>
    %258 = arith.addf %255, %257 : vector<8x256xf32>
    %259 = arith.addf %258, %248 : vector<8x256xf32>
    %260 = vector.extract_strided_slice %259 {offsets = [0, 0], sizes = [8, 64], strides = [1, 1]} : vector<8x256xf32> to vector<8x64xf32>
    %261 = arith.negf %260 : vector<8x64xf32>
    %262 = math.exp %261 : vector<8x64xf32>
    %cst_81 = arith.constant 1.000000e+00 : f32
    %263 = vector.broadcast %cst_81 : f32 to vector<8x64xf32>
    %264 = arith.addf %263, %262 : vector<8x64xf32>
    %265 = arith.divf %263, %264 : vector<8x64xf32>
    %266 = vector.extract_strided_slice %259 {offsets = [0, 64], sizes = [8, 64], strides = [1, 1]} : vector<8x256xf32> to vector<8x64xf32>
    %267 = arith.negf %266 : vector<8x64xf32>
    %268 = math.exp %267 : vector<8x64xf32>
    %cst_82 = arith.constant 1.000000e+00 : f32
    %269 = vector.broadcast %cst_82 : f32 to vector<8x64xf32>
    %270 = arith.addf %269, %268 : vector<8x64xf32>
    %271 = arith.divf %269, %270 : vector<8x64xf32>
    %272 = vector.extract_strided_slice %259 {offsets = [0, 128], sizes = [8, 64], strides = [1, 1]} : vector<8x256xf32> to vector<8x64xf32>
    %273 = math.tanh %272 : vector<8x64xf32>
    %274 = vector.extract_strided_slice %259 {offsets = [0, 192], sizes = [8, 64], strides = [1, 1]} : vector<8x256xf32> to vector<8x64xf32>
    %275 = arith.negf %274 : vector<8x64xf32>
    %276 = math.exp %275 : vector<8x64xf32>
    %cst_83 = arith.constant 1.000000e+00 : f32
    %277 = vector.broadcast %cst_83 : f32 to vector<8x64xf32>
    %278 = arith.addf %277, %276 : vector<8x64xf32>
    %279 = arith.divf %277, %278 : vector<8x64xf32>
    %280 = arith.mulf %271, %236 : vector<8x64xf32>
    %281 = arith.mulf %265, %273 : vector<8x64xf32>
    %282 = arith.addf %280, %281 : vector<8x64xf32>
    %283 = math.tanh %282 : vector<8x64xf32>
    %284 = arith.mulf %279, %283 : vector<8x64xf32>
    %285 = vector.extract_strided_slice %284 {offsets = [0, 0], sizes = [8, 32], strides = [1, 1]} : vector<8x64xf32> to vector<8x32xf32>
    %286 = arith.truncf %285 : vector<8x32xf32> to vector<8x32xbf16>
    %287 = arith.index_cast %250 : i32 to index
    %c0_84 = arith.constant 0 : index
    %288 = vector.load %arg7[%287, %c0_84] : memref<64x32xbf16, #tpu.memory_space<vmem>>, vector<8x32xbf16>
    tpu.vector_store %arg7[%287, %c0_84], %286 {strides = array<i32>} : memref<64x32xbf16, #tpu.memory_space<vmem>>, vector<8x32xbf16>,
    %289 = vector.extract_strided_slice %284 {offsets = [0, 32], sizes = [8, 32], strides = [1, 1]} : vector<8x64xf32> to vector<8x32xf32>
    %290 = arith.truncf %289 : vector<8x32xf32> to vector<8x32xbf16>
    %291 = arith.index_cast %253 : i32 to index
    %c0_85 = arith.constant 0 : index
    %292 = vector.load %arg8[%291, %c0_85] : memref<64x32xbf16, #tpu.memory_space<vmem>>, vector<8x32xbf16>
    tpu.vector_store %arg8[%291, %c0_85], %290 {strides = array<i32>} : memref<64x32xbf16, #tpu.memory_space<vmem>>, vector<8x32xbf16>,
    %c6_i32 = arith.constant 6 : i32
    %293 = arith.truncf %284 : vector<8x64xf32> to vector<8x64xbf16>
    %cst_86 = arith.constant dense<0.000000e+00> : vector<8x256xf32>
    %294 = tpu.matmul %293, %3, %cst_86 {dimension_numbers = #tpu.dot_dimension_numbers<[1], [0], [0], [1], [0, 0, 1, 1], [], []>} : vector<8x64xbf16>, vector<64x256xbf16>, vector<8x256xf32> -> vector<8x256xf32>
    %c8_i32_87 = arith.constant 8 : i32
    %295 = arith.muli %c6_i32, %c8_i32_87 : i32
    %296 = tpu.assume_multiple %295, 8 : i32
    %c7_i32_88 = arith.constant 7 : i32
    %297 = arith.subi %c7_i32_88, %c6_i32 : i32
    %c8_i32_89 = arith.constant 8 : i32
    %298 = arith.muli %297, %c8_i32_89 : i32
    %299 = tpu.assume_multiple %298, 8 : i32
    %300 = arith.index_cast %296 : i32 to index
    %c0_90 = arith.constant 0 : index
    %301 = vector.load %arg11[%300, %c0_90] : memref<64x256xf32, #tpu.memory_space<vmem>>, vector<8x256xf32>
    %302 = arith.index_cast %299 : i32 to index
    %c0_91 = arith.constant 0 : index
    %303 = vector.load %arg12[%302, %c0_91] : memref<64x256xf32, #tpu.memory_space<vmem>>, vector<8x256xf32>
    %304 = arith.addf %301, %303 : vector<8x256xf32>
    %305 = arith.addf %304, %294 : vector<8x256xf32>
    %306 = vector.extract_strided_slice %305 {offsets = [0, 0], sizes = [8, 64], strides = [1, 1]} : vector<8x256xf32> to vector<8x64xf32>
    %307 = arith.negf %306 : vector<8x64xf32>
    %308 = math.exp %307 : vector<8x64xf32>
    %cst_92 = arith.constant 1.000000e+00 : f32
    %309 = vector.broadcast %cst_92 : f32 to vector<8x64xf32>
    %310 = arith.addf %309, %308 : vector<8x64xf32>
    %311 = arith.divf %309, %310 : vector<8x64xf32>
    %312 = vector.extract_strided_slice %305 {offsets = [0, 64], sizes = [8, 64], strides = [1, 1]} : vector<8x256xf32> to vector<8x64xf32>
    %313 = arith.negf %312 : vector<8x64xf32>
    %314 = math.exp %313 : vector<8x64xf32>
    %cst_93 = arith.constant 1.000000e+00 : f32
    %315 = vector.broadcast %cst_93 : f32 to vector<8x64xf32>
    %316 = arith.addf %315, %314 : vector<8x64xf32>
    %317 = arith.divf %315, %316 : vector<8x64xf32>
    %318 = vector.extract_strided_slice %305 {offsets = [0, 128], sizes = [8, 64], strides = [1, 1]} : vector<8x256xf32> to vector<8x64xf32>
    %319 = math.tanh %318 : vector<8x64xf32>
    %320 = vector.extract_strided_slice %305 {offsets = [0, 192], sizes = [8, 64], strides = [1, 1]} : vector<8x256xf32> to vector<8x64xf32>
    %321 = arith.negf %320 : vector<8x64xf32>
    %322 = math.exp %321 : vector<8x64xf32>
    %cst_94 = arith.constant 1.000000e+00 : f32
    %323 = vector.broadcast %cst_94 : f32 to vector<8x64xf32>
    %324 = arith.addf %323, %322 : vector<8x64xf32>
    %325 = arith.divf %323, %324 : vector<8x64xf32>
    %326 = arith.mulf %317, %282 : vector<8x64xf32>
    %327 = arith.mulf %311, %319 : vector<8x64xf32>
    %328 = arith.addf %326, %327 : vector<8x64xf32>
    %329 = math.tanh %328 : vector<8x64xf32>
    %330 = arith.mulf %325, %329 : vector<8x64xf32>
    %331 = vector.extract_strided_slice %330 {offsets = [0, 0], sizes = [8, 32], strides = [1, 1]} : vector<8x64xf32> to vector<8x32xf32>
    %332 = arith.truncf %331 : vector<8x32xf32> to vector<8x32xbf16>
    %333 = arith.index_cast %296 : i32 to index
    %c0_95 = arith.constant 0 : index
    %334 = vector.load %arg7[%333, %c0_95] : memref<64x32xbf16, #tpu.memory_space<vmem>>, vector<8x32xbf16>
    tpu.vector_store %arg7[%333, %c0_95], %332 {strides = array<i32>} : memref<64x32xbf16, #tpu.memory_space<vmem>>, vector<8x32xbf16>,
    %335 = vector.extract_strided_slice %330 {offsets = [0, 32], sizes = [8, 32], strides = [1, 1]} : vector<8x64xf32> to vector<8x32xf32>
    %336 = arith.truncf %335 : vector<8x32xf32> to vector<8x32xbf16>
    %337 = arith.index_cast %299 : i32 to index
    %c0_96 = arith.constant 0 : index
    %338 = vector.load %arg8[%337, %c0_96] : memref<64x32xbf16, #tpu.memory_space<vmem>>, vector<8x32xbf16>
    tpu.vector_store %arg8[%337, %c0_96], %336 {strides = array<i32>} : memref<64x32xbf16, #tpu.memory_space<vmem>>, vector<8x32xbf16>,
    %c7_i32_97 = arith.constant 7 : i32
    %339 = arith.truncf %330 : vector<8x64xf32> to vector<8x64xbf16>
    %cst_98 = arith.constant dense<0.000000e+00> : vector<8x256xf32>
    %340 = tpu.matmul %339, %3, %cst_98 {dimension_numbers = #tpu.dot_dimension_numbers<[1], [0], [0], [1], [0, 0, 1, 1], [], []>} : vector<8x64xbf16>, vector<64x256xbf16>, vector<8x256xf32> -> vector<8x256xf32>
    %c8_i32_99 = arith.constant 8 : i32
    %341 = arith.muli %c7_i32_97, %c8_i32_99 : i32
    %342 = tpu.assume_multiple %341, 8 : i32
    %c7_i32_100 = arith.constant 7 : i32
    %343 = arith.subi %c7_i32_100, %c7_i32_97 : i32
    %c8_i32_101 = arith.constant 8 : i32
    %344 = arith.muli %343, %c8_i32_101 : i32
    %345 = tpu.assume_multiple %344, 8 : i32
    %346 = arith.index_cast %342 : i32 to index
    %c0_102 = arith.constant 0 : index
    %347 = vector.load %arg11[%346, %c0_102] : memref<64x256xf32, #tpu.memory_space<vmem>>, vector<8x256xf32>
    %348 = arith.index_cast %345 : i32 to index
    %c0_103 = arith.constant 0 : index
    %349 = vector.load %arg12[%348, %c0_103] : memref<64x256xf32, #tpu.memory_space<vmem>>, vector<8x256xf32>
    %350 = arith.addf %347, %349 : vector<8x256xf32>
    %351 = arith.addf %350, %340 : vector<8x256xf32>
    %352 = vector.extract_strided_slice %351 {offsets = [0, 0], sizes = [8, 64], strides = [1, 1]} : vector<8x256xf32> to vector<8x64xf32>
    %353 = arith.negf %352 : vector<8x64xf32>
    %354 = math.exp %353 : vector<8x64xf32>
    %cst_104 = arith.constant 1.000000e+00 : f32
    %355 = vector.broadcast %cst_104 : f32 to vector<8x64xf32>
    %356 = arith.addf %355, %354 : vector<8x64xf32>
    %357 = arith.divf %355, %356 : vector<8x64xf32>
    %358 = vector.extract_strided_slice %351 {offsets = [0, 64], sizes = [8, 64], strides = [1, 1]} : vector<8x256xf32> to vector<8x64xf32>
    %359 = arith.negf %358 : vector<8x64xf32>
    %360 = math.exp %359 : vector<8x64xf32>
    %cst_105 = arith.constant 1.000000e+00 : f32
    %361 = vector.broadcast %cst_105 : f32 to vector<8x64xf32>
    %362 = arith.addf %361, %360 : vector<8x64xf32>
    %363 = arith.divf %361, %362 : vector<8x64xf32>
    %364 = vector.extract_strided_slice %351 {offsets = [0, 128], sizes = [8, 64], strides = [1, 1]} : vector<8x256xf32> to vector<8x64xf32>
    %365 = math.tanh %364 : vector<8x64xf32>
    %366 = vector.extract_strided_slice %351 {offsets = [0, 192], sizes = [8, 64], strides = [1, 1]} : vector<8x256xf32> to vector<8x64xf32>
    %367 = arith.negf %366 : vector<8x64xf32>
    %368 = math.exp %367 : vector<8x64xf32>
    %cst_106 = arith.constant 1.000000e+00 : f32
    %369 = vector.broadcast %cst_106 : f32 to vector<8x64xf32>
    %370 = arith.addf %369, %368 : vector<8x64xf32>
    %371 = arith.divf %369, %370 : vector<8x64xf32>
    %372 = arith.mulf %363, %328 : vector<8x64xf32>
    %373 = arith.mulf %357, %365 : vector<8x64xf32>
    %374 = arith.addf %372, %373 : vector<8x64xf32>
    %375 = math.tanh %374 : vector<8x64xf32>
    %376 = arith.mulf %371, %375 : vector<8x64xf32>
    %377 = vector.extract_strided_slice %376 {offsets = [0, 0], sizes = [8, 32], strides = [1, 1]} : vector<8x64xf32> to vector<8x32xf32>
    %378 = arith.truncf %377 : vector<8x32xf32> to vector<8x32xbf16>
    %379 = arith.index_cast %342 : i32 to index
    %c0_107 = arith.constant 0 : index
    %380 = vector.load %arg7[%379, %c0_107] : memref<64x32xbf16, #tpu.memory_space<vmem>>, vector<8x32xbf16>
    tpu.vector_store %arg7[%379, %c0_107], %378 {strides = array<i32>} : memref<64x32xbf16, #tpu.memory_space<vmem>>, vector<8x32xbf16>,
    %381 = vector.extract_strided_slice %376 {offsets = [0, 32], sizes = [8, 32], strides = [1, 1]} : vector<8x64xf32> to vector<8x32xf32>
    %382 = arith.truncf %381 : vector<8x32xf32> to vector<8x32xbf16>
    %383 = arith.index_cast %345 : i32 to index
    %c0_108 = arith.constant 0 : index
    %384 = vector.load %arg8[%383, %c0_108] : memref<64x32xbf16, #tpu.memory_space<vmem>>, vector<8x32xbf16>
    tpu.vector_store %arg8[%383, %c0_108], %382 {strides = array<i32>} : memref<64x32xbf16, #tpu.memory_space<vmem>>, vector<8x32xbf16>,
    %c8_i32_109 = arith.constant 8 : i32
    %c0_110 = arith.constant 0 : index
    %c0_111 = arith.constant 0 : index
    %385 = vector.load %arg9[%c0_110, %c0_111] : memref<8x64xf32, #tpu.memory_space<vmem>>, vector<8x64xf32>
    tpu.vector_store %arg9[%c0_110, %c0_111], %376 {strides = array<i32>} : memref<8x64xf32, #tpu.memory_space<vmem>>, vector<8x64xf32>,
    %c0_112 = arith.constant 0 : index
    %c0_113 = arith.constant 0 : index
    %386 = vector.load %arg10[%c0_112, %c0_113] : memref<8x64xf32, #tpu.memory_space<vmem>>, vector<8x64xf32>
    tpu.vector_store %arg10[%c0_112, %c0_113], %374 {strides = array<i32>} : memref<8x64xf32, #tpu.memory_space<vmem>>, vector<8x64xf32>,
    return
  }
  func.func @transform_0(%arg0: i32) -> (i32, i32) {
    %c0_i32 = arith.constant 0 : i32
    %c0_i32_0 = arith.constant 0 : i32
    return %arg0, %c0_i32 : i32, i32
  }
  func.func @transform_1(%arg0: i32) -> (i32, i32) {
    %c0_i32 = arith.constant 0 : i32
    %0 = arith.subi %c0_i32, %arg0 : i32
    %c0_i32_0 = arith.constant 0 : i32
    %c0_i32_1 = arith.constant 0 : i32
    return %0, %c0_i32_0 : i32, i32
  }
  func.func @transform_2(%arg0: i32) -> (i32, i32) {
    %c0_i32 = arith.constant 0 : i32
    %c0_i32_0 = arith.constant 0 : i32
    %c0_i32_1 = arith.constant 0 : i32
    return %c0_i32, %c0_i32_0 : i32, i32
  }
  func.func @transform_3(%arg0: i32) -> (i32, i32) {
    %c0_i32 = arith.constant 0 : i32
    %c0_i32_0 = arith.constant 0 : i32
    %c0_i32_1 = arith.constant 0 : i32
    return %c0_i32, %c0_i32_0 : i32, i32
  }
  func.func @transform_4(%arg0: i32) -> (i32, i32) {
    %c0_i32 = arith.constant 0 : i32
    %c0_i32_0 = arith.constant 0 : i32
    %c0_i32_1 = arith.constant 0 : i32
    return %c0_i32, %c0_i32_0 : i32, i32
  }
  func.func @transform_5(%arg0: i32) -> (i32, i32) {
    %c0_i32 = arith.constant 0 : i32
    %c0_i32_0 = arith.constant 0 : i32
    %c0_i32_1 = arith.constant 0 : i32
    return %c0_i32, %c0_i32_0 : i32, i32
  }
  func.func @transform_6(%arg0: i32) -> (i32, i32) {
    %c0_i32 = arith.constant 0 : i32
    %c0_i32_0 = arith.constant 0 : i32
    return %arg0, %c0_i32 : i32, i32
  }
  func.func @transform_7(%arg0: i32) -> (i32, i32) {
    %c0_i32 = arith.constant 0 : i32
    %0 = arith.subi %c0_i32, %arg0 : i32
    %c0_i32_0 = arith.constant 0 : i32
    %c0_i32_1 = arith.constant 0 : i32
    return %0, %c0_i32_0 : i32, i32
  }
}

module attributes {stable_mosaic.version = 11 : i64} {
  func.func @_bilstm_layer_kernel(%arg0: i32, %arg1: memref<64x32xbf16, #tpu.memory_space<vmem>>, %arg2: memref<64x32xbf16, #tpu.memory_space<vmem>>, %arg3: memref<64x32xbf16, #tpu.memory_space<vmem>>, %arg4: memref<64x32xbf16, #tpu.memory_space<vmem>>, %arg5: memref<32x256xbf16, #tpu.memory_space<vmem>>, %arg6: memref<32x256xbf16, #tpu.memory_space<vmem>>, %arg7: memref<32x256xbf16, #tpu.memory_space<vmem>>, %arg8: memref<32x256xbf16, #tpu.memory_space<vmem>>, %arg9: memref<64x256xbf16, #tpu.memory_space<vmem>>, %arg10: memref<1x256xf32, #tpu.memory_space<vmem>>, %arg11: memref<64x32xbf16, #tpu.memory_space<vmem>>, %arg12: memref<64x32xbf16, #tpu.memory_space<vmem>>, %arg13: memref<8x64xf32, #tpu.memory_space<vmem>>, %arg14: memref<8x64xf32, #tpu.memory_space<vmem>>, %arg15: memref<64x256xf32, #tpu.memory_space<vmem>>, %arg16: memref<64x256xf32, #tpu.memory_space<vmem>>) attributes {dimension_semantics = [#tpu.dimension_semantics<arbitrary>], iteration_bounds = array<i64: 1>, scalar_prefetch = 0 : i64, scratch_operands = 4 : i64, tpu.core_type = #tpu.core_type<tc>, window_params = [{transform_indices = @transform_0, window_bounds = array<i64: 64, 32>}, {transform_indices = @transform_1, window_bounds = array<i64: 64, 32>}, {transform_indices = @transform_2, window_bounds = array<i64: 64, 32>}, {transform_indices = @transform_3, window_bounds = array<i64: 64, 32>}, {pipeline_mode = #tpu.pipeline_mode<synchronous>, transform_indices = @transform_4, window_bounds = array<i64: 32, 256>}, {pipeline_mode = #tpu.pipeline_mode<synchronous>, transform_indices = @transform_5, window_bounds = array<i64: 32, 256>}, {pipeline_mode = #tpu.pipeline_mode<synchronous>, transform_indices = @transform_6, window_bounds = array<i64: 32, 256>}, {pipeline_mode = #tpu.pipeline_mode<synchronous>, transform_indices = @transform_7, window_bounds = array<i64: 32, 256>}, {pipeline_mode = #tpu.pipeline_mode<synchronous>, transform_indices = @transform_8, window_bounds = array<i64: 64, 256>}, {pipeline_mode = #tpu.pipeline_mode<synchronous>, transform_indices = @transform_9, window_bounds = array<i64: 1, 256>}, {transform_indices = @transform_10, window_bounds = array<i64: 64, 32>}, {transform_indices = @transform_11, window_bounds = array<i64: 64, 32>}]} {
    %c0_i32 = arith.constant 0 : i32
    %0 = arith.cmpi eq, %arg0, %c0_i32 : i32
    %1 = arith.extui %0 : i1 to i32
    %c0_i32_0 = arith.constant 0 : i32
    %2 = arith.cmpi ne, %1, %c0_i32_0 : i32
    scf.if %2 {
      %cst_124 = arith.constant 0.000000e+00 : f32
      %395 = vector.broadcast %cst_124 : f32 to vector<8x64xf32>
      %c0_125 = arith.constant 0 : index
      %c0_126 = arith.constant 0 : index
      %396 = vector.load %arg13[%c0_125, %c0_126] : memref<8x64xf32, #tpu.memory_space<vmem>>, vector<8x64xf32>
      tpu.vector_store %arg13[%c0_125, %c0_126], %395 {strides = array<i32>} : memref<8x64xf32, #tpu.memory_space<vmem>>, vector<8x64xf32>,
      %cst_127 = arith.constant 0.000000e+00 : f32
      %397 = vector.broadcast %cst_127 : f32 to vector<8x64xf32>
      %c0_128 = arith.constant 0 : index
      %c0_129 = arith.constant 0 : index
      %398 = vector.load %arg14[%c0_128, %c0_129] : memref<8x64xf32, #tpu.memory_space<vmem>>, vector<8x64xf32>
      tpu.vector_store %arg14[%c0_128, %c0_129], %397 {strides = array<i32>} : memref<8x64xf32, #tpu.memory_space<vmem>>, vector<8x64xf32>,
    } else {
    }
    %c0 = arith.constant 0 : index
    %c0_1 = arith.constant 0 : index
    %3 = vector.load %arg9[%c0, %c0_1] : memref<64x256xbf16, #tpu.memory_space<vmem>>, vector<64x256xbf16>
    %c0_2 = arith.constant 0 : index
    %c0_3 = arith.constant 0 : index
    %4 = vector.load %arg10[%c0_2, %c0_3] : memref<1x256xf32, #tpu.memory_space<vmem>>, vector<1x256xf32>
    %c0_4 = arith.constant 0 : index
    %c0_5 = arith.constant 0 : index
    %5 = vector.load %arg1[%c0_4, %c0_5] : memref<64x32xbf16, #tpu.memory_space<vmem>>, vector<64x32xbf16>
    %c0_6 = arith.constant 0 : index
    %c0_7 = arith.constant 0 : index
    %6 = vector.load %arg5[%c0_6, %c0_7] : memref<32x256xbf16, #tpu.memory_space<vmem>>, vector<32x256xbf16>
    %cst = arith.constant dense<0.000000e+00> : vector<64x256xf32>
    %7 = tpu.matmul %5, %6, %cst {dimension_numbers = #tpu.dot_dimension_numbers<[1], [0], [0], [1], [0, 0, 1, 1], [], []>} : vector<64x32xbf16>, vector<32x256xbf16>, vector<64x256xf32> -> vector<64x256xf32>
    %c0_8 = arith.constant 0 : index
    %c0_9 = arith.constant 0 : index
    %8 = vector.load %arg2[%c0_8, %c0_9] : memref<64x32xbf16, #tpu.memory_space<vmem>>, vector<64x32xbf16>
    %c0_10 = arith.constant 0 : index
    %c0_11 = arith.constant 0 : index
    %9 = vector.load %arg6[%c0_10, %c0_11] : memref<32x256xbf16, #tpu.memory_space<vmem>>, vector<32x256xbf16>
    %cst_12 = arith.constant dense<0.000000e+00> : vector<64x256xf32>
    %10 = tpu.matmul %8, %9, %cst_12 {dimension_numbers = #tpu.dot_dimension_numbers<[1], [0], [0], [1], [0, 0, 1, 1], [], []>} : vector<64x32xbf16>, vector<32x256xbf16>, vector<64x256xf32> -> vector<64x256xf32>
    %11 = arith.addf %7, %10 : vector<64x256xf32>
    %12 = vector.broadcast %4 : vector<1x256xf32> to vector<64x256xf32>
    %13 = arith.addf %11, %12 : vector<64x256xf32>
    %c0_13 = arith.constant 0 : index
    %c0_14 = arith.constant 0 : index
    %14 = vector.load %arg15[%c0_13, %c0_14] : memref<64x256xf32, #tpu.memory_space<vmem>>, vector<64x256xf32>
    tpu.vector_store %arg15[%c0_13, %c0_14], %13 {strides = array<i32>} : memref<64x256xf32, #tpu.memory_space<vmem>>, vector<64x256xf32>,
    %c0_15 = arith.constant 0 : index
    %c0_16 = arith.constant 0 : index
    %15 = vector.load %arg3[%c0_15, %c0_16] : memref<64x32xbf16, #tpu.memory_space<vmem>>, vector<64x32xbf16>
    %c0_17 = arith.constant 0 : index
    %c0_18 = arith.constant 0 : index
    %16 = vector.load %arg7[%c0_17, %c0_18] : memref<32x256xbf16, #tpu.memory_space<vmem>>, vector<32x256xbf16>
    %cst_19 = arith.constant dense<0.000000e+00> : vector<64x256xf32>
    %17 = tpu.matmul %15, %16, %cst_19 {dimension_numbers = #tpu.dot_dimension_numbers<[1], [0], [0], [1], [0, 0, 1, 1], [], []>} : vector<64x32xbf16>, vector<32x256xbf16>, vector<64x256xf32> -> vector<64x256xf32>
    %c0_20 = arith.constant 0 : index
    %c0_21 = arith.constant 0 : index
    %18 = vector.load %arg4[%c0_20, %c0_21] : memref<64x32xbf16, #tpu.memory_space<vmem>>, vector<64x32xbf16>
    %c0_22 = arith.constant 0 : index
    %c0_23 = arith.constant 0 : index
    %19 = vector.load %arg8[%c0_22, %c0_23] : memref<32x256xbf16, #tpu.memory_space<vmem>>, vector<32x256xbf16>
    %cst_24 = arith.constant dense<0.000000e+00> : vector<64x256xf32>
    %20 = tpu.matmul %18, %19, %cst_24 {dimension_numbers = #tpu.dot_dimension_numbers<[1], [0], [0], [1], [0, 0, 1, 1], [], []>} : vector<64x32xbf16>, vector<32x256xbf16>, vector<64x256xf32> -> vector<64x256xf32>
    %21 = arith.addf %17, %20 : vector<64x256xf32>
    %c0_25 = arith.constant 0 : index
    %c0_26 = arith.constant 0 : index
    %22 = vector.load %arg16[%c0_25, %c0_26] : memref<64x256xf32, #tpu.memory_space<vmem>>, vector<64x256xf32>
    tpu.vector_store %arg16[%c0_25, %c0_26], %21 {strides = array<i32>} : memref<64x256xf32, #tpu.memory_space<vmem>>, vector<64x256xf32>,
    %c0_27 = arith.constant 0 : index
    %c0_28 = arith.constant 0 : index
    %23 = vector.load %arg13[%c0_27, %c0_28] : memref<8x64xf32, #tpu.memory_space<vmem>>, vector<8x64xf32>
    %c0_29 = arith.constant 0 : index
    %c0_30 = arith.constant 0 : index
    %24 = vector.load %arg14[%c0_29, %c0_30] : memref<8x64xf32, #tpu.memory_space<vmem>>, vector<8x64xf32>
    %c0_i32_31 = arith.constant 0 : i32
    %25 = arith.truncf %23 : vector<8x64xf32> to vector<8x64xbf16>
    %cst_32 = arith.constant dense<0.000000e+00> : vector<8x256xf32>
    %26 = tpu.matmul %25, %3, %cst_32 {dimension_numbers = #tpu.dot_dimension_numbers<[1], [0], [0], [1], [0, 0, 1, 1], [], []>} : vector<8x64xbf16>, vector<64x256xbf16>, vector<8x256xf32> -> vector<8x256xf32>
    %c8_i32 = arith.constant 8 : i32
    %27 = arith.muli %c0_i32_31, %c8_i32 : i32
    %28 = tpu.assume_multiple %27, 8 : i32
    %c7_i32 = arith.constant 7 : i32
    %29 = arith.subi %c7_i32, %c0_i32_31 : i32
    %c8_i32_33 = arith.constant 8 : i32
    %30 = arith.muli %29, %c8_i32_33 : i32
    %31 = tpu.assume_multiple %30, 8 : i32
    %32 = arith.index_cast %28 : i32 to index
    %c0_34 = arith.constant 0 : index
    %33 = vector.load %arg15[%32, %c0_34] : memref<64x256xf32, #tpu.memory_space<vmem>>, vector<8x256xf32>
    %34 = arith.index_cast %31 : i32 to index
    %c0_35 = arith.constant 0 : index
    %35 = vector.load %arg16[%34, %c0_35] : memref<64x256xf32, #tpu.memory_space<vmem>>, vector<8x256xf32>
    %36 = arith.addf %33, %35 : vector<8x256xf32>
    %37 = arith.addf %36, %26 : vector<8x256xf32>
    %38 = vector.extract_strided_slice %37 {offsets = [0, 0], sizes = [8, 64], strides = [1, 1]} : vector<8x256xf32> to vector<8x64xf32>
    %39 = arith.negf %38 : vector<8x64xf32>
    %40 = math.exp %39 : vector<8x64xf32>
    %cst_36 = arith.constant 1.000000e+00 : f32
    %41 = vector.broadcast %cst_36 : f32 to vector<8x64xf32>
    %42 = arith.addf %41, %40 : vector<8x64xf32>
    %43 = arith.divf %41, %42 : vector<8x64xf32>
    %44 = vector.extract_strided_slice %37 {offsets = [0, 64], sizes = [8, 64], strides = [1, 1]} : vector<8x256xf32> to vector<8x64xf32>
    %45 = arith.negf %44 : vector<8x64xf32>
    %46 = math.exp %45 : vector<8x64xf32>
    %cst_37 = arith.constant 1.000000e+00 : f32
    %47 = vector.broadcast %cst_37 : f32 to vector<8x64xf32>
    %48 = arith.addf %47, %46 : vector<8x64xf32>
    %49 = arith.divf %47, %48 : vector<8x64xf32>
    %50 = vector.extract_strided_slice %37 {offsets = [0, 128], sizes = [8, 64], strides = [1, 1]} : vector<8x256xf32> to vector<8x64xf32>
    %51 = math.tanh %50 : vector<8x64xf32>
    %52 = vector.extract_strided_slice %37 {offsets = [0, 192], sizes = [8, 64], strides = [1, 1]} : vector<8x256xf32> to vector<8x64xf32>
    %53 = arith.negf %52 : vector<8x64xf32>
    %54 = math.exp %53 : vector<8x64xf32>
    %cst_38 = arith.constant 1.000000e+00 : f32
    %55 = vector.broadcast %cst_38 : f32 to vector<8x64xf32>
    %56 = arith.addf %55, %54 : vector<8x64xf32>
    %57 = arith.divf %55, %56 : vector<8x64xf32>
    %58 = arith.mulf %49, %24 : vector<8x64xf32>
    %59 = arith.mulf %43, %51 : vector<8x64xf32>
    %60 = arith.addf %58, %59 : vector<8x64xf32>
    %61 = math.tanh %60 : vector<8x64xf32>
    %62 = arith.mulf %57, %61 : vector<8x64xf32>
    %63 = vector.extract_strided_slice %62 {offsets = [0, 0], sizes = [8, 32], strides = [1, 1]} : vector<8x64xf32> to vector<8x32xf32>
    %64 = arith.truncf %63 : vector<8x32xf32> to vector<8x32xbf16>
    %65 = arith.index_cast %28 : i32 to index
    %c0_39 = arith.constant 0 : index
    %66 = vector.load %arg11[%65, %c0_39] : memref<64x32xbf16, #tpu.memory_space<vmem>>, vector<8x32xbf16>
    tpu.vector_store %arg11[%65, %c0_39], %64 {strides = array<i32>} : memref<64x32xbf16, #tpu.memory_space<vmem>>, vector<8x32xbf16>,
    %67 = vector.extract_strided_slice %62 {offsets = [0, 32], sizes = [8, 32], strides = [1, 1]} : vector<8x64xf32> to vector<8x32xf32>
    %68 = arith.truncf %67 : vector<8x32xf32> to vector<8x32xbf16>
    %69 = arith.index_cast %31 : i32 to index
    %c0_40 = arith.constant 0 : index
    %70 = vector.load %arg12[%69, %c0_40] : memref<64x32xbf16, #tpu.memory_space<vmem>>, vector<8x32xbf16>
    tpu.vector_store %arg12[%69, %c0_40], %68 {strides = array<i32>} : memref<64x32xbf16, #tpu.memory_space<vmem>>, vector<8x32xbf16>,
    %c1_i32 = arith.constant 1 : i32
    %71 = arith.truncf %62 : vector<8x64xf32> to vector<8x64xbf16>
    %cst_41 = arith.constant dense<0.000000e+00> : vector<8x256xf32>
    %72 = tpu.matmul %71, %3, %cst_41 {dimension_numbers = #tpu.dot_dimension_numbers<[1], [0], [0], [1], [0, 0, 1, 1], [], []>} : vector<8x64xbf16>, vector<64x256xbf16>, vector<8x256xf32> -> vector<8x256xf32>
    %c8_i32_42 = arith.constant 8 : i32
    %73 = arith.muli %c1_i32, %c8_i32_42 : i32
    %74 = tpu.assume_multiple %73, 8 : i32
    %c7_i32_43 = arith.constant 7 : i32
    %75 = arith.subi %c7_i32_43, %c1_i32 : i32
    %c8_i32_44 = arith.constant 8 : i32
    %76 = arith.muli %75, %c8_i32_44 : i32
    %77 = tpu.assume_multiple %76, 8 : i32
    %78 = arith.index_cast %74 : i32 to index
    %c0_45 = arith.constant 0 : index
    %79 = vector.load %arg15[%78, %c0_45] : memref<64x256xf32, #tpu.memory_space<vmem>>, vector<8x256xf32>
    %80 = arith.index_cast %77 : i32 to index
    %c0_46 = arith.constant 0 : index
    %81 = vector.load %arg16[%80, %c0_46] : memref<64x256xf32, #tpu.memory_space<vmem>>, vector<8x256xf32>
    %82 = arith.addf %79, %81 : vector<8x256xf32>
    %83 = arith.addf %82, %72 : vector<8x256xf32>
    %84 = vector.extract_strided_slice %83 {offsets = [0, 0], sizes = [8, 64], strides = [1, 1]} : vector<8x256xf32> to vector<8x64xf32>
    %85 = arith.negf %84 : vector<8x64xf32>
    %86 = math.exp %85 : vector<8x64xf32>
    %cst_47 = arith.constant 1.000000e+00 : f32
    %87 = vector.broadcast %cst_47 : f32 to vector<8x64xf32>
    %88 = arith.addf %87, %86 : vector<8x64xf32>
    %89 = arith.divf %87, %88 : vector<8x64xf32>
    %90 = vector.extract_strided_slice %83 {offsets = [0, 64], sizes = [8, 64], strides = [1, 1]} : vector<8x256xf32> to vector<8x64xf32>
    %91 = arith.negf %90 : vector<8x64xf32>
    %92 = math.exp %91 : vector<8x64xf32>
    %cst_48 = arith.constant 1.000000e+00 : f32
    %93 = vector.broadcast %cst_48 : f32 to vector<8x64xf32>
    %94 = arith.addf %93, %92 : vector<8x64xf32>
    %95 = arith.divf %93, %94 : vector<8x64xf32>
    %96 = vector.extract_strided_slice %83 {offsets = [0, 128], sizes = [8, 64], strides = [1, 1]} : vector<8x256xf32> to vector<8x64xf32>
    %97 = math.tanh %96 : vector<8x64xf32>
    %98 = vector.extract_strided_slice %83 {offsets = [0, 192], sizes = [8, 64], strides = [1, 1]} : vector<8x256xf32> to vector<8x64xf32>
    %99 = arith.negf %98 : vector<8x64xf32>
    %100 = math.exp %99 : vector<8x64xf32>
    %cst_49 = arith.constant 1.000000e+00 : f32
    %101 = vector.broadcast %cst_49 : f32 to vector<8x64xf32>
    %102 = arith.addf %101, %100 : vector<8x64xf32>
    %103 = arith.divf %101, %102 : vector<8x64xf32>
    %104 = arith.mulf %95, %60 : vector<8x64xf32>
    %105 = arith.mulf %89, %97 : vector<8x64xf32>
    %106 = arith.addf %104, %105 : vector<8x64xf32>
    %107 = math.tanh %106 : vector<8x64xf32>
    %108 = arith.mulf %103, %107 : vector<8x64xf32>
    %109 = vector.extract_strided_slice %108 {offsets = [0, 0], sizes = [8, 32], strides = [1, 1]} : vector<8x64xf32> to vector<8x32xf32>
    %110 = arith.truncf %109 : vector<8x32xf32> to vector<8x32xbf16>
    %111 = arith.index_cast %74 : i32 to index
    %c0_50 = arith.constant 0 : index
    %112 = vector.load %arg11[%111, %c0_50] : memref<64x32xbf16, #tpu.memory_space<vmem>>, vector<8x32xbf16>
    tpu.vector_store %arg11[%111, %c0_50], %110 {strides = array<i32>} : memref<64x32xbf16, #tpu.memory_space<vmem>>, vector<8x32xbf16>,
    %113 = vector.extract_strided_slice %108 {offsets = [0, 32], sizes = [8, 32], strides = [1, 1]} : vector<8x64xf32> to vector<8x32xf32>
    %114 = arith.truncf %113 : vector<8x32xf32> to vector<8x32xbf16>
    %115 = arith.index_cast %77 : i32 to index
    %c0_51 = arith.constant 0 : index
    %116 = vector.load %arg12[%115, %c0_51] : memref<64x32xbf16, #tpu.memory_space<vmem>>, vector<8x32xbf16>
    tpu.vector_store %arg12[%115, %c0_51], %114 {strides = array<i32>} : memref<64x32xbf16, #tpu.memory_space<vmem>>, vector<8x32xbf16>,
    %c2_i32 = arith.constant 2 : i32
    %117 = arith.truncf %108 : vector<8x64xf32> to vector<8x64xbf16>
    %cst_52 = arith.constant dense<0.000000e+00> : vector<8x256xf32>
    %118 = tpu.matmul %117, %3, %cst_52 {dimension_numbers = #tpu.dot_dimension_numbers<[1], [0], [0], [1], [0, 0, 1, 1], [], []>} : vector<8x64xbf16>, vector<64x256xbf16>, vector<8x256xf32> -> vector<8x256xf32>
    %c8_i32_53 = arith.constant 8 : i32
    %119 = arith.muli %c2_i32, %c8_i32_53 : i32
    %120 = tpu.assume_multiple %119, 8 : i32
    %c7_i32_54 = arith.constant 7 : i32
    %121 = arith.subi %c7_i32_54, %c2_i32 : i32
    %c8_i32_55 = arith.constant 8 : i32
    %122 = arith.muli %121, %c8_i32_55 : i32
    %123 = tpu.assume_multiple %122, 8 : i32
    %124 = arith.index_cast %120 : i32 to index
    %c0_56 = arith.constant 0 : index
    %125 = vector.load %arg15[%124, %c0_56] : memref<64x256xf32, #tpu.memory_space<vmem>>, vector<8x256xf32>
    %126 = arith.index_cast %123 : i32 to index
    %c0_57 = arith.constant 0 : index
    %127 = vector.load %arg16[%126, %c0_57] : memref<64x256xf32, #tpu.memory_space<vmem>>, vector<8x256xf32>
    %128 = arith.addf %125, %127 : vector<8x256xf32>
    %129 = arith.addf %128, %118 : vector<8x256xf32>
    %130 = vector.extract_strided_slice %129 {offsets = [0, 0], sizes = [8, 64], strides = [1, 1]} : vector<8x256xf32> to vector<8x64xf32>
    %131 = arith.negf %130 : vector<8x64xf32>
    %132 = math.exp %131 : vector<8x64xf32>
    %cst_58 = arith.constant 1.000000e+00 : f32
    %133 = vector.broadcast %cst_58 : f32 to vector<8x64xf32>
    %134 = arith.addf %133, %132 : vector<8x64xf32>
    %135 = arith.divf %133, %134 : vector<8x64xf32>
    %136 = vector.extract_strided_slice %129 {offsets = [0, 64], sizes = [8, 64], strides = [1, 1]} : vector<8x256xf32> to vector<8x64xf32>
    %137 = arith.negf %136 : vector<8x64xf32>
    %138 = math.exp %137 : vector<8x64xf32>
    %cst_59 = arith.constant 1.000000e+00 : f32
    %139 = vector.broadcast %cst_59 : f32 to vector<8x64xf32>
    %140 = arith.addf %139, %138 : vector<8x64xf32>
    %141 = arith.divf %139, %140 : vector<8x64xf32>
    %142 = vector.extract_strided_slice %129 {offsets = [0, 128], sizes = [8, 64], strides = [1, 1]} : vector<8x256xf32> to vector<8x64xf32>
    %143 = math.tanh %142 : vector<8x64xf32>
    %144 = vector.extract_strided_slice %129 {offsets = [0, 192], sizes = [8, 64], strides = [1, 1]} : vector<8x256xf32> to vector<8x64xf32>
    %145 = arith.negf %144 : vector<8x64xf32>
    %146 = math.exp %145 : vector<8x64xf32>
    %cst_60 = arith.constant 1.000000e+00 : f32
    %147 = vector.broadcast %cst_60 : f32 to vector<8x64xf32>
    %148 = arith.addf %147, %146 : vector<8x64xf32>
    %149 = arith.divf %147, %148 : vector<8x64xf32>
    %150 = arith.mulf %141, %106 : vector<8x64xf32>
    %151 = arith.mulf %135, %143 : vector<8x64xf32>
    %152 = arith.addf %150, %151 : vector<8x64xf32>
    %153 = math.tanh %152 : vector<8x64xf32>
    %154 = arith.mulf %149, %153 : vector<8x64xf32>
    %155 = vector.extract_strided_slice %154 {offsets = [0, 0], sizes = [8, 32], strides = [1, 1]} : vector<8x64xf32> to vector<8x32xf32>
    %156 = arith.truncf %155 : vector<8x32xf32> to vector<8x32xbf16>
    %157 = arith.index_cast %120 : i32 to index
    %c0_61 = arith.constant 0 : index
    %158 = vector.load %arg11[%157, %c0_61] : memref<64x32xbf16, #tpu.memory_space<vmem>>, vector<8x32xbf16>
    tpu.vector_store %arg11[%157, %c0_61], %156 {strides = array<i32>} : memref<64x32xbf16, #tpu.memory_space<vmem>>, vector<8x32xbf16>,
    %159 = vector.extract_strided_slice %154 {offsets = [0, 32], sizes = [8, 32], strides = [1, 1]} : vector<8x64xf32> to vector<8x32xf32>
    %160 = arith.truncf %159 : vector<8x32xf32> to vector<8x32xbf16>
    %161 = arith.index_cast %123 : i32 to index
    %c0_62 = arith.constant 0 : index
    %162 = vector.load %arg12[%161, %c0_62] : memref<64x32xbf16, #tpu.memory_space<vmem>>, vector<8x32xbf16>
    tpu.vector_store %arg12[%161, %c0_62], %160 {strides = array<i32>} : memref<64x32xbf16, #tpu.memory_space<vmem>>, vector<8x32xbf16>,
    %c3_i32 = arith.constant 3 : i32
    %163 = arith.truncf %154 : vector<8x64xf32> to vector<8x64xbf16>
    %cst_63 = arith.constant dense<0.000000e+00> : vector<8x256xf32>
    %164 = tpu.matmul %163, %3, %cst_63 {dimension_numbers = #tpu.dot_dimension_numbers<[1], [0], [0], [1], [0, 0, 1, 1], [], []>} : vector<8x64xbf16>, vector<64x256xbf16>, vector<8x256xf32> -> vector<8x256xf32>
    %c8_i32_64 = arith.constant 8 : i32
    %165 = arith.muli %c3_i32, %c8_i32_64 : i32
    %166 = tpu.assume_multiple %165, 8 : i32
    %c7_i32_65 = arith.constant 7 : i32
    %167 = arith.subi %c7_i32_65, %c3_i32 : i32
    %c8_i32_66 = arith.constant 8 : i32
    %168 = arith.muli %167, %c8_i32_66 : i32
    %169 = tpu.assume_multiple %168, 8 : i32
    %170 = arith.index_cast %166 : i32 to index
    %c0_67 = arith.constant 0 : index
    %171 = vector.load %arg15[%170, %c0_67] : memref<64x256xf32, #tpu.memory_space<vmem>>, vector<8x256xf32>
    %172 = arith.index_cast %169 : i32 to index
    %c0_68 = arith.constant 0 : index
    %173 = vector.load %arg16[%172, %c0_68] : memref<64x256xf32, #tpu.memory_space<vmem>>, vector<8x256xf32>
    %174 = arith.addf %171, %173 : vector<8x256xf32>
    %175 = arith.addf %174, %164 : vector<8x256xf32>
    %176 = vector.extract_strided_slice %175 {offsets = [0, 0], sizes = [8, 64], strides = [1, 1]} : vector<8x256xf32> to vector<8x64xf32>
    %177 = arith.negf %176 : vector<8x64xf32>
    %178 = math.exp %177 : vector<8x64xf32>
    %cst_69 = arith.constant 1.000000e+00 : f32
    %179 = vector.broadcast %cst_69 : f32 to vector<8x64xf32>
    %180 = arith.addf %179, %178 : vector<8x64xf32>
    %181 = arith.divf %179, %180 : vector<8x64xf32>
    %182 = vector.extract_strided_slice %175 {offsets = [0, 64], sizes = [8, 64], strides = [1, 1]} : vector<8x256xf32> to vector<8x64xf32>
    %183 = arith.negf %182 : vector<8x64xf32>
    %184 = math.exp %183 : vector<8x64xf32>
    %cst_70 = arith.constant 1.000000e+00 : f32
    %185 = vector.broadcast %cst_70 : f32 to vector<8x64xf32>
    %186 = arith.addf %185, %184 : vector<8x64xf32>
    %187 = arith.divf %185, %186 : vector<8x64xf32>
    %188 = vector.extract_strided_slice %175 {offsets = [0, 128], sizes = [8, 64], strides = [1, 1]} : vector<8x256xf32> to vector<8x64xf32>
    %189 = math.tanh %188 : vector<8x64xf32>
    %190 = vector.extract_strided_slice %175 {offsets = [0, 192], sizes = [8, 64], strides = [1, 1]} : vector<8x256xf32> to vector<8x64xf32>
    %191 = arith.negf %190 : vector<8x64xf32>
    %192 = math.exp %191 : vector<8x64xf32>
    %cst_71 = arith.constant 1.000000e+00 : f32
    %193 = vector.broadcast %cst_71 : f32 to vector<8x64xf32>
    %194 = arith.addf %193, %192 : vector<8x64xf32>
    %195 = arith.divf %193, %194 : vector<8x64xf32>
    %196 = arith.mulf %187, %152 : vector<8x64xf32>
    %197 = arith.mulf %181, %189 : vector<8x64xf32>
    %198 = arith.addf %196, %197 : vector<8x64xf32>
    %199 = math.tanh %198 : vector<8x64xf32>
    %200 = arith.mulf %195, %199 : vector<8x64xf32>
    %201 = vector.extract_strided_slice %200 {offsets = [0, 0], sizes = [8, 32], strides = [1, 1]} : vector<8x64xf32> to vector<8x32xf32>
    %202 = arith.truncf %201 : vector<8x32xf32> to vector<8x32xbf16>
    %203 = arith.index_cast %166 : i32 to index
    %c0_72 = arith.constant 0 : index
    %204 = vector.load %arg11[%203, %c0_72] : memref<64x32xbf16, #tpu.memory_space<vmem>>, vector<8x32xbf16>
    tpu.vector_store %arg11[%203, %c0_72], %202 {strides = array<i32>} : memref<64x32xbf16, #tpu.memory_space<vmem>>, vector<8x32xbf16>,
    %205 = vector.extract_strided_slice %200 {offsets = [0, 32], sizes = [8, 32], strides = [1, 1]} : vector<8x64xf32> to vector<8x32xf32>
    %206 = arith.truncf %205 : vector<8x32xf32> to vector<8x32xbf16>
    %207 = arith.index_cast %169 : i32 to index
    %c0_73 = arith.constant 0 : index
    %208 = vector.load %arg12[%207, %c0_73] : memref<64x32xbf16, #tpu.memory_space<vmem>>, vector<8x32xbf16>
    tpu.vector_store %arg12[%207, %c0_73], %206 {strides = array<i32>} : memref<64x32xbf16, #tpu.memory_space<vmem>>, vector<8x32xbf16>,
    %c4_i32 = arith.constant 4 : i32
    %209 = arith.truncf %200 : vector<8x64xf32> to vector<8x64xbf16>
    %cst_74 = arith.constant dense<0.000000e+00> : vector<8x256xf32>
    %210 = tpu.matmul %209, %3, %cst_74 {dimension_numbers = #tpu.dot_dimension_numbers<[1], [0], [0], [1], [0, 0, 1, 1], [], []>} : vector<8x64xbf16>, vector<64x256xbf16>, vector<8x256xf32> -> vector<8x256xf32>
    %c8_i32_75 = arith.constant 8 : i32
    %211 = arith.muli %c4_i32, %c8_i32_75 : i32
    %212 = tpu.assume_multiple %211, 8 : i32
    %c7_i32_76 = arith.constant 7 : i32
    %213 = arith.subi %c7_i32_76, %c4_i32 : i32
    %c8_i32_77 = arith.constant 8 : i32
    %214 = arith.muli %213, %c8_i32_77 : i32
    %215 = tpu.assume_multiple %214, 8 : i32
    %216 = arith.index_cast %212 : i32 to index
    %c0_78 = arith.constant 0 : index
    %217 = vector.load %arg15[%216, %c0_78] : memref<64x256xf32, #tpu.memory_space<vmem>>, vector<8x256xf32>
    %218 = arith.index_cast %215 : i32 to index
    %c0_79 = arith.constant 0 : index
    %219 = vector.load %arg16[%218, %c0_79] : memref<64x256xf32, #tpu.memory_space<vmem>>, vector<8x256xf32>
    %220 = arith.addf %217, %219 : vector<8x256xf32>
    %221 = arith.addf %220, %210 : vector<8x256xf32>
    %222 = vector.extract_strided_slice %221 {offsets = [0, 0], sizes = [8, 64], strides = [1, 1]} : vector<8x256xf32> to vector<8x64xf32>
    %223 = arith.negf %222 : vector<8x64xf32>
    %224 = math.exp %223 : vector<8x64xf32>
    %cst_80 = arith.constant 1.000000e+00 : f32
    %225 = vector.broadcast %cst_80 : f32 to vector<8x64xf32>
    %226 = arith.addf %225, %224 : vector<8x64xf32>
    %227 = arith.divf %225, %226 : vector<8x64xf32>
    %228 = vector.extract_strided_slice %221 {offsets = [0, 64], sizes = [8, 64], strides = [1, 1]} : vector<8x256xf32> to vector<8x64xf32>
    %229 = arith.negf %228 : vector<8x64xf32>
    %230 = math.exp %229 : vector<8x64xf32>
    %cst_81 = arith.constant 1.000000e+00 : f32
    %231 = vector.broadcast %cst_81 : f32 to vector<8x64xf32>
    %232 = arith.addf %231, %230 : vector<8x64xf32>
    %233 = arith.divf %231, %232 : vector<8x64xf32>
    %234 = vector.extract_strided_slice %221 {offsets = [0, 128], sizes = [8, 64], strides = [1, 1]} : vector<8x256xf32> to vector<8x64xf32>
    %235 = math.tanh %234 : vector<8x64xf32>
    %236 = vector.extract_strided_slice %221 {offsets = [0, 192], sizes = [8, 64], strides = [1, 1]} : vector<8x256xf32> to vector<8x64xf32>
    %237 = arith.negf %236 : vector<8x64xf32>
    %238 = math.exp %237 : vector<8x64xf32>
    %cst_82 = arith.constant 1.000000e+00 : f32
    %239 = vector.broadcast %cst_82 : f32 to vector<8x64xf32>
    %240 = arith.addf %239, %238 : vector<8x64xf32>
    %241 = arith.divf %239, %240 : vector<8x64xf32>
    %242 = arith.mulf %233, %198 : vector<8x64xf32>
    %243 = arith.mulf %227, %235 : vector<8x64xf32>
    %244 = arith.addf %242, %243 : vector<8x64xf32>
    %245 = math.tanh %244 : vector<8x64xf32>
    %246 = arith.mulf %241, %245 : vector<8x64xf32>
    %247 = vector.extract_strided_slice %246 {offsets = [0, 0], sizes = [8, 32], strides = [1, 1]} : vector<8x64xf32> to vector<8x32xf32>
    %248 = arith.truncf %247 : vector<8x32xf32> to vector<8x32xbf16>
    %249 = arith.index_cast %212 : i32 to index
    %c0_83 = arith.constant 0 : index
    %250 = vector.load %arg11[%249, %c0_83] : memref<64x32xbf16, #tpu.memory_space<vmem>>, vector<8x32xbf16>
    tpu.vector_store %arg11[%249, %c0_83], %248 {strides = array<i32>} : memref<64x32xbf16, #tpu.memory_space<vmem>>, vector<8x32xbf16>,
    %251 = vector.extract_strided_slice %246 {offsets = [0, 32], sizes = [8, 32], strides = [1, 1]} : vector<8x64xf32> to vector<8x32xf32>
    %252 = arith.truncf %251 : vector<8x32xf32> to vector<8x32xbf16>
    %253 = arith.index_cast %215 : i32 to index
    %c0_84 = arith.constant 0 : index
    %254 = vector.load %arg12[%253, %c0_84] : memref<64x32xbf16, #tpu.memory_space<vmem>>, vector<8x32xbf16>
    tpu.vector_store %arg12[%253, %c0_84], %252 {strides = array<i32>} : memref<64x32xbf16, #tpu.memory_space<vmem>>, vector<8x32xbf16>,
    %c5_i32 = arith.constant 5 : i32
    %255 = arith.truncf %246 : vector<8x64xf32> to vector<8x64xbf16>
    %cst_85 = arith.constant dense<0.000000e+00> : vector<8x256xf32>
    %256 = tpu.matmul %255, %3, %cst_85 {dimension_numbers = #tpu.dot_dimension_numbers<[1], [0], [0], [1], [0, 0, 1, 1], [], []>} : vector<8x64xbf16>, vector<64x256xbf16>, vector<8x256xf32> -> vector<8x256xf32>
    %c8_i32_86 = arith.constant 8 : i32
    %257 = arith.muli %c5_i32, %c8_i32_86 : i32
    %258 = tpu.assume_multiple %257, 8 : i32
    %c7_i32_87 = arith.constant 7 : i32
    %259 = arith.subi %c7_i32_87, %c5_i32 : i32
    %c8_i32_88 = arith.constant 8 : i32
    %260 = arith.muli %259, %c8_i32_88 : i32
    %261 = tpu.assume_multiple %260, 8 : i32
    %262 = arith.index_cast %258 : i32 to index
    %c0_89 = arith.constant 0 : index
    %263 = vector.load %arg15[%262, %c0_89] : memref<64x256xf32, #tpu.memory_space<vmem>>, vector<8x256xf32>
    %264 = arith.index_cast %261 : i32 to index
    %c0_90 = arith.constant 0 : index
    %265 = vector.load %arg16[%264, %c0_90] : memref<64x256xf32, #tpu.memory_space<vmem>>, vector<8x256xf32>
    %266 = arith.addf %263, %265 : vector<8x256xf32>
    %267 = arith.addf %266, %256 : vector<8x256xf32>
    %268 = vector.extract_strided_slice %267 {offsets = [0, 0], sizes = [8, 64], strides = [1, 1]} : vector<8x256xf32> to vector<8x64xf32>
    %269 = arith.negf %268 : vector<8x64xf32>
    %270 = math.exp %269 : vector<8x64xf32>
    %cst_91 = arith.constant 1.000000e+00 : f32
    %271 = vector.broadcast %cst_91 : f32 to vector<8x64xf32>
    %272 = arith.addf %271, %270 : vector<8x64xf32>
    %273 = arith.divf %271, %272 : vector<8x64xf32>
    %274 = vector.extract_strided_slice %267 {offsets = [0, 64], sizes = [8, 64], strides = [1, 1]} : vector<8x256xf32> to vector<8x64xf32>
    %275 = arith.negf %274 : vector<8x64xf32>
    %276 = math.exp %275 : vector<8x64xf32>
    %cst_92 = arith.constant 1.000000e+00 : f32
    %277 = vector.broadcast %cst_92 : f32 to vector<8x64xf32>
    %278 = arith.addf %277, %276 : vector<8x64xf32>
    %279 = arith.divf %277, %278 : vector<8x64xf32>
    %280 = vector.extract_strided_slice %267 {offsets = [0, 128], sizes = [8, 64], strides = [1, 1]} : vector<8x256xf32> to vector<8x64xf32>
    %281 = math.tanh %280 : vector<8x64xf32>
    %282 = vector.extract_strided_slice %267 {offsets = [0, 192], sizes = [8, 64], strides = [1, 1]} : vector<8x256xf32> to vector<8x64xf32>
    %283 = arith.negf %282 : vector<8x64xf32>
    %284 = math.exp %283 : vector<8x64xf32>
    %cst_93 = arith.constant 1.000000e+00 : f32
    %285 = vector.broadcast %cst_93 : f32 to vector<8x64xf32>
    %286 = arith.addf %285, %284 : vector<8x64xf32>
    %287 = arith.divf %285, %286 : vector<8x64xf32>
    %288 = arith.mulf %279, %244 : vector<8x64xf32>
    %289 = arith.mulf %273, %281 : vector<8x64xf32>
    %290 = arith.addf %288, %289 : vector<8x64xf32>
    %291 = math.tanh %290 : vector<8x64xf32>
    %292 = arith.mulf %287, %291 : vector<8x64xf32>
    %293 = vector.extract_strided_slice %292 {offsets = [0, 0], sizes = [8, 32], strides = [1, 1]} : vector<8x64xf32> to vector<8x32xf32>
    %294 = arith.truncf %293 : vector<8x32xf32> to vector<8x32xbf16>
    %295 = arith.index_cast %258 : i32 to index
    %c0_94 = arith.constant 0 : index
    %296 = vector.load %arg11[%295, %c0_94] : memref<64x32xbf16, #tpu.memory_space<vmem>>, vector<8x32xbf16>
    tpu.vector_store %arg11[%295, %c0_94], %294 {strides = array<i32>} : memref<64x32xbf16, #tpu.memory_space<vmem>>, vector<8x32xbf16>,
    %297 = vector.extract_strided_slice %292 {offsets = [0, 32], sizes = [8, 32], strides = [1, 1]} : vector<8x64xf32> to vector<8x32xf32>
    %298 = arith.truncf %297 : vector<8x32xf32> to vector<8x32xbf16>
    %299 = arith.index_cast %261 : i32 to index
    %c0_95 = arith.constant 0 : index
    %300 = vector.load %arg12[%299, %c0_95] : memref<64x32xbf16, #tpu.memory_space<vmem>>, vector<8x32xbf16>
    tpu.vector_store %arg12[%299, %c0_95], %298 {strides = array<i32>} : memref<64x32xbf16, #tpu.memory_space<vmem>>, vector<8x32xbf16>,
    %c6_i32 = arith.constant 6 : i32
    %301 = arith.truncf %292 : vector<8x64xf32> to vector<8x64xbf16>
    %cst_96 = arith.constant dense<0.000000e+00> : vector<8x256xf32>
    %302 = tpu.matmul %301, %3, %cst_96 {dimension_numbers = #tpu.dot_dimension_numbers<[1], [0], [0], [1], [0, 0, 1, 1], [], []>} : vector<8x64xbf16>, vector<64x256xbf16>, vector<8x256xf32> -> vector<8x256xf32>
    %c8_i32_97 = arith.constant 8 : i32
    %303 = arith.muli %c6_i32, %c8_i32_97 : i32
    %304 = tpu.assume_multiple %303, 8 : i32
    %c7_i32_98 = arith.constant 7 : i32
    %305 = arith.subi %c7_i32_98, %c6_i32 : i32
    %c8_i32_99 = arith.constant 8 : i32
    %306 = arith.muli %305, %c8_i32_99 : i32
    %307 = tpu.assume_multiple %306, 8 : i32
    %308 = arith.index_cast %304 : i32 to index
    %c0_100 = arith.constant 0 : index
    %309 = vector.load %arg15[%308, %c0_100] : memref<64x256xf32, #tpu.memory_space<vmem>>, vector<8x256xf32>
    %310 = arith.index_cast %307 : i32 to index
    %c0_101 = arith.constant 0 : index
    %311 = vector.load %arg16[%310, %c0_101] : memref<64x256xf32, #tpu.memory_space<vmem>>, vector<8x256xf32>
    %312 = arith.addf %309, %311 : vector<8x256xf32>
    %313 = arith.addf %312, %302 : vector<8x256xf32>
    %314 = vector.extract_strided_slice %313 {offsets = [0, 0], sizes = [8, 64], strides = [1, 1]} : vector<8x256xf32> to vector<8x64xf32>
    %315 = arith.negf %314 : vector<8x64xf32>
    %316 = math.exp %315 : vector<8x64xf32>
    %cst_102 = arith.constant 1.000000e+00 : f32
    %317 = vector.broadcast %cst_102 : f32 to vector<8x64xf32>
    %318 = arith.addf %317, %316 : vector<8x64xf32>
    %319 = arith.divf %317, %318 : vector<8x64xf32>
    %320 = vector.extract_strided_slice %313 {offsets = [0, 64], sizes = [8, 64], strides = [1, 1]} : vector<8x256xf32> to vector<8x64xf32>
    %321 = arith.negf %320 : vector<8x64xf32>
    %322 = math.exp %321 : vector<8x64xf32>
    %cst_103 = arith.constant 1.000000e+00 : f32
    %323 = vector.broadcast %cst_103 : f32 to vector<8x64xf32>
    %324 = arith.addf %323, %322 : vector<8x64xf32>
    %325 = arith.divf %323, %324 : vector<8x64xf32>
    %326 = vector.extract_strided_slice %313 {offsets = [0, 128], sizes = [8, 64], strides = [1, 1]} : vector<8x256xf32> to vector<8x64xf32>
    %327 = math.tanh %326 : vector<8x64xf32>
    %328 = vector.extract_strided_slice %313 {offsets = [0, 192], sizes = [8, 64], strides = [1, 1]} : vector<8x256xf32> to vector<8x64xf32>
    %329 = arith.negf %328 : vector<8x64xf32>
    %330 = math.exp %329 : vector<8x64xf32>
    %cst_104 = arith.constant 1.000000e+00 : f32
    %331 = vector.broadcast %cst_104 : f32 to vector<8x64xf32>
    %332 = arith.addf %331, %330 : vector<8x64xf32>
    %333 = arith.divf %331, %332 : vector<8x64xf32>
    %334 = arith.mulf %325, %290 : vector<8x64xf32>
    %335 = arith.mulf %319, %327 : vector<8x64xf32>
    %336 = arith.addf %334, %335 : vector<8x64xf32>
    %337 = math.tanh %336 : vector<8x64xf32>
    %338 = arith.mulf %333, %337 : vector<8x64xf32>
    %339 = vector.extract_strided_slice %338 {offsets = [0, 0], sizes = [8, 32], strides = [1, 1]} : vector<8x64xf32> to vector<8x32xf32>
    %340 = arith.truncf %339 : vector<8x32xf32> to vector<8x32xbf16>
    %341 = arith.index_cast %304 : i32 to index
    %c0_105 = arith.constant 0 : index
    %342 = vector.load %arg11[%341, %c0_105] : memref<64x32xbf16, #tpu.memory_space<vmem>>, vector<8x32xbf16>
    tpu.vector_store %arg11[%341, %c0_105], %340 {strides = array<i32>} : memref<64x32xbf16, #tpu.memory_space<vmem>>, vector<8x32xbf16>,
    %343 = vector.extract_strided_slice %338 {offsets = [0, 32], sizes = [8, 32], strides = [1, 1]} : vector<8x64xf32> to vector<8x32xf32>
    %344 = arith.truncf %343 : vector<8x32xf32> to vector<8x32xbf16>
    %345 = arith.index_cast %307 : i32 to index
    %c0_106 = arith.constant 0 : index
    %346 = vector.load %arg12[%345, %c0_106] : memref<64x32xbf16, #tpu.memory_space<vmem>>, vector<8x32xbf16>
    tpu.vector_store %arg12[%345, %c0_106], %344 {strides = array<i32>} : memref<64x32xbf16, #tpu.memory_space<vmem>>, vector<8x32xbf16>,
    %c7_i32_107 = arith.constant 7 : i32
    %347 = arith.truncf %338 : vector<8x64xf32> to vector<8x64xbf16>
    %cst_108 = arith.constant dense<0.000000e+00> : vector<8x256xf32>
    %348 = tpu.matmul %347, %3, %cst_108 {dimension_numbers = #tpu.dot_dimension_numbers<[1], [0], [0], [1], [0, 0, 1, 1], [], []>} : vector<8x64xbf16>, vector<64x256xbf16>, vector<8x256xf32> -> vector<8x256xf32>
    %c8_i32_109 = arith.constant 8 : i32
    %349 = arith.muli %c7_i32_107, %c8_i32_109 : i32
    %350 = tpu.assume_multiple %349, 8 : i32
    %c7_i32_110 = arith.constant 7 : i32
    %351 = arith.subi %c7_i32_110, %c7_i32_107 : i32
    %c8_i32_111 = arith.constant 8 : i32
    %352 = arith.muli %351, %c8_i32_111 : i32
    %353 = tpu.assume_multiple %352, 8 : i32
    %354 = arith.index_cast %350 : i32 to index
    %c0_112 = arith.constant 0 : index
    %355 = vector.load %arg15[%354, %c0_112] : memref<64x256xf32, #tpu.memory_space<vmem>>, vector<8x256xf32>
    %356 = arith.index_cast %353 : i32 to index
    %c0_113 = arith.constant 0 : index
    %357 = vector.load %arg16[%356, %c0_113] : memref<64x256xf32, #tpu.memory_space<vmem>>, vector<8x256xf32>
    %358 = arith.addf %355, %357 : vector<8x256xf32>
    %359 = arith.addf %358, %348 : vector<8x256xf32>
    %360 = vector.extract_strided_slice %359 {offsets = [0, 0], sizes = [8, 64], strides = [1, 1]} : vector<8x256xf32> to vector<8x64xf32>
    %361 = arith.negf %360 : vector<8x64xf32>
    %362 = math.exp %361 : vector<8x64xf32>
    %cst_114 = arith.constant 1.000000e+00 : f32
    %363 = vector.broadcast %cst_114 : f32 to vector<8x64xf32>
    %364 = arith.addf %363, %362 : vector<8x64xf32>
    %365 = arith.divf %363, %364 : vector<8x64xf32>
    %366 = vector.extract_strided_slice %359 {offsets = [0, 64], sizes = [8, 64], strides = [1, 1]} : vector<8x256xf32> to vector<8x64xf32>
    %367 = arith.negf %366 : vector<8x64xf32>
    %368 = math.exp %367 : vector<8x64xf32>
    %cst_115 = arith.constant 1.000000e+00 : f32
    %369 = vector.broadcast %cst_115 : f32 to vector<8x64xf32>
    %370 = arith.addf %369, %368 : vector<8x64xf32>
    %371 = arith.divf %369, %370 : vector<8x64xf32>
    %372 = vector.extract_strided_slice %359 {offsets = [0, 128], sizes = [8, 64], strides = [1, 1]} : vector<8x256xf32> to vector<8x64xf32>
    %373 = math.tanh %372 : vector<8x64xf32>
    %374 = vector.extract_strided_slice %359 {offsets = [0, 192], sizes = [8, 64], strides = [1, 1]} : vector<8x256xf32> to vector<8x64xf32>
    %375 = arith.negf %374 : vector<8x64xf32>
    %376 = math.exp %375 : vector<8x64xf32>
    %cst_116 = arith.constant 1.000000e+00 : f32
    %377 = vector.broadcast %cst_116 : f32 to vector<8x64xf32>
    %378 = arith.addf %377, %376 : vector<8x64xf32>
    %379 = arith.divf %377, %378 : vector<8x64xf32>
    %380 = arith.mulf %371, %336 : vector<8x64xf32>
    %381 = arith.mulf %365, %373 : vector<8x64xf32>
    %382 = arith.addf %380, %381 : vector<8x64xf32>
    %383 = math.tanh %382 : vector<8x64xf32>
    %384 = arith.mulf %379, %383 : vector<8x64xf32>
    %385 = vector.extract_strided_slice %384 {offsets = [0, 0], sizes = [8, 32], strides = [1, 1]} : vector<8x64xf32> to vector<8x32xf32>
    %386 = arith.truncf %385 : vector<8x32xf32> to vector<8x32xbf16>
    %387 = arith.index_cast %350 : i32 to index
    %c0_117 = arith.constant 0 : index
    %388 = vector.load %arg11[%387, %c0_117] : memref<64x32xbf16, #tpu.memory_space<vmem>>, vector<8x32xbf16>
    tpu.vector_store %arg11[%387, %c0_117], %386 {strides = array<i32>} : memref<64x32xbf16, #tpu.memory_space<vmem>>, vector<8x32xbf16>,
    %389 = vector.extract_strided_slice %384 {offsets = [0, 32], sizes = [8, 32], strides = [1, 1]} : vector<8x64xf32> to vector<8x32xf32>
    %390 = arith.truncf %389 : vector<8x32xf32> to vector<8x32xbf16>
    %391 = arith.index_cast %353 : i32 to index
    %c0_118 = arith.constant 0 : index
    %392 = vector.load %arg12[%391, %c0_118] : memref<64x32xbf16, #tpu.memory_space<vmem>>, vector<8x32xbf16>
    tpu.vector_store %arg12[%391, %c0_118], %390 {strides = array<i32>} : memref<64x32xbf16, #tpu.memory_space<vmem>>, vector<8x32xbf16>,
    %c8_i32_119 = arith.constant 8 : i32
    %c0_120 = arith.constant 0 : index
    %c0_121 = arith.constant 0 : index
    %393 = vector.load %arg13[%c0_120, %c0_121] : memref<8x64xf32, #tpu.memory_space<vmem>>, vector<8x64xf32>
    tpu.vector_store %arg13[%c0_120, %c0_121], %384 {strides = array<i32>} : memref<8x64xf32, #tpu.memory_space<vmem>>, vector<8x64xf32>,
    %c0_122 = arith.constant 0 : index
    %c0_123 = arith.constant 0 : index
    %394 = vector.load %arg14[%c0_122, %c0_123] : memref<8x64xf32, #tpu.memory_space<vmem>>, vector<8x64xf32>
    tpu.vector_store %arg14[%c0_122, %c0_123], %382 {strides = array<i32>} : memref<8x64xf32, #tpu.memory_space<vmem>>, vector<8x64xf32>,
    return
  }
  func.func @transform_0(%arg0: i32) -> (i32, i32) {
    %c0_i32 = arith.constant 0 : i32
    %c0_i32_0 = arith.constant 0 : i32
    return %arg0, %c0_i32 : i32, i32
  }
  func.func @transform_1(%arg0: i32) -> (i32, i32) {
    %c0_i32 = arith.constant 0 : i32
    %c0_i32_0 = arith.constant 0 : i32
    return %arg0, %c0_i32 : i32, i32
  }
  func.func @transform_2(%arg0: i32) -> (i32, i32) {
    %c0_i32 = arith.constant 0 : i32
    %0 = arith.subi %c0_i32, %arg0 : i32
    %c0_i32_0 = arith.constant 0 : i32
    %c0_i32_1 = arith.constant 0 : i32
    return %0, %c0_i32_0 : i32, i32
  }
  func.func @transform_3(%arg0: i32) -> (i32, i32) {
    %c0_i32 = arith.constant 0 : i32
    %0 = arith.subi %c0_i32, %arg0 : i32
    %c0_i32_0 = arith.constant 0 : i32
    %c0_i32_1 = arith.constant 0 : i32
    return %0, %c0_i32_0 : i32, i32
  }
  func.func @transform_4(%arg0: i32) -> (i32, i32) {
    %c0_i32 = arith.constant 0 : i32
    %c0_i32_0 = arith.constant 0 : i32
    %c0_i32_1 = arith.constant 0 : i32
    return %c0_i32, %c0_i32_0 : i32, i32
  }
  func.func @transform_5(%arg0: i32) -> (i32, i32) {
    %c0_i32 = arith.constant 0 : i32
    %c0_i32_0 = arith.constant 0 : i32
    %c0_i32_1 = arith.constant 0 : i32
    return %c0_i32, %c0_i32_0 : i32, i32
  }
  func.func @transform_6(%arg0: i32) -> (i32, i32) {
    %c0_i32 = arith.constant 0 : i32
    %c0_i32_0 = arith.constant 0 : i32
    %c0_i32_1 = arith.constant 0 : i32
    return %c0_i32, %c0_i32_0 : i32, i32
  }
  func.func @transform_7(%arg0: i32) -> (i32, i32) {
    %c0_i32 = arith.constant 0 : i32
    %c0_i32_0 = arith.constant 0 : i32
    %c0_i32_1 = arith.constant 0 : i32
    return %c0_i32, %c0_i32_0 : i32, i32
  }
  func.func @transform_8(%arg0: i32) -> (i32, i32) {
    %c0_i32 = arith.constant 0 : i32
    %c0_i32_0 = arith.constant 0 : i32
    %c0_i32_1 = arith.constant 0 : i32
    return %c0_i32, %c0_i32_0 : i32, i32
  }
  func.func @transform_9(%arg0: i32) -> (i32, i32) {
    %c0_i32 = arith.constant 0 : i32
    %c0_i32_0 = arith.constant 0 : i32
    %c0_i32_1 = arith.constant 0 : i32
    return %c0_i32, %c0_i32_0 : i32, i32
  }
  func.func @transform_10(%arg0: i32) -> (i32, i32) {
    %c0_i32 = arith.constant 0 : i32
    %c0_i32_0 = arith.constant 0 : i32
    return %arg0, %c0_i32 : i32, i32
  }
  func.func @transform_11(%arg0: i32) -> (i32, i32) {
    %c0_i32 = arith.constant 0 : i32
    %0 = arith.subi %c0_i32, %arg0 : i32
    %c0_i32_0 = arith.constant 0 : i32
    %c0_i32_1 = arith.constant 0 : i32
    return %0, %c0_i32_0 : i32, i32
  }
}

</mosaic_0001>

<bundles_post_ra>
// kernel: bilstm_forward.2
= control target key start
LH: loop header
LB: loop body
LE: loop exit
PB: predicated region body
PF: predicated region fallthrough
CT: control target
= control target key end

     0   :  { %vm66_vm0 = vcmask 523264   ;;  %v1445_v1 = vmov 0   ;;  %v1446_v2 = vmov 0.0   ;;  %vm129_vm1 = vcmask 130048   ;;  %s1447_s8 = smov 64   ;;  %s1448_s27 = smov 32   ;;  %s1835_s2 = inlined_call_operand.vmem [shape: bf16[16,256], index: 2, kind: input, shape index: {}]   ;;  %s1836_s3 = inlined_call_operand.vmem [shape: bf16[16,256], index: 3, kind: input, shape index: {}]   ;;  %s1837_s0 = inlined_call_operand.vmem [shape: bf16[64,16], index: 0, kind: input, shape index: {}, may-alias: {0,1}]   ;;  %s1838_s1 = inlined_call_operand.vmem [shape: bf16[64,16], index: 1, kind: input, shape index: {}, may-alias: {0,1}]   ;;  %s1839_s4 = inlined_call_operand.vmem [shape: bf16[64,256], index: 4, kind: input, shape index: {}]   ;;  %s1840_s5 = inlined_call_operand.vmem [shape: f32[1,256], index: 5, kind: input, shape index: {}]   ;;  %s1841_s6 = inlined_call_operand.vmem [shape: bf16[64,32], index: 6, kind: output, shape index: {0}]   ;;  %s1842_s7 = inlined_call_operand.vmem [shape: bf16[64,32], index: 7, kind: output, shape index: {1}]  }
   0x1   :  { %v1323_v0 = vld [vmem:[%s1835_s2 + $0x4] ss:$8 sps:$4 sm:$0xff]   ;;  %174 = vmatprep.mubr.bf16.mxu0 %v1445_v1  ;;  %315 = vmatprep.mubr.bf16.mxu1 %v1445_v1  ;;  %67 = vst.msk [vmem:[#allocation2] sm:$0xff] %vm66_vm0, %v1446_v2  ;;  %68 = vst.msk [vmem:[#allocation3] sm:$0xff] %vm66_vm0, %v1446_v2  ;;  %v1327_v4 = vld [vmem:[%s1835_s2] ss:$8 sps:$4 sm:$0xff]   ;;  %v89_v25 = vlaneseq }
   0x2   :  { %v1325_v3 = vld [vmem:[%s1836_s3 + $0x4] ss:$8 sps:$4 sm:$0xff]   ;;  %142 = vmatprep.subr.bf16.mxu0 %v1323_v0  ;;  %v1328_v5 = vld [vmem:[%s1836_s3] ss:$8 sps:$4 sm:$0xff]   ;;  %v1528_v10 = vld [vmem:[%s1839_s4 + $0x14] ss:$8 sps:$4 sm:$0xff]  }
   0x3   :  { %283 = vmatprep.subr.bf16.mxu1 %v1325_v3  ;;  %v1329_v6 = vld [vmem:[%s1837_s0] sm:$0xff]   ;;  %143 = vmatpush1.bf16.msra.mxu0 %v1327_v4  ;;  %v1535_v11 = vld [vmem:[%s1839_s4 + $0x10] ss:$8 sps:$4 sm:$0xff]   ;;  %v1334_v12 = vld [vmem:[%s1837_s0 + $0x8] sm:$0xff]   ;;  %v90_v26 = vshrl.u32 %v89_v25, 7  ;;  %vm507_vm2 = vcmask 257024  }
   0x4   :  { %284 = vmatpush1.bf16.msra.mxu1 %v1328_v5  ;;  %v1330_v7 = vld [vmem:[%s1838_s1] sm:$0xff]   ;;  %v1335_v13 = vld [vmem:[%s1838_s1 + $0x8] sm:$0xff]   ;;  %v1564_v16 = vld [vmem:[%s1839_s4 + $0x34] ss:$8 sps:$4 sm:$0xff]  }
   0x5   :  { %v1514_v8 = vld [vmem:[%s1839_s4 + $0x4] ss:$8 sps:$4 sm:$0xff]   ;;  %v1519_v9 = vld [vmem:[%s1839_s4] ss:$8 sps:$4 sm:$0xff]   ;;  %v1572_v18 = vld [vmem:[%s1839_s4 + $0x30] ss:$8 sps:$4 sm:$0xff]  }
   0x6   :  { %1243 = vmatmul.mubr.msk.bf16.vlgmr.msra.gmra.mrb[0].mxu0 %vm129_vm1, %v1329_v6  ;;  %419 = vmatprep.subr.bf16.mxu0 %v1514_v8  ;;  %v1549_v14 = vld [vmem:[%s1839_s4 + $0x24] ss:$8 sps:$4 sm:$0xff]   ;;  %v1556_v15 = vld [vmem:[%s1839_s4 + $0x20] ss:$8 sps:$4 sm:$0xff]   ;;  %v1339_v19 = vld [vmem:[%s1837_s0 + $0x10] sm:$0xff]   ;;  %v91_v27 = vsub.s32 0, %v90_v26 }
   0x7   :  { %1253 = vmatmul.mubr.msk.bf16.vlgmr.msra.gmra.mrb[0].mxu1 %vm129_vm1, %v1330_v7  ;;  %184 = vmatprep.mubr.bf16.mxu0 %v1445_v1  ;;  %v1340_v20 = vld [vmem:[%s1838_s1 + $0x10] sm:$0xff]   ;;  %v1344_v21 = vld [vmem:[%s1837_s0 + $0x18] sm:$0xff]   ;;  %v77_v28 = vld [vmem:[%s1840_s5] sm:$0x3]  ;;  %v95_v29 = vsub.s32 1, %v90_v26 }
   0x8   :  { %420 = vmatpush1.bf16.msra.mxu0 %v1519_v9  ;;  %325 = vmatprep.mubr.bf16.mxu1 %v1445_v1  ;;  %v373_v17 = vld [vmem:[#allocation3] sm:$0xff]  ;;  %v1345_v22 = vld [vmem:[%s1838_s1 + $0x18] sm:$0xff]   ;;  %v372_v23 = vld [vmem:[#allocation2] sm:$0xff]  ;;  %v92_v32 = vrot.slane %v77_v28, %v91_v27 }
   0x9   :  { %421 = vmatprep.subr.bf16.mxu0 %v1528_v10  ;;  %519 = vmatprep.subr.bf16.mxu1 %v1514_v8  ;;  %v374_v24 = vpack.c.bf16 %v372_v23, %v372_v23  ;;  %v96_v35 = vrot.slane %v77_v28, %v95_v29 }
   0xa   :  { %520 = vmatpush1.bf16.msra.mxu1 %v1519_v9  ;;  %488 = vrot.lane.b32.xlu0 %v373_v17, %s1447_s8 }
   0xb   :  { %521 = vmatprep.subr.bf16.mxu1 %v1528_v10 }
   0xc   :  { %422 = vmatpush1.bf16.msra.mxu0 %v1535_v11 }
   0xd   :  { %423 = vmatprep.subr.bf16.mxu0 %v1549_v14 }
   0xe   :  { %1244 = vmatmul.mubr.msk.bf16.gmra.mrb[4].mxu0 %vm129_vm1, %v1334_v12  ;;  %522 = vmatpush1.bf16.msra.mxu1 %v1535_v11 }
   0xf   :  { %1254 = vmatmul.mubr.msk.bf16.gmra.mrb[4].mxu1 %vm129_vm1, %v1335_v13  ;;  %194 = vmatprep.mubr.bf16.mxu0 %v1445_v1 }
  0x10   :  { %335 = vmatprep.mubr.bf16.mxu1 %v1445_v1  ;;  %424 = vmatpush1.bf16.msra.mxu0 %v1556_v15 }
  0x11   :  { %425 = vmatprep.subr.bf16.mxu0 %v1564_v16  ;;  %523 = vmatprep.subr.bf16.mxu1 %v1549_v14 }
  0x12   :  { %524 = vmatpush1.bf16.msra.mxu1 %v1556_v15 }
  0x13   :  { %525 = vmatprep.subr.bf16.mxu1 %v1564_v16 }
  0x14   :  { %426 = vmatpush1.bf16.msra.mxu0 %v1572_v18 }
  0x15   :  { %615 = vmatprep.subr.bf16.mxu0 %v1514_v8 }
  0x16   :  { %1245 = vmatmul.mubr.msk.bf16.gmra.mrb[8].mxu0 %vm129_vm1, %v1339_v19  ;;  %526 = vmatpush1.bf16.msra.mxu1 %v1572_v18 }
  0x17   :  { %1255 = vmatmul.mubr.msk.bf16.gmra.mrb[8].mxu1 %vm129_vm1, %v1340_v20  ;;  %204 = vmatprep.mubr.bf16.mxu0 %v1445_v1 }
  0x18   :  { %345 = vmatprep.mubr.bf16.mxu1 %v1445_v1  ;;  %711 = vmatprep.subr.bf16.mxu1 %v1514_v8 }
  0x1e   :  { %1246 = vmatmul.mubr.msk.bf16.gmra.mrb[12].mxu0 %vm129_vm1, %v1344_v21 }
  0x1f   :  { %1256 = vmatmul.mubr.msk.bf16.gmra.mrb[12].mxu1 %vm129_vm1, %v1345_v22  ;;  %451 = vmatprep.mubr.bf16.mxu0 %v1445_v1 }
  0x20   :  { %551 = vmatprep.mubr.bf16.mxu1 %v1445_v1 }
  0x26   :  { %1265 = vmatmul.mubr.msk.bf16.vlgmr.msra.gmra.mrb[16].mxu0 %vm66_vm0, %v374_v24 }
  0x27   :  { %616 = vmatpush1.bf16.msra.mxu0 %v1519_v9  ;;  %647 = vmatprep.mubr.bf16.mxu0 %v1445_v1 }
  0x28   :  { %617 = vmatprep.subr.bf16.mxu0 %v1528_v10 }
  0x2b   :  { %618 = vmatpush1.bf16.msra.mxu0 %v1535_v11 }
  0x2c   :  { %619 = vmatprep.subr.bf16.mxu0 %v1549_v14 }
  0x2f   :  { %620 = vmatpush1.bf16.msra.mxu0 %v1556_v15 }
  0x30   :  { %621 = vmatprep.subr.bf16.mxu0 %v1564_v16 }
  0x33   :  { %622 = vmatpush1.bf16.msra.mxu0 %v1572_v18 }
  0x34   :  { %807 = vmatprep.subr.bf16.mxu0 %v1514_v8 }
  0xd9   :  { %v176_v30 = vpop.f32.mrb[0].mxu0 }
  0xda   :  { %v1617_v31 = vpop.f32.mrb[0].mxu1  ;;  %v178_v33 = vpop.f32.mrb[1].mxu0  ;;  %v177_v21 = vadd.f32 %v176_v30, %v92_v32 }
  0xdb   :  { %v319_v34 = vpop.f32.mrb[1].mxu1  ;;  %v180_v36 = vpop.f32.mrb[2].mxu0  ;;  %v179_v26 = vadd.f32 %v178_v33, %v96_v35 }
  0xdc   :  { %v321_v37 = vpop.f32.mrb[2].mxu1  ;;  %v181_v38 = vadd.f32 %v180_v36, %v92_v32  ;;  %v182_v39 = vpop.f32.mrb[3].mxu0 }
  0xdd   :  { %v323_v40 = vpop.f32.mrb[3].mxu1  ;;  %v183_v41 = vadd.f32 %v182_v39, %v96_v35 }
  0xe1   :  { %v186_v42 = vpop.f32.mrb[4].mxu0 }
  0xe2   :  { %v327_v43 = vpop.f32.mrb[4].mxu1  ;;  %v187_v44 = vadd.f32 %v186_v42, %v92_v32  ;;  %v188_v45 = vpop.f32.mrb[5].mxu0 }
  0xe3   :  { %v329_v46 = vpop.f32.mrb[5].mxu1  ;;  %v189_v47 = vadd.f32 %v188_v45, %v96_v35  ;;  %v190_v48 = vpop.f32.mrb[6].mxu0 }
  0xe4   :  { %v331_v49 = vpop.f32.mrb[6].mxu1  ;;  %v191_v50 = vadd.f32 %v190_v48, %v92_v32  ;;  %v192_v51 = vpop.f32.mrb[7].mxu0 }
  0xe5   :  { %v333_v52 = vpop.f32.mrb[7].mxu1  ;;  %v193_v53 = vadd.f32 %v192_v51, %v96_v35 }
  0xe9   :  { %v196_v54 = vpop.f32.mrb[8].mxu0 }
  0xea   :  { %v337_v55 = vpop.f32.mrb[8].mxu1  ;;  %v197_v56 = vadd.f32 %v196_v54, %v92_v32  ;;  %v198_v58 = vpop.f32.mrb[9].mxu0 }
  0xeb   :  { %v1619_v57 = vadd.f32 %v337_v55, %v191_v50  ;;  %v339_v59 = vpop.f32.mrb[9].mxu1  ;;  %v199_v60 = vadd.f32 %v198_v58, %v96_v35  ;;  %v200_v62 = vpop.f32.mrb[10].mxu0 }
  0xec   :  { %v1621_v61 = vadd.f32 %v339_v59, %v193_v53  ;;  %v341_v63 = vpop.f32.mrb[10].mxu1  ;;  %v201_v0 = vadd.f32 %v200_v62, %v92_v32  ;;  %v202_v3 = vpop.f32.mrb[11].mxu0  ;;  %v1625_v5 = vadd.f32 %v331_v49, %v197_v56 }
  0xed   :  { %v1623_v2 = vadd.f32 %v341_v63, %v187_v44  ;;  %v343_v4 = vpop.f32.mrb[11].mxu1  ;;  %v203_v6 = vadd.f32 %v202_v3, %v96_v35  ;;  %v1629_v12 = vadd.f32 %v333_v52, %v199_v60  ;;  %v489_v55 = vpop.permute.xlu0 %488 }
  0xee   :  { %v1627_v7 = vadd.f32 %v343_v4, %v189_v47  ;;  %v1631_v13 = vadd.f32 %v327_v43, %v201_v0 }
  0xef   :  { %v1633_v17 = vadd.f32 %v329_v46, %v203_v6 }
  0xf1   :  { %v206_v19 = vpop.f32.mrb[12].mxu0 }
  0xf2   :  { %v347_v20 = vpop.f32.mrb[12].mxu1  ;;  %v207_v22 = vadd.f32 %v206_v19, %v92_v32  ;;  %v208_v24 = vpop.f32.mrb[13].mxu0 }
  0xf3   :  { %v570_v23 = vadd.f32 %v347_v20, %v181_v38  ;;  %v349_v25 = vpop.f32.mrb[13].mxu1  ;;  %v209_v27 = vadd.f32 %v208_v24, %v96_v35  ;;  %v210_v29 = vpop.f32.mrb[14].mxu0 }
  0xf4   :  { %v571_v28 = vadd.f32 %v349_v25, %v183_v41  ;;  %v351_v36 = vpop.f32.mrb[14].mxu1  ;;  %v211_v39 = vadd.f32 %v210_v29, %v92_v32  ;;  %v212_v44 = vpop.f32.mrb[15].mxu0  ;;  %v1635_v43 = vadd.f32 %v321_v37, %v207_v22 }
  0xf5   :  { %v470_v42 = vadd.f32 %v351_v36, %v177_v21  ;;  %v353_v45 = vpop.f32.mrb[15].mxu1  ;;  %v213_v46 = vadd.f32 %v212_v44, %v96_v35  ;;  %v1637_v48 = vadd.f32 %v323_v40, %v209_v27 }
  0xf6   :  { %v471_v47 = vadd.f32 %v353_v45, %v179_v26  ;;  %v1640_v30 = vadd.f32 %v1617_v31, %v211_v39 }
  0xf7   :  { %v1642_v38 = vadd.f32 %v319_v34, %v213_v46 }
  0xf9   :  { %v453_v33 = vpop.f32.mrb[16].mxu0 }
  0xfa   :  { %v472_v49 = vadd.f32 %v470_v42, %v453_v33  ;;  %v455_v41 = vpop.f32.mrb[17].mxu0 }
  0xfb   :  { %v473_v50 = vadd.f32 %v471_v47, %v455_v41  ;;  %v457_v51 = vpop.f32.mrb[18].mxu0 }
  0xfc   :  { %v1266_v32 = vmul.f32 -1.442695, %v472_v49  ;;  %v458_v52 = vpop.f32.mrb[19].mxu0 }
  0xfd   :  { %v1267_v31 = vmul.f32 -1.442695, %v473_v50 }
  0xfe   :  { %1349 = vpow2.f32 %v1266_v32 }
  0xff   :  { %1351 = vtanh.f32 %v473_v50 }
 0x108   :  { %v1350_v53 = vpop.eup %1349 }
 0x109   :  { %v477_v37 = vadd.f32 1.0, %v1350_v53  ;;  %v1352_v35 = vpop.eup %1351 }
 0x10b   :  { %1353 = vrcp.f32 %v477_v37 }
 0x10c   :  { %1355 = vpow2.f32 %v1267_v31 }
 0x115   :  { %v1354_v40 = vpop.eup %1353 }
 0x116   :  { %v492_v54 = vmul.f32 %v1354_v40, %v1352_v35  ;;  %v1356_v34 = vpop.eup %1355  ;;  %v491_v58 = vmul.f32 %v1354_v40, %v489_v55 }
 0x117   :  { %v484_v56 = vadd.f32 1.0, %v1356_v34 }
 0x118   :  { %494 = vrot.lane.b32.xlu0 %v492_v54, %s1447_s8 }
 0x119   :  { %1357 = vrcp.f32 %v484_v56 }
 0x123   :  { %v1358_v62 = vpop.eup %1357 }
 0x18a   :  { %v495_v59 = vpop.permute.xlu0 %494 }
 0x18b   :  { %v497_v60 = vadd.f32 %v495_v59, %v491_v58 }
 0x18d   :  { %1359 = vtanh.f32 %v497_v60 }
 0x197   :  { %v1360_v63 = vpop.eup %1359 }
 0x198   :  { %v499_v0 = vmul.f32 %v1360_v63, %v1358_v62 }
 0x19a   :  { %v1645_v3 = vpack.c.bf16 %v499_v0, %v499_v0 }
 0x19c   :  { %514 = vrot.lane.b32.xlu1 %v1645_v3, %s1447_s8 }
 0x20e   :  { %v515_v4 = vpop.permute.xlu1 %514 }
 0x20f   :  { %1270 = vmatmul.mubr.msk.bf16.vlgmr.msra.gmra.mrb[16].mxu1 %vm66_vm0, %v515_v4 }
 0x210   :  { %712 = vmatpush1.bf16.msra.mxu1 %v1519_v9  ;;  %743 = vmatprep.mubr.bf16.mxu1 %v1445_v1 }
 0x211   :  { %713 = vmatprep.subr.bf16.mxu1 %v1528_v10 }
 0x214   :  { %714 = vmatpush1.bf16.msra.mxu1 %v1535_v11 }
 0x215   :  { %715 = vmatprep.subr.bf16.mxu1 %v1549_v14 }
 0x218   :  { %716 = vmatpush1.bf16.msra.mxu1 %v1556_v15 }
 0x219   :  { %717 = vmatprep.subr.bf16.mxu1 %v1564_v16 }
 0x21c   :  { %718 = vmatpush1.bf16.msra.mxu1 %v1572_v18 }
 0x21d   :  { %901 = vmatprep.subr.bf16.mxu1 %v1514_v8 }
 0x2e2   :  { %v553_v6 = vpop.f32.mrb[16].mxu1 }
 0x2e3   :  { %v572_v19 = vadd.f32 %v570_v23, %v553_v6  ;;  %v555_v20 = vpop.f32.mrb[17].mxu1 }
 0x2e4   :  { %v573_v21 = vadd.f32 %v571_v28, %v555_v20  ;;  %v557_v22 = vpop.f32.mrb[18].mxu1 }
 0x2e5   :  { %v1271_v24 = vmul.f32 -1.442695, %v572_v19  ;;  %v558_v25 = vpop.f32.mrb[19].mxu1 }
 0x2e6   :  { %v1272_v42 = vmul.f32 -1.442695, %v573_v21 }
 0x2e7   :  { %1361 = vpow2.f32 %v1271_v24 }
 0x2e8   :  { %1363 = vtanh.f32 %v573_v21 }
 0x2f1   :  { %v1362_v26 = vpop.eup %1361 }
 0x2f2   :  { %v577_v27 = vadd.f32 1.0, %v1362_v26  ;;  %v1364_v29 = vpop.eup %1363 }
 0x2f4   :  { %1365 = vrcp.f32 %v577_v27 }
 0x2f5   :  { %1367 = vpow2.f32 %v1272_v42 }
 0x2fe   :  { %v1366_v36 = vpop.eup %1365 }
 0x2ff   :  { %v588_v39 = vmul.f32 %v1366_v36, %v1364_v29  ;;  %v1368_v44 = vpop.eup %1367  ;;  %v587_v23 = vmul.f32 %v1366_v36, %v497_v60 }
 0x300   :  { %v584_v45 = vadd.f32 1.0, %v1368_v44 }
 0x301   :  { %590 = vrot.lane.b32.xlu1 %v588_v39, %s1447_s8 }
 0x302   :  { %1369 = vrcp.f32 %v584_v45 }
 0x30c   :  { %v1370_v47 = vpop.eup %1369 }
 0x373   :  { %v591_v46 = vpop.permute.xlu1 %590 }
 0x374   :  { %v593_v28 = vadd.f32 %v591_v46, %v587_v23 }
 0x376   :  { %1371 = vtanh.f32 %v593_v28 }
 0x380   :  { %v1372_v33 = vpop.eup %1371 }
 0x381   :  { %v595_v49 = vmul.f32 %v1372_v33, %v1370_v47 }
 0x383   :  { %v1660_v41 = vpack.c.bf16 %v595_v49, %v595_v49 }
 0x385   :  { %610 = vrot.lane.b32.xlu0 %v1660_v41, %s1447_s8 }
 0x3f7   :  { %v611_v50 = vpop.permute.xlu0 %610 }
 0x3f8   :  { %1276 = vmatmul.mubr.msk.bf16.vlgmr.msra.gmra.mrb[20].mxu0 %vm66_vm0, %v611_v50 }
 0x3f9   :  { %808 = vmatpush1.bf16.msra.mxu0 %v1519_v9  ;;  %839 = vmatprep.mubr.bf16.mxu0 %v1445_v1 }
 0x3fa   :  { %809 = vmatprep.subr.bf16.mxu0 %v1528_v10 }
 0x3fd   :  { %810 = vmatpush1.bf16.msra.mxu0 %v1535_v11 }
 0x3fe   :  { %811 = vmatprep.subr.bf16.mxu0 %v1549_v14 }
 0x401   :  { %812 = vmatpush1.bf16.msra.mxu0 %v1556_v15 }
 0x402   :  { %813 = vmatprep.subr.bf16.mxu0 %v1564_v16 }
 0x405   :  { %814 = vmatpush1.bf16.msra.mxu0 %v1572_v18 }
 0x406   :  { %995 = vmatprep.subr.bf16.mxu0 %v1514_v8 }
 0x4cb   :  { %v649_v51 = vpop.f32.mrb[20].mxu0 }
 0x4cc   :  { %v668_v32 = vadd.f32 %v1623_v2, %v649_v51  ;;  %v651_v52 = vpop.f32.mrb[21].mxu0 }
 0x4cd   :  { %v669_v53 = vadd.f32 %v1627_v7, %v651_v52  ;;  %v653_v37 = vpop.f32.mrb[22].mxu0 }
 0x4ce   :  { %v1277_v35 = vmul.f32 -1.442695, %v668_v32  ;;  %v654_v40 = vpop.f32.mrb[23].mxu0 }
 0x4cf   :  { %v1278_v58 = vmul.f32 -1.442695, %v669_v53 }
 0x4d0   :  { %1373 = vpow2.f32 %v1277_v35 }
 0x4d1   :  { %1375 = vtanh.f32 %v669_v53 }
 0x4da   :  { %v1374_v54 = vpop.eup %1373 }
 0x4db   :  { %v673_v31 = vadd.f32 1.0, %v1374_v54  ;;  %v1376_v34 = vpop.eup %1375 }
 0x4dd   :  { %1377 = vrcp.f32 %v673_v31 }
 0x4de   :  { %1379 = vpow2.f32 %v1278_v58 }
 0x4e7   :  { %v1378_v55 = vpop.eup %1377 }
 0x4e8   :  { %v684_v56 = vmul.f32 %v1378_v55, %v1376_v34  ;;  %v1380_v59 = vpop.eup %1379  ;;  %v683_v60 = vmul.f32 %v1378_v55, %v593_v28 }
 0x4e9   :  { %v680_v2 = vadd.f32 1.0, %v1380_v59 }
 0x4ea   :  { %686 = vrot.lane.b32.xlu1 %v684_v56, %s1447_s8 }
 0x4eb   :  { %1381 = vrcp.f32 %v680_v2 }
 0x4f5   :  { %v1382_v63 = vpop.eup %1381 }
 0x55c   :  { %v687_v62 = vpop.permute.xlu1 %686 }
 0x55d   :  { %v689_v7 = vadd.f32 %v687_v62, %v683_v60 }
 0x55f   :  { %1383 = vtanh.f32 %v689_v7 }
 0x569   :  { %v1384_v0 = vpop.eup %1383 }
 0x56a   :  { %v691_v4 = vmul.f32 %v1384_v0, %v1382_v63 }
 0x56c   :  { %v1677_v6 = vpack.c.bf16 %v691_v4, %v691_v4 }
 0x56e   :  { %706 = vrot.lane.b32.xlu0 %v1677_v6, %s1447_s8 }
 0x5e0   :  { %v707_v19 = vpop.permute.xlu0 %706 }
 0x5e1   :  { %1282 = vmatmul.mubr.msk.bf16.vlgmr.msra.gmra.mrb[20].mxu1 %vm66_vm0, %v707_v19 }
 0x5e2   :  { %902 = vmatpush1.bf16.msra.mxu1 %v1519_v9  ;;  %933 = vmatprep.mubr.bf16.mxu1 %v1445_v1 }
 0x5e3   :  { %903 = vmatprep.subr.bf16.mxu1 %v1528_v10 }
 0x5e6   :  { %904 = vmatpush1.bf16.msra.mxu1 %v1535_v11 }
 0x5e7   :  { %905 = vmatprep.subr.bf16.mxu1 %v1549_v14 }
 0x5ea   :  { %906 = vmatpush1.bf16.msra.mxu1 %v1556_v15 }
 0x5eb   :  { %907 = vmatprep.subr.bf16.mxu1 %v1564_v16 }
 0x5ee   :  { %908 = vmatpush1.bf16.msra.mxu1 %v1572_v18 }
 0x5ef   :  { %1089 = vmatprep.subr.bf16.mxu1 %v1514_v8 }
 0x6b4   :  { %v745_v20 = vpop.f32.mrb[20].mxu1 }
 0x6b5   :  { %v764_v21 = vadd.f32 %v1619_v57, %v745_v20  ;;  %v747_v22 = vpop.f32.mrb[21].mxu1 }
 0x6b6   :  { %v765_v24 = vadd.f32 %v1621_v61, %v747_v22  ;;  %v749_v25 = vpop.f32.mrb[22].mxu1 }
 0x6b7   :  { %v1283_v26 = vmul.f32 -1.442695, %v764_v21  ;;  %v750_v27 = vpop.f32.mrb[23].mxu1 }
 0x6b8   :  { %v1284_v8 = vmul.f32 -1.442695, %v765_v24 }
 0x6b9   :  { %1385 = vpow2.f32 %v1283_v26 }
 0x6ba   :  { %1387 = vtanh.f32 %v765_v24 }
 0x6c3   :  { %v1386_v29 = vpop.eup %1385 }
 0x6c4   :  { %v769_v36 = vadd.f32 1.0, %v1386_v29  ;;  %v1388_v39 = vpop.eup %1387 }
 0x6c6   :  { %1389 = vrcp.f32 %v769_v36 }
 0x6c7   :  { %1391 = vpow2.f32 %v1284_v8 }
 0x6d0   :  { %v1390_v42 = vpop.eup %1389 }
 0x6d1   :  { %v780_v44 = vmul.f32 %v1390_v42, %v1388_v39  ;;  %v1392_v45 = vpop.eup %1391  ;;  %v779_v23 = vmul.f32 %v1390_v42, %v689_v7 }
 0x6d2   :  { %v776_v57 = vadd.f32 1.0, %v1392_v45 }
 0x6d3   :  { %782 = vrot.lane.b32.xlu1 %v780_v44, %s1447_s8 }
 0x6d4   :  { %1393 = vrcp.f32 %v776_v57 }
 0x6de   :  { %v1394_v28 = vpop.eup %1393 }
 0x745   :  { %v783_v46 = vpop.permute.xlu1 %782 }
 0x746   :  { %v785_v61 = vadd.f32 %v783_v46, %v779_v23 }
 0x748   :  { %1395 = vtanh.f32 %v785_v61 }
 0x752   :  { %v1396_v47 = vpop.eup %1395 }
 0x753   :  { %v787_v33 = vmul.f32 %v1396_v47, %v1394_v28 }
 0x755   :  { %v1694_v49 = vpack.c.bf16 %v787_v33, %v787_v33 }
 0x757   :  { %802 = vrot.lane.b32.xlu0 %v1694_v49, %s1447_s8 }
 0x7c9   :  { %v803_v50 = vpop.permute.xlu0 %802 }
 0x7ca   :  { %1288 = vmatmul.mubr.msk.bf16.vlgmr.msra.gmra.mrb[24].mxu0 %vm66_vm0, %v803_v50 }
 0x7cb   :  { %996 = vmatpush1.bf16.msra.mxu0 %v1519_v9  ;;  %1027 = vmatprep.mubr.bf16.mxu0 %v1445_v1 }
 0x7cc   :  { %997 = vmatprep.subr.bf16.mxu0 %v1528_v10 }
 0x7cf   :  { %998 = vmatpush1.bf16.msra.mxu0 %v1535_v11 }
 0x7d0   :  { %999 = vmatprep.subr.bf16.mxu0 %v1549_v14 }
 0x7d3   :  { %1000 = vmatpush1.bf16.msra.mxu0 %v1556_v15 }
 0x7d4   :  { %1001 = vmatprep.subr.bf16.mxu0 %v1564_v16 }
 0x7d7   :  { %1002 = vmatpush1.bf16.msra.mxu0 %v1572_v18 }
 0x89d   :  { %v841_v51 = vpop.f32.mrb[24].mxu0 }
 0x89e   :  { %v858_v32 = vadd.f32 %v1625_v5, %v841_v51  ;;  %v843_v52 = vpop.f32.mrb[25].mxu0 }
 0x89f   :  { %v859_v53 = vadd.f32 %v1629_v12, %v843_v52  ;;  %v845_v37 = vpop.f32.mrb[26].mxu0 }
 0x8a0   :  { %v1289_v35 = vmul.f32 -1.442695, %v858_v32  ;;  %v846_v40 = vpop.f32.mrb[27].mxu0 }
 0x8a1   :  { %v1290_v58 = vmul.f32 -1.442695, %v859_v53 }
 0x8a2   :  { %1397 = vpow2.f32 %v1289_v35 }
 0x8a3   :  { %1399 = vtanh.f32 %v859_v53 }
 0x8ac   :  { %v1398_v54 = vpop.eup %1397 }
 0x8ad   :  { %v863_v31 = vadd.f32 1.0, %v1398_v54  ;;  %v1400_v34 = vpop.eup %1399 }
 0x8af   :  { %1401 = vrcp.f32 %v863_v31 }
 0x8b0   :  { %1403 = vpow2.f32 %v1290_v58 }
 0x8b9   :  { %v1402_v55 = vpop.eup %1401 }
 0x8ba   :  { %v874_v56 = vmul.f32 %v1402_v55, %v1400_v34  ;;  %v1404_v59 = vpop.eup %1403  ;;  %v873_v2 = vmul.f32 %v1402_v55, %v785_v61 }
 0x8bb   :  { %v870_v5 = vadd.f32 1.0, %v1404_v59 }
 0x8bc   :  { %876 = vrot.lane.b32.xlu1 %v874_v56, %s1447_s8 }
 0x8bd   :  { %1405 = vrcp.f32 %v870_v5 }
 0x8c7   :  { %v1406_v62 = vpop.eup %1405 }
 0x92e   :  { %v877_v60 = vpop.permute.xlu1 %876 }
 0x92f   :  { %v879_v12 = vadd.f32 %v877_v60, %v873_v2 }
 0x931   :  { %1407 = vtanh.f32 %v879_v12 }
 0x93b   :  { %v1408_v7 = vpop.eup %1407 }
 0x93c   :  { %v881_v63 = vmul.f32 %v1408_v7, %v1406_v62 }
 0x93e   :  { %v1710_v0 = vpack.c.bf16 %v881_v63, %v881_v63 }
 0x940   :  { %896 = vrot.lane.b32.xlu0 %v1710_v0, %s1447_s8 }
 0x9b2   :  { %v897_v4 = vpop.permute.xlu0 %896 }
 0x9b3   :  { %1294 = vmatmul.mubr.msk.bf16.vlgmr.msra.gmra.mrb[24].mxu1 %vm66_vm0, %v897_v4 }
 0x9b4   :  { %1090 = vmatpush1.bf16.msra.mxu1 %v1519_v9  ;;  %1121 = vmatprep.mubr.bf16.mxu1 %v1445_v1 }
 0x9b5   :  { %1091 = vmatprep.subr.bf16.mxu1 %v1528_v10 }
 0x9b8   :  { %1092 = vmatpush1.bf16.msra.mxu1 %v1535_v11 }
 0x9b9   :  { %1093 = vmatprep.subr.bf16.mxu1 %v1549_v14 }
 0x9bc   :  { %1094 = vmatpush1.bf16.msra.mxu1 %v1556_v15 }
 0x9bd   :  { %1095 = vmatprep.subr.bf16.mxu1 %v1564_v16 }
 0x9c0   :  { %1096 = vmatpush1.bf16.msra.mxu1 %v1572_v18 }
 0xa86   :  { %v935_v19 = vpop.f32.mrb[24].mxu1 }
 0xa87   :  { %v952_v20 = vadd.f32 %v1631_v13, %v935_v19  ;;  %v937_v21 = vpop.f32.mrb[25].mxu1 }
 0xa88   :  { %v953_v9 = vadd.f32 %v1633_v17, %v937_v21  ;;  %v939_v22 = vpop.f32.mrb[26].mxu1 }
 0xa89   :  { %v1295_v1 = vmul.f32 -1.442695, %v952_v20  ;;  %v940_v24 = vpop.f32.mrb[27].mxu1 }
 0xa8a   :  { %v1296_v16 = vmul.f32 -1.442695, %v953_v9 }
 0xa8b   :  { %1409 = vpow2.f32 %v1295_v1 }
 0xa8c   :  { %1411 = vtanh.f32 %v953_v9 }
 0xa95   :  { %v1410_v10 = vpop.eup %1409 }
 0xa96   :  { %v957_v11 = vadd.f32 1.0, %v1410_v10  ;;  %v1412_v14 = vpop.eup %1411 }
 0xa98   :  { %1413 = vrcp.f32 %v957_v11 }
 0xa99   :  { %1415 = vpow2.f32 %v1296_v16 }
 0xaa2   :  { %v1414_v15 = vpop.eup %1413 }
 0xaa3   :  { %v968_v25 = vmul.f32 %v1414_v15, %v1412_v14  ;;  %v1416_v18 = vpop.eup %1415  ;;  %v967_v26 = vmul.f32 %v1414_v15, %v879_v12 }
 0xaa4   :  { %v964_v13 = vadd.f32 1.0, %v1416_v18 }
 0xaa5   :  { %970 = vrot.lane.b32.xlu1 %v968_v25, %s1447_s8 }
 0xaa6   :  { %1417 = vrcp.f32 %v964_v13 }
 0xab0   :  { %v1418_v29 = vpop.eup %1417 }
 0xb17   :  { %v971_v27 = vpop.permute.xlu1 %970 }
 0xb18   :  { %v973_v17 = vadd.f32 %v971_v27, %v967_v26 }
 0xb1a   :  { %1419 = vtanh.f32 %v973_v17 }
 0xb24   :  { %v1420_v36 = vpop.eup %1419 }
 0xb25   :  { %v975_v39 = vmul.f32 %v1420_v36, %v1418_v29 }
 0xb27   :  { %v1726_v42 = vpack.c.bf16 %v975_v39, %v975_v39 }
 0xb29   :  { %990 = vrot.lane.b32.xlu0 %v1726_v42, %s1447_s8 }
 0xb9b   :  { %v991_v44 = vpop.permute.xlu0 %990 }
 0xb9c   :  { %1300 = vmatmul.mubr.msk.bf16.vlgmr.msra.gmra.mrb[28].mxu0 %vm66_vm0, %v991_v44 }
 0xc6f   :  { %v1029_v8 = vpop.f32.mrb[28].mxu0 }
 0xc70   :  { %v1046_v45 = vadd.f32 %v1635_v43, %v1029_v8  ;;  %v1031_v57 = vpop.f32.mrb[29].mxu0 }
 0xc71   :  { %v1047_v23 = vadd.f32 %v1637_v48, %v1031_v57  ;;  %v1033_v46 = vpop.f32.mrb[30].mxu0 }
 0xc72   :  { %v1301_v61 = vmul.f32 -1.442695, %v1046_v45  ;;  %v1034_v28 = vpop.f32.mrb[31].mxu0 }
 0xc73   :  { %v1302_v52 = vmul.f32 -1.442695, %v1047_v23 }
 0xc74   :  { %1421 = vpow2.f32 %v1301_v61 }
 0xc75   :  { %1423 = vtanh.f32 %v1047_v23 }
 0xc7e   :  { %v1422_v47 = vpop.eup %1421 }
 0xc7f   :  { %v1051_v33 = vadd.f32 1.0, %v1422_v47  ;;  %v1424_v50 = vpop.eup %1423 }
 0xc81   :  { %1425 = vrcp.f32 %v1051_v33 }
 0xc82   :  { %1427 = vpow2.f32 %v1302_v52 }
 0xc8b   :  { %v1426_v51 = vpop.eup %1425 }
 0xc8c   :  { %v1062_v32 = vmul.f32 %v1426_v51, %v1424_v50  ;;  %v1428_v53 = vpop.eup %1427  ;;  %v1061_v37 = vmul.f32 %v1426_v51, %v973_v17 }
 0xc8d   :  { %v1058_v43 = vadd.f32 1.0, %v1428_v53 }
 0xc8e   :  { %1064 = vrot.lane.b32.xlu1 %v1062_v32, %s1447_s8 }
 0xc8f   :  { %1429 = vrcp.f32 %v1058_v43 }
 0xc99   :  { %v1430_v40 = vpop.eup %1429 }
 0xd00   :  { %v1065_v35 = vpop.permute.xlu1 %1064 }
 0xd01   :  { %v1067_v48 = vadd.f32 %v1065_v35, %v1061_v37 }
 0xd03   :  { %1431 = vtanh.f32 %v1067_v48 }
 0xd0d   :  { %v1432_v54 = vpop.eup %1431 }
 0xd0e   :  { %v1069_v31 = vmul.f32 %v1432_v54, %v1430_v40 }
 0xd10   :  { %v1070_v34 = vpack.c.bf16 %v1069_v31, %v1069_v31 }
 0xd12   :  { %1084 = vrot.lane.b32.xlu0 %v1070_v34, %s1447_s8 }
 0xd16   :  { %504 = vrot.lane.b32.xlu0 %v1645_v3, %s1447_s8 }
 0xd1a   :  { %600 = vrot.lane.b32.xlu0 %v1660_v41, %s1447_s8 }
 0xd1e   :  { %696 = vrot.lane.b32.xlu0 %v1677_v6, %s1447_s8 }
 0xd22   :  { %792 = vrot.lane.b32.xlu0 %v1694_v49, %s1447_s8 }
 0xd26   :  { %886 = vrot.lane.b32.xlu0 %v1710_v0, %s1447_s8 }
 0xd2a   :  { %980 = vrot.lane.b32.xlu0 %v1726_v42, %s1447_s8 }
 0xd2e   :  { %1074 = vrot.lane.b32.xlu0 %v1070_v34, %s1447_s8 }
 0xd84   :  { %v1085_v55 = vpop.permute.xlu0 %1084 }
 0xd85   :  { %1306 = vmatmul.mubr.msk.bf16.vlgmr.msra.gmra.mrb[28].mxu1 %vm66_vm0, %v1085_v55 }
 0xd88   :  { %v505_v56 = vpop.permute.xlu0 %504 }
 0xd89   :  { %508 = vst.msk [vmem:[%s1841_s6] sm:$0xf] %vm507_vm2, %v505_v56 }
 0xd8c   :  { %v601_v58 = vpop.permute.xlu0 %600 }
 0xd8d   :  { %1274 = vst.msk [vmem:[%s1841_s6 + $0x4] sm:$0xf] %vm507_vm2, %v601_v58 }
 0xd90   :  { %v697_v59 = vpop.permute.xlu0 %696 }
 0xd91   :  { %1280 = vst.msk [vmem:[%s1841_s6 + $0x8] sm:$0xf] %vm507_vm2, %v697_v59 }
 0xd94   :  { %v793_v5 = vpop.permute.xlu0 %792 }
 0xd95   :  { %1286 = vst.msk [vmem:[%s1841_s6 + $0xc] sm:$0xf] %vm507_vm2, %v793_v5 }
 0xd98   :  { %v887_v2 = vpop.permute.xlu0 %886 }
 0xd99   :  { %1292 = vst.msk [vmem:[%s1841_s6 + $0x10] sm:$0xf] %vm507_vm2, %v887_v2 }
 0xd9c   :  { %v981_v60 = vpop.permute.xlu0 %980 }
 0xd9d   :  { %1298 = vst.msk [vmem:[%s1841_s6 + $0x14] sm:$0xf] %vm507_vm2, %v981_v60 }
 0xda0   :  { %v1075_v12 = vpop.permute.xlu0 %1074 }
 0xda1   :  { %1304 = vst.msk [vmem:[%s1841_s6 + $0x18] sm:$0xf] %vm507_vm2, %v1075_v12 }
 0xe58   :  { %v1123_v62 = vpop.f32.mrb[28].mxu1 }
 0xe59   :  { %v1140_v7 = vadd.f32 %v1640_v30, %v1123_v62  ;;  %v1125_v63 = vpop.f32.mrb[29].mxu1 }
 0xe5a   :  { %v1141_v4 = vadd.f32 %v1642_v38, %v1125_v63  ;;  %v1127_v19 = vpop.f32.mrb[30].mxu1 }
 0xe5b   :  { %v1307_v20 = vmul.f32 -1.442695, %v1140_v7  ;;  %v1128_v21 = vpop.f32.mrb[31].mxu1 }
 0xe5c   :  { %v1308_v30 = vmul.f32 -1.442695, %v1141_v4 }
 0xe5d   :  { %1433 = vpow2.f32 %v1307_v20 }
 0xe5e   :  { %1435 = vtanh.f32 %v1141_v4 }
 0xe67   :  { %v1434_v9 = vpop.eup %1433 }
 0xe68   :  { %v1145_v22 = vadd.f32 1.0, %v1434_v9  ;;  %v1436_v1 = vpop.eup %1435 }
 0xe6a   :  { %1437 = vrcp.f32 %v1145_v22 }
 0xe6b   :  { %1439 = vpow2.f32 %v1308_v30 }
 0xe74   :  { %v1438_v24 = vpop.eup %1437 }
 0xe75   :  { %v1156_v10 = vmul.f32 %v1438_v24, %v1436_v1  ;;  %v1440_v38 = vpop.eup %1439  ;;  %v1155_v11 = vmul.f32 %v1438_v24, %v1067_v48 }
 0xe77   :  { %1158 = vrot.lane.b32.xlu1 %v1156_v10, %s1447_s8 }
 0xe7b   :  { %509 = vrot.lane.b32.xlu1 %v1645_v3, %s1448_s27  ;;  %v1152_v3 = vadd.f32 1.0, %v1440_v38 }
 0xe7d   :  { %1441 = vrcp.f32 %v1152_v3 }
 0xe7f   :  { %605 = vrot.lane.b32.xlu1 %v1660_v41, %s1448_s27 }
 0xe83   :  { %701 = vrot.lane.b32.xlu1 %v1677_v6, %s1448_s27 }
 0xe87   :  { %797 = vrot.lane.b32.xlu1 %v1694_v49, %s1448_s27 }
 0xe8b   :  { %891 = vrot.lane.b32.xlu1 %v1710_v0, %s1448_s27  ;;  %v1442_v0 = vpop.eup %1441 }
 0xe8f   :  { %985 = vrot.lane.b32.xlu1 %v1726_v42, %s1448_s27 }
 0xe93   :  { %1079 = vrot.lane.b32.xlu1 %v1070_v34, %s1448_s27 }
 0xee9   :  { %v1159_v41 = vpop.permute.xlu1 %1158 }
 0xeea   :  { %v1161_v14 = vadd.f32 %v1159_v41, %v1155_v11 }
 0xeec   :  { %1443 = vtanh.f32 %v1161_v14 }
 0xeed   :  { %v510_v6 = vpop.permute.xlu1 %509 }
 0xeee   :  { %1269 = vst.msk [vmem:[%s1842_s7 + $0x1c] sm:$0xf] %vm507_vm2, %v510_v6 }
 0xef1   :  { %v606_v49 = vpop.permute.xlu1 %605 }
 0xef2   :  { %1275 = vst.msk [vmem:[%s1842_s7 + $0x18] sm:$0xf] %vm507_vm2, %v606_v49 }
 0xef5   :  { %v702_v15 = vpop.permute.xlu1 %701 }
 0xef6   :  { %v1444_v25 = vpop.eup %1443  ;;  %1281 = vst.msk [vmem:[%s1842_s7 + $0x14] sm:$0xf] %vm507_vm2, %v702_v15 }
 0xef7   :  { %v1163_v16 = vmul.f32 %v1444_v25, %v1442_v0 }
 0xef9   :  { %v798_v18 = vpop.permute.xlu1 %797  ;;  %v1318_v13 = vpack.c.bf16 %v1163_v16, %v1163_v16 }
 0xefa   :  { %1287 = vst.msk [vmem:[%s1842_s7 + $0x10] sm:$0xf] %vm507_vm2, %v798_v18 }
 0xefb   :  { %1173 = vrot.lane.b32.xlu1 %v1318_v13, %s1448_s27  ;;  %1168 = vrot.lane.b32.xlu0 %v1318_v13, %s1447_s8 }
 0xefd   :  { %v892_v26 = vpop.permute.xlu1 %891 }
 0xefe   :  { %1293 = vst.msk [vmem:[%s1842_s7 + $0xc] sm:$0xf] %vm507_vm2, %v892_v26 }
 0xeff   :  { %1183 = vrot.lane.b32.xlu1 %v1161_v14, %s1447_s8  ;;  %1178 = vrot.lane.b32.xlu0 %v1163_v16, %s1447_s8 }
 0xf01   :  { %v986_v27 = vpop.permute.xlu1 %985 }
 0xf02   :  { %1299 = vst.msk [vmem:[%s1842_s7 + $0x8] sm:$0xf] %vm507_vm2, %v986_v27 }
 0xf05   :  { %v1080_v17 = vpop.permute.xlu1 %1079 }
 0xf06   :  { %1305 = vst.msk [vmem:[%s1842_s7 + $0x4] sm:$0xf] %vm507_vm2, %v1080_v17 }
 0xf6d   :  { %v1169_v29 = vpop.permute.xlu0 %1168  ;;  %v1174_v36 = vpop.permute.xlu1 %1173 }
 0xf6e   :  { %1310 = vst.msk [vmem:[%s1841_s6 + $0x1c] sm:$0xf] %vm507_vm2, %v1169_v29  ;;  %1176 = vst.msk [vmem:[%s1842_s7] sm:$0xf] %vm507_vm2, %v1174_v36 }
 0xf71   :  { %v1179_v39 = vpop.permute.xlu0 %1178  ;;  %v1184_v42 = vpop.permute.xlu1 %1183 }
 0xf72   :  { %1181 = vst.msk [vmem:[#allocation2] sm:$0xff] %vm66_vm0, %v1179_v39  ;;  %1186 = vst.msk [vmem:[#allocation3] sm:$0xff] %vm66_vm0, %v1184_v42 }

// kernel: bilstm_forward.3
= control target key start
LH: loop header
LB: loop body
LE: loop exit
PB: predicated region body
PF: predicated region fallthrough
CT: control target
= control target key end

     0   :  { %vm100_vm0 = vcmask 523264   ;;  %v1885_v1 = vmov 0   ;;  %v1886_v2 = vmov 0.0   ;;  %vm176_vm1 = vcmask 261120   ;;  %s1887_s23 = smov 64   ;;  %s2371_s5 = inlined_call_operand.vmem [shape: bf16[32,256], index: 5, kind: input, shape index: {}]   ;;  %s2372_s7 = inlined_call_operand.vmem [shape: bf16[32,256], index: 7, kind: input, shape index: {}]   ;;  %s2373_s1 = inlined_call_operand.vmem [shape: bf16[64,32], index: 1, kind: input, shape index: {}, may-alias: {1,3}]   ;;  %s2374_s4 = inlined_call_operand.vmem [shape: bf16[32,256], index: 4, kind: input, shape index: {}]   ;;  %s2375_s3 = inlined_call_operand.vmem [shape: bf16[64,32], index: 3, kind: input, shape index: {}, may-alias: {1,3}]   ;;  %s2376_s6 = inlined_call_operand.vmem [shape: bf16[32,256], index: 6, kind: input, shape index: {}]   ;;  %s2377_s0 = inlined_call_operand.vmem [shape: bf16[64,32], index: 0, kind: input, shape index: {}, may-alias: {0,2}]   ;;  %s2378_s2 = inlined_call_operand.vmem [shape: bf16[64,32], index: 2, kind: input, shape index: {}, may-alias: {0,2}]   ;;  %s2379_s8 = inlined_call_operand.vmem [shape: bf16[64,256], index: 8, kind: input, shape index: {}]   ;;  %s2380_s9 = inlined_call_operand.vmem [shape: f32[1,256], index: 9, kind: input, shape index: {}]   ;;  %s2381_s10 = inlined_call_operand.vmem [shape: bf16[64,32], index: 10, kind: output, shape index: {0}]   ;;  %s2382_s11 = inlined_call_operand.vmem [shape: bf16[64,32], index: 11, kind: output, shape index: {1}]  }
   0x1   :  { %v1737_v0 = vld [vmem:[%s2371_s5 + $0x4] ss:$8 sps:$4 sm:$0xff]   ;;  %221 = vmatprep.mubr.bf16.mxu0 %v1885_v1  ;;  %538 = vmatprep.mubr.bf16.mxu1 %v1885_v1  ;;  %101 = vst.msk [vmem:[#allocation2] sm:$0xff] %vm100_vm0, %v1886_v2  ;;  %102 = vst.msk [vmem:[#allocation3] sm:$0xff] %vm100_vm0, %v1886_v2  ;;  %v1741_v4 = vld [vmem:[%s2371_s5] ss:$8 sps:$4 sm:$0xff]   ;;  %v388_v45 = vlaneseq }
   0x2   :  { %v1739_v3 = vld [vmem:[%s2372_s7 + $0x4] ss:$8 sps:$4 sm:$0xff]   ;;  %189 = vmatprep.subr.bf16.mxu0 %v1737_v0  ;;  %v1742_v5 = vld [vmem:[%s2372_s7] ss:$8 sps:$4 sm:$0xff]   ;;  %v1743_v6 = vld [vmem:[%s2371_s5 + $0x14] ss:$8 sps:$4 sm:$0xff]  }
   0x3   :  { %506 = vmatprep.subr.bf16.mxu1 %v1739_v3  ;;  %190 = vmatpush1.bf16.msra.mxu0 %v1741_v4  ;;  %v1745_v7 = vld [vmem:[%s2372_s7 + $0x14] ss:$8 sps:$4 sm:$0xff]   ;;  %v1747_v8 = vld [vmem:[%s2371_s5 + $0x10] ss:$8 sps:$4 sm:$0xff]   ;;  %v1749_v10 = vld [vmem:[%s2373_s1] sm:$0xff]   ;;  %v389_v46 = vshrl.u32 %v388_v45, 7 }
   0x4   :  { %507 = vmatpush1.bf16.msra.mxu1 %v1742_v5  ;;  %191 = vmatprep.subr.bf16.mxu0 %v1743_v6  ;;  %v1748_v9 = vld [vmem:[%s2372_s7 + $0x10] ss:$8 sps:$4 sm:$0xff]   ;;  %v1750_v11 = vld [vmem:[%s2374_s4] ss:$8 sps:$4 sm:$0xff]   ;;  %v1752_v12 = vld [vmem:[%s2374_s4 + $0x4] ss:$8 sps:$4 sm:$0xff]  }
   0x5   :  { %508 = vmatprep.subr.bf16.mxu1 %v1745_v7  ;;  %v1753_v13 = vld [vmem:[%s2375_s3] sm:$0xff]   ;;  %v1757_v16 = vld [vmem:[%s2373_s1 + $0x8] sm:$0xff]   ;;  %v1760_v17 = vld [vmem:[%s2374_s4 + $0x10] ss:$8 sps:$4 sm:$0xff]   ;;  %v390_v47 = vsub.s32 0, %v389_v46  ;;  %v394_v49 = vsub.s32 1, %v389_v46 }
   0x6   :  { %v1754_v14 = vld [vmem:[%s2376_s6] ss:$8 sps:$4 sm:$0xff]   ;;  %v1756_v15 = vld [vmem:[%s2376_s6 + $0x4] ss:$8 sps:$4 sm:$0xff]   ;;  %v1762_v18 = vld [vmem:[%s2374_s4 + $0x14] ss:$8 sps:$4 sm:$0xff]  }
   0x7   :  { %192 = vmatpush1.bf16.msra.mxu0 %v1747_v8  ;;  %v1758_v19 = vld [vmem:[%s2375_s3 + $0x8] sm:$0xff]   ;;  %v1766_v20 = vld [vmem:[%s2376_s6 + $0x14] ss:$8 sps:$4 sm:$0xff]   ;;  %v1764_v21 = vld [vmem:[%s2376_s6 + $0x10] ss:$8 sps:$4 sm:$0xff]   ;;  %vm855_vm2 = vcmask 257024  }
   0x8   :  { %509 = vmatpush1.bf16.msra.mxu1 %v1748_v9  ;;  %314 = vmatprep.subr.bf16.mxu0 %v1752_v12  ;;  %v2024_v22 = vld [vmem:[%s2379_s8 + $0x4] ss:$8 sps:$4 sm:$0xff]   ;;  %v1759_v23 = vld [vmem:[%s2373_s1 + $0x10] sm:$0xff]   ;;  %v1767_v25 = vld [vmem:[%s2373_s1 + $0x18] sm:$0xff]   ;;  %s1888_s6 = smov 32  }
   0x9   :  { %631 = vmatprep.subr.bf16.mxu1 %v1756_v15  ;;  %v1763_v24 = vld [vmem:[%s2375_s3 + $0x10] sm:$0xff]   ;;  %v1768_v26 = vld [vmem:[%s2375_s3 + $0x18] sm:$0xff]   ;;  %v721_v27 = vld [vmem:[#allocation3] sm:$0xff] }
   0xa   :  { %1599 = vmatmul.mubr.msk.bf16.vlgmr.msra.gmra.mrb[0].mxu0 %vm176_vm1, %v1749_v10  ;;  %836 = vrot.lane.b32.xlu0 %v721_v27, %s1887_s23  ;;  %v1769_v28 = vld [vmem:[%s2377_s0] sm:$0xff]   ;;  %v2063_v31 = vld [vmem:[%s2379_s8 + $0x14] ss:$8 sps:$4 sm:$0xff]   ;;  %v2072_v32 = vld [vmem:[%s2379_s8 + $0x10] ss:$8 sps:$4 sm:$0xff]  }
   0xb   :  { %1623 = vmatmul.mubr.msk.bf16.vlgmr.msra.gmra.mrb[0].mxu1 %vm176_vm1, %v1753_v13  ;;  %315 = vmatpush1.bf16.msra.mxu0 %v1750_v11  ;;  %v1770_v29 = vld [vmem:[%s2378_s2] sm:$0xff]   ;;  %v1774_v34 = vld [vmem:[%s2377_s0 + $0x8] sm:$0xff]   ;;  %v2099_v37 = vld [vmem:[%s2379_s8 + $0x34] ss:$8 sps:$4 sm:$0xff]  }
   0xc   :  { %632 = vmatpush1.bf16.msra.mxu1 %v1754_v14  ;;  %231 = vmatprep.mubr.bf16.mxu0 %v1885_v1  ;;  %v2058_v30 = vld [vmem:[%s2379_s8] ss:$8 sps:$4 sm:$0xff]   ;;  %v2079_v33 = vld [vmem:[%s2379_s8 + $0x24] ss:$8 sps:$4 sm:$0xff]   ;;  %v2110_v38 = vld [vmem:[%s2379_s8 + $0x30] ss:$8 sps:$4 sm:$0xff]  }
   0xd   :  { %548 = vmatprep.mubr.bf16.mxu1 %v1885_v1  ;;  %316 = vmatprep.subr.bf16.mxu0 %v1762_v18  ;;  %v1775_v35 = vld [vmem:[%s2378_s2 + $0x8] sm:$0xff]   ;;  %v1779_v39 = vld [vmem:[%s2377_s0 + $0x10] sm:$0xff]   ;;  %v1784_v41 = vld [vmem:[%s2377_s0 + $0x18] sm:$0xff]  }
   0xe   :  { %633 = vmatprep.subr.bf16.mxu1 %v1766_v20  ;;  %v2094_v36 = vld [vmem:[%s2379_s8 + $0x20] ss:$8 sps:$4 sm:$0xff]   ;;  %v1780_v40 = vld [vmem:[%s2378_s2 + $0x10] sm:$0xff]   ;;  %v1785_v42 = vld [vmem:[%s2378_s2 + $0x18] sm:$0xff]  }
   0xf   :  { %317 = vmatpush1.bf16.msra.mxu0 %v1760_v17  ;;  %v720_v43 = vld [vmem:[#allocation2] sm:$0xff] }
  0x10   :  { %634 = vmatpush1.bf16.msra.mxu1 %v1764_v21  ;;  %767 = vmatprep.subr.bf16.mxu0 %v2024_v22  ;;  %v722_v44 = vpack.c.bf16 %v720_v43, %v720_v43  ;;  %v111_v48 = vld [vmem:[%s2380_s9] sm:$0x3] }
  0x11   :  { %867 = vmatprep.subr.bf16.mxu1 %v2024_v22  ;;  %v391_v52 = vrot.slane %v111_v48, %v390_v47  ;;  %v395_v55 = vrot.slane %v111_v48, %v394_v49 }
  0x12   :  { %1600 = vmatmul.mubr.msk.bf16.gmra.mrb[4].mxu0 %vm176_vm1, %v1757_v16 }
  0x13   :  { %1624 = vmatmul.mubr.msk.bf16.gmra.mrb[4].mxu1 %vm176_vm1, %v1758_v19  ;;  %241 = vmatprep.mubr.bf16.mxu0 %v1885_v1 }
  0x14   :  { %558 = vmatprep.mubr.bf16.mxu1 %v1885_v1 }
  0x1a   :  { %1601 = vmatmul.mubr.msk.bf16.gmra.mrb[8].mxu0 %vm176_vm1, %v1759_v23 }
  0x1b   :  { %1625 = vmatmul.mubr.msk.bf16.gmra.mrb[8].mxu1 %vm176_vm1, %v1763_v24  ;;  %251 = vmatprep.mubr.bf16.mxu0 %v1885_v1 }
  0x1c   :  { %568 = vmatprep.mubr.bf16.mxu1 %v1885_v1 }
  0x22   :  { %1602 = vmatmul.mubr.msk.bf16.gmra.mrb[12].mxu0 %vm176_vm1, %v1767_v25 }
  0x23   :  { %1626 = vmatmul.mubr.msk.bf16.gmra.mrb[12].mxu1 %vm176_vm1, %v1768_v26  ;;  %346 = vmatprep.mubr.bf16.mxu0 %v1885_v1 }
  0x24   :  { %663 = vmatprep.mubr.bf16.mxu1 %v1885_v1 }
  0x2a   :  { %1611 = vmatmul.mubr.msk.bf16.vlgmr.msra.gmra.mrb[0].mxu0 %vm176_vm1, %v1769_v28 }
  0x2b   :  { %1635 = vmatmul.mubr.msk.bf16.vlgmr.msra.gmra.mrb[0].mxu1 %vm176_vm1, %v1770_v29  ;;  %768 = vmatpush1.bf16.msra.mxu0 %v2058_v30 }
  0x2c   :  { %356 = vmatprep.mubr.bf16.mxu0 %v1885_v1  ;;  %673 = vmatprep.mubr.bf16.mxu1 %v1885_v1 }
  0x2d   :  { %769 = vmatprep.subr.bf16.mxu0 %v2063_v31  ;;  %868 = vmatpush1.bf16.msra.mxu1 %v2058_v30 }
  0x2e   :  { %869 = vmatprep.subr.bf16.mxu1 %v2063_v31 }
  0x2f   :  { %770 = vmatpush1.bf16.msra.mxu0 %v2072_v32 }
  0x30   :  { %771 = vmatprep.subr.bf16.mxu0 %v2079_v33 }
  0x31   :  { %870 = vmatpush1.bf16.msra.mxu1 %v2072_v32 }
  0x32   :  { %1612 = vmatmul.mubr.msk.bf16.gmra.mrb[4].mxu0 %vm176_vm1, %v1774_v34  ;;  %871 = vmatprep.subr.bf16.mxu1 %v2079_v33 }
  0x33   :  { %1636 = vmatmul.mubr.msk.bf16.gmra.mrb[4].mxu1 %vm176_vm1, %v1775_v35  ;;  %366 = vmatprep.mubr.bf16.mxu0 %v1885_v1 }
  0x34   :  { %683 = vmatprep.mubr.bf16.mxu1 %v1885_v1  ;;  %772 = vmatpush1.bf16.msra.mxu0 %v2094_v36 }
  0x35   :  { %773 = vmatprep.subr.bf16.mxu0 %v2099_v37  ;;  %872 = vmatpush1.bf16.msra.mxu1 %v2094_v36 }
  0x36   :  { %873 = vmatprep.subr.bf16.mxu1 %v2099_v37 }
  0x38   :  { %774 = vmatpush1.bf16.msra.mxu0 %v2110_v38 }
  0x39   :  { %874 = vmatpush1.bf16.msra.mxu1 %v2110_v38  ;;  %963 = vmatprep.subr.bf16.mxu0 %v2024_v22 }
  0x3a   :  { %1613 = vmatmul.mubr.msk.bf16.gmra.mrb[8].mxu0 %vm176_vm1, %v1779_v39  ;;  %1059 = vmatprep.subr.bf16.mxu1 %v2024_v22 }
  0x3b   :  { %1637 = vmatmul.mubr.msk.bf16.gmra.mrb[8].mxu1 %vm176_vm1, %v1780_v40  ;;  %376 = vmatprep.mubr.bf16.mxu0 %v1885_v1 }
  0x3c   :  { %693 = vmatprep.mubr.bf16.mxu1 %v1885_v1 }
  0x42   :  { %1614 = vmatmul.mubr.msk.bf16.gmra.mrb[12].mxu0 %vm176_vm1, %v1784_v41 }
  0x43   :  { %1638 = vmatmul.mubr.msk.bf16.gmra.mrb[12].mxu1 %vm176_vm1, %v1785_v42  ;;  %799 = vmatprep.mubr.bf16.mxu0 %v1885_v1 }
  0x44   :  { %899 = vmatprep.mubr.bf16.mxu1 %v1885_v1 }
  0x4a   :  { %1647 = vmatmul.mubr.msk.bf16.vlgmr.msra.gmra.mrb[16].mxu0 %vm100_vm0, %v722_v44 }
  0x4b   :  { %964 = vmatpush1.bf16.msra.mxu0 %v2058_v30  ;;  %995 = vmatprep.mubr.bf16.mxu0 %v1885_v1 }
  0x4c   :  { %965 = vmatprep.subr.bf16.mxu0 %v2063_v31 }
  0x4f   :  { %966 = vmatpush1.bf16.msra.mxu0 %v2072_v32 }
  0x50   :  { %967 = vmatprep.subr.bf16.mxu0 %v2079_v33 }
  0x53   :  { %968 = vmatpush1.bf16.msra.mxu0 %v2094_v36 }
  0x54   :  { %969 = vmatprep.subr.bf16.mxu0 %v2099_v37 }
  0x57   :  { %970 = vmatpush1.bf16.msra.mxu0 %v2110_v38 }
  0x58   :  { %1155 = vmatprep.subr.bf16.mxu0 %v2024_v22 }
  0xfd   :  { %v348_v50 = vpop.f32.mrb[0].mxu0 }
  0xfe   :  { %v2153_v51 = vpop.f32.mrb[0].mxu1  ;;  %v350_v53 = vpop.f32.mrb[1].mxu0  ;;  %v398_v41 = vadd.f32 %v391_v52, %v348_v50 }
  0xff   :  { %v667_v54 = vpop.f32.mrb[1].mxu1  ;;  %v352_v56 = vpop.f32.mrb[2].mxu0  ;;  %v399_v46 = vadd.f32 %v395_v55, %v350_v53 }
 0x100   :  { %v669_v57 = vpop.f32.mrb[2].mxu1  ;;  %v400_v58 = vadd.f32 %v391_v52, %v352_v56  ;;  %v354_v59 = vpop.f32.mrb[3].mxu0 }
 0x101   :  { %v671_v60 = vpop.f32.mrb[3].mxu1  ;;  %v401_v61 = vadd.f32 %v395_v55, %v354_v59 }
 0x105   :  { %v358_v62 = vpop.f32.mrb[4].mxu0 }
 0x106   :  { %v675_v63 = vpop.f32.mrb[4].mxu1  ;;  %v402_v0 = vadd.f32 %v391_v52, %v358_v62  ;;  %v360_v2 = vpop.f32.mrb[5].mxu0 }
 0x107   :  { %v677_v3 = vpop.f32.mrb[5].mxu1  ;;  %v403_v4 = vadd.f32 %v395_v55, %v360_v2  ;;  %v362_v5 = vpop.f32.mrb[6].mxu0 }
 0x108   :  { %v679_v6 = vpop.f32.mrb[6].mxu1  ;;  %v404_v7 = vadd.f32 %v391_v52, %v362_v5  ;;  %v364_v8 = vpop.f32.mrb[7].mxu0 }
 0x109   :  { %v681_v9 = vpop.f32.mrb[7].mxu1  ;;  %v405_v10 = vadd.f32 %v395_v55, %v364_v8 }
 0x10d   :  { %v368_v11 = vpop.f32.mrb[8].mxu0 }
 0x10e   :  { %v685_v12 = vpop.f32.mrb[8].mxu1  ;;  %v406_v13 = vadd.f32 %v391_v52, %v368_v11  ;;  %v370_v15 = vpop.f32.mrb[9].mxu0 }
 0x10f   :  { %v2155_v14 = vadd.f32 %v685_v12, %v404_v7  ;;  %v687_v16 = vpop.f32.mrb[9].mxu1  ;;  %v407_v17 = vadd.f32 %v395_v55, %v370_v15  ;;  %v372_v19 = vpop.f32.mrb[10].mxu0 }
 0x110   :  { %v2157_v18 = vadd.f32 %v687_v16, %v405_v10  ;;  %v689_v20 = vpop.f32.mrb[10].mxu1  ;;  %v408_v21 = vadd.f32 %v391_v52, %v372_v19  ;;  %v374_v24 = vpop.f32.mrb[11].mxu0  ;;  %v2161_v26 = vadd.f32 %v679_v6, %v406_v13 }
 0x111   :  { %v2159_v23 = vadd.f32 %v689_v20, %v402_v0  ;;  %v691_v25 = vpop.f32.mrb[11].mxu1  ;;  %v409_v27 = vadd.f32 %v395_v55, %v374_v24  ;;  %v2165_v29 = vadd.f32 %v681_v9, %v407_v17  ;;  %v837_v12 = vpop.permute.xlu0 %836 }
 0x112   :  { %v2163_v28 = vadd.f32 %v691_v25, %v403_v4  ;;  %v2167_v34 = vadd.f32 %v675_v63, %v408_v21 }
 0x113   :  { %v2169_v35 = vadd.f32 %v677_v3, %v409_v27 }
 0x115   :  { %v378_v39 = vpop.f32.mrb[12].mxu0 }
 0x116   :  { %v695_v40 = vpop.f32.mrb[12].mxu1  ;;  %v410_v42 = vadd.f32 %v391_v52, %v378_v39  ;;  %v380_v44 = vpop.f32.mrb[13].mxu0 }
 0x117   :  { %v918_v43 = vadd.f32 %v695_v40, %v400_v58  ;;  %v697_v45 = vpop.f32.mrb[13].mxu1  ;;  %v411_v47 = vadd.f32 %v395_v55, %v380_v44  ;;  %v382_v49 = vpop.f32.mrb[14].mxu0 }
 0x118   :  { %v919_v48 = vadd.f32 %v697_v45, %v401_v61  ;;  %v699_v56 = vpop.f32.mrb[14].mxu1  ;;  %v412_v59 = vadd.f32 %v391_v52, %v382_v49  ;;  %v384_v0 = vpop.f32.mrb[15].mxu0  ;;  %v2171_v63 = vadd.f32 %v669_v57, %v410_v42 }
 0x119   :  { %v818_v62 = vadd.f32 %v699_v56, %v398_v41  ;;  %v701_v2 = vpop.f32.mrb[15].mxu1  ;;  %v413_v3 = vadd.f32 %v395_v55, %v384_v0  ;;  %v2173_v5 = vadd.f32 %v671_v60, %v411_v47 }
 0x11a   :  { %v819_v4 = vadd.f32 %v701_v2, %v399_v46  ;;  %v2176_v50 = vadd.f32 %v2153_v51, %v412_v59 }
 0x11b   :  { %v2178_v58 = vadd.f32 %v667_v54, %v413_v3 }
 0x11d   :  { %v801_v53 = vpop.f32.mrb[16].mxu0 }
 0x11e   :  { %v820_v6 = vadd.f32 %v818_v62, %v801_v53  ;;  %v803_v61 = vpop.f32.mrb[17].mxu0 }
 0x11f   :  { %v821_v7 = vadd.f32 %v819_v4, %v803_v61  ;;  %v805_v8 = vpop.f32.mrb[18].mxu0 }
 0x120   :  { %v1648_v52 = vmul.f32 -1.442695, %v820_v6  ;;  %v806_v9 = vpop.f32.mrb[19].mxu0 }
 0x121   :  { %v1649_v51 = vmul.f32 -1.442695, %v821_v7 }
 0x122   :  { %1789 = vpow2.f32 %v1648_v52 }
 0x123   :  { %1791 = vtanh.f32 %v821_v7 }
 0x12c   :  { %v1790_v10 = vpop.eup %1789 }
 0x12d   :  { %v825_v57 = vadd.f32 1.0, %v1790_v10  ;;  %v1792_v55 = vpop.eup %1791 }
 0x12f   :  { %1793 = vrcp.f32 %v825_v57 }
 0x130   :  { %1795 = vpow2.f32 %v1649_v51 }
 0x139   :  { %v1794_v60 = vpop.eup %1793 }
 0x13a   :  { %v840_v11 = vmul.f32 %v1794_v60, %v1792_v55  ;;  %v1796_v54 = vpop.eup %1795  ;;  %v839_v15 = vmul.f32 %v1794_v60, %v837_v12 }
 0x13b   :  { %v832_v13 = vadd.f32 1.0, %v1796_v54 }
 0x13c   :  { %842 = vrot.lane.b32.xlu0 %v840_v11, %s1887_s23 }
 0x13d   :  { %1797 = vrcp.f32 %v832_v13 }
 0x147   :  { %v1798_v19 = vpop.eup %1797 }
 0x1ae   :  { %v843_v16 = vpop.permute.xlu0 %842 }
 0x1af   :  { %v845_v17 = vadd.f32 %v843_v16, %v839_v15 }
 0x1b1   :  { %1799 = vtanh.f32 %v845_v17 }
 0x1bb   :  { %v1800_v20 = vpop.eup %1799 }
 0x1bc   :  { %v847_v21 = vmul.f32 %v1800_v20, %v1798_v19 }
 0x1be   :  { %v2181_v24 = vpack.c.bf16 %v847_v21, %v847_v21 }
 0x1c0   :  { %862 = vrot.lane.b32.xlu1 %v2181_v24, %s1887_s23 }
 0x232   :  { %v863_v25 = vpop.permute.xlu1 %862 }
 0x233   :  { %1652 = vmatmul.mubr.msk.bf16.vlgmr.msra.gmra.mrb[16].mxu1 %vm100_vm0, %v863_v25 }
 0x234   :  { %1060 = vmatpush1.bf16.msra.mxu1 %v2058_v30  ;;  %1091 = vmatprep.mubr.bf16.mxu1 %v1885_v1 }
 0x235   :  { %1061 = vmatprep.subr.bf16.mxu1 %v2063_v31 }
 0x238   :  { %1062 = vmatpush1.bf16.msra.mxu1 %v2072_v32 }
 0x239   :  { %1063 = vmatprep.subr.bf16.mxu1 %v2079_v33 }
 0x23c   :  { %1064 = vmatpush1.bf16.msra.mxu1 %v2094_v36 }
 0x23d   :  { %1065 = vmatprep.subr.bf16.mxu1 %v2099_v37 }
 0x240   :  { %1066 = vmatpush1.bf16.msra.mxu1 %v2110_v38 }
 0x241   :  { %1249 = vmatprep.subr.bf16.mxu1 %v2024_v22 }
 0x306   :  { %v901_v27 = vpop.f32.mrb[16].mxu1 }
 0x307   :  { %v920_v39 = vadd.f32 %v918_v43, %v901_v27  ;;  %v903_v40 = vpop.f32.mrb[17].mxu1 }
 0x308   :  { %v921_v41 = vadd.f32 %v919_v48, %v903_v40  ;;  %v905_v42 = vpop.f32.mrb[18].mxu1 }
 0x309   :  { %v1653_v44 = vmul.f32 -1.442695, %v920_v39  ;;  %v906_v45 = vpop.f32.mrb[19].mxu1 }
 0x30a   :  { %v1654_v62 = vmul.f32 -1.442695, %v921_v41 }
 0x30b   :  { %1801 = vpow2.f32 %v1653_v44 }
 0x30c   :  { %1803 = vtanh.f32 %v921_v41 }
 0x315   :  { %v1802_v46 = vpop.eup %1801 }
 0x316   :  { %v925_v47 = vadd.f32 1.0, %v1802_v46  ;;  %v1804_v49 = vpop.eup %1803 }
 0x318   :  { %1805 = vrcp.f32 %v925_v47 }
 0x319   :  { %1807 = vpow2.f32 %v1654_v62 }
 0x322   :  { %v1806_v56 = vpop.eup %1805 }
 0x323   :  { %v936_v59 = vmul.f32 %v1806_v56, %v1804_v49  ;;  %v1808_v0 = vpop.eup %1807  ;;  %v935_v43 = vmul.f32 %v1806_v56, %v845_v17 }
 0x324   :  { %v932_v2 = vadd.f32 1.0, %v1808_v0 }
 0x325   :  { %938 = vrot.lane.b32.xlu1 %v936_v59, %s1887_s23 }
 0x326   :  { %1809 = vrcp.f32 %v932_v2 }
 0x330   :  { %v1810_v4 = vpop.eup %1809 }
 0x397   :  { %v939_v3 = vpop.permute.xlu1 %938 }
 0x398   :  { %v941_v48 = vadd.f32 %v939_v3, %v935_v43 }
 0x39a   :  { %1811 = vtanh.f32 %v941_v48 }
 0x3a4   :  { %v1812_v53 = vpop.eup %1811 }
 0x3a5   :  { %v943_v6 = vmul.f32 %v1812_v53, %v1810_v4 }
 0x3a7   :  { %v2196_v61 = vpack.c.bf16 %v943_v6, %v943_v6 }
 0x3a9   :  { %958 = vrot.lane.b32.xlu0 %v2196_v61, %s1887_s23 }
 0x41b   :  { %v959_v7 = vpop.permute.xlu0 %958 }
 0x41c   :  { %1658 = vmatmul.mubr.msk.bf16.vlgmr.msra.gmra.mrb[20].mxu0 %vm100_vm0, %v959_v7 }
 0x41d   :  { %1156 = vmatpush1.bf16.msra.mxu0 %v2058_v30  ;;  %1187 = vmatprep.mubr.bf16.mxu0 %v1885_v1 }
 0x41e   :  { %1157 = vmatprep.subr.bf16.mxu0 %v2063_v31 }
 0x421   :  { %1158 = vmatpush1.bf16.msra.mxu0 %v2072_v32 }
 0x422   :  { %1159 = vmatprep.subr.bf16.mxu0 %v2079_v33 }
 0x425   :  { %1160 = vmatpush1.bf16.msra.mxu0 %v2094_v36 }
 0x426   :  { %1161 = vmatprep.subr.bf16.mxu0 %v2099_v37 }
 0x429   :  { %1162 = vmatpush1.bf16.msra.mxu0 %v2110_v38 }
 0x42a   :  { %1343 = vmatprep.subr.bf16.mxu0 %v2024_v22 }
 0x4ef   :  { %v997_v8 = vpop.f32.mrb[20].mxu0 }
 0x4f0   :  { %v1016_v52 = vadd.f32 %v2159_v23, %v997_v8  ;;  %v999_v9 = vpop.f32.mrb[21].mxu0 }
 0x4f1   :  { %v1017_v10 = vadd.f32 %v2163_v28, %v999_v9  ;;  %v1001_v57 = vpop.f32.mrb[22].mxu0 }
 0x4f2   :  { %v1659_v55 = vmul.f32 -1.442695, %v1016_v52  ;;  %v1002_v60 = vpop.f32.mrb[23].mxu0 }
 0x4f3   :  { %v1660_v15 = vmul.f32 -1.442695, %v1017_v10 }
 0x4f4   :  { %1813 = vpow2.f32 %v1659_v55 }
 0x4f5   :  { %1815 = vtanh.f32 %v1017_v10 }
 0x4fe   :  { %v1814_v11 = vpop.eup %1813 }
 0x4ff   :  { %v1021_v51 = vadd.f32 1.0, %v1814_v11  ;;  %v1816_v54 = vpop.eup %1815 }
 0x501   :  { %1817 = vrcp.f32 %v1021_v51 }
 0x502   :  { %1819 = vpow2.f32 %v1660_v15 }
 0x50b   :  { %v1818_v12 = vpop.eup %1817 }
 0x50c   :  { %v1032_v13 = vmul.f32 %v1818_v12, %v1816_v54  ;;  %v1820_v16 = vpop.eup %1819  ;;  %v1031_v17 = vmul.f32 %v1818_v12, %v941_v48 }
 0x50d   :  { %v1028_v23 = vadd.f32 1.0, %v1820_v16 }
 0x50e   :  { %1034 = vrot.lane.b32.xlu1 %v1032_v13, %s1887_s23 }
 0x50f   :  { %1821 = vrcp.f32 %v1028_v23 }
 0x519   :  { %v1822_v20 = vpop.eup %1821 }
 0x580   :  { %v1035_v19 = vpop.permute.xlu1 %1034 }
 0x581   :  { %v1037_v28 = vadd.f32 %v1035_v19, %v1031_v17 }
 0x583   :  { %1823 = vtanh.f32 %v1037_v28 }
 0x58d   :  { %v1824_v21 = vpop.eup %1823 }
 0x58e   :  { %v1039_v25 = vmul.f32 %v1824_v21, %v1822_v20 }
 0x590   :  { %v2213_v27 = vpack.c.bf16 %v1039_v25, %v1039_v25 }
 0x592   :  { %1054 = vrot.lane.b32.xlu0 %v2213_v27, %s1887_s23 }
 0x604   :  { %v1055_v39 = vpop.permute.xlu0 %1054 }
 0x605   :  { %1664 = vmatmul.mubr.msk.bf16.vlgmr.msra.gmra.mrb[20].mxu1 %vm100_vm0, %v1055_v39 }
 0x606   :  { %1250 = vmatpush1.bf16.msra.mxu1 %v2058_v30  ;;  %1281 = vmatprep.mubr.bf16.mxu1 %v1885_v1 }
 0x607   :  { %1251 = vmatprep.subr.bf16.mxu1 %v2063_v31 }
 0x60a   :  { %1252 = vmatpush1.bf16.msra.mxu1 %v2072_v32 }
 0x60b   :  { %1253 = vmatprep.subr.bf16.mxu1 %v2079_v33 }
 0x60e   :  { %1254 = vmatpush1.bf16.msra.mxu1 %v2094_v36 }
 0x60f   :  { %1255 = vmatprep.subr.bf16.mxu1 %v2099_v37 }
 0x612   :  { %1256 = vmatpush1.bf16.msra.mxu1 %v2110_v38 }
 0x613   :  { %1437 = vmatprep.subr.bf16.mxu1 %v2024_v22 }
 0x6d8   :  { %v1093_v40 = vpop.f32.mrb[20].mxu1 }
 0x6d9   :  { %v1112_v41 = vadd.f32 %v2155_v14, %v1093_v40  ;;  %v1095_v42 = vpop.f32.mrb[21].mxu1 }
 0x6da   :  { %v1113_v44 = vadd.f32 %v2157_v18, %v1095_v42  ;;  %v1097_v45 = vpop.f32.mrb[22].mxu1 }
 0x6db   :  { %v1665_v46 = vmul.f32 -1.442695, %v1112_v41  ;;  %v1098_v47 = vpop.f32.mrb[23].mxu1 }
 0x6dc   :  { %v1666_v22 = vmul.f32 -1.442695, %v1113_v44 }
 0x6dd   :  { %1825 = vpow2.f32 %v1665_v46 }
 0x6de   :  { %1827 = vtanh.f32 %v1113_v44 }
 0x6e7   :  { %v1826_v49 = vpop.eup %1825 }
 0x6e8   :  { %v1117_v56 = vadd.f32 1.0, %v1826_v49  ;;  %v1828_v59 = vpop.eup %1827 }
 0x6ea   :  { %1829 = vrcp.f32 %v1117_v56 }
 0x6eb   :  { %1831 = vpow2.f32 %v1666_v22 }
 0x6f4   :  { %v1830_v62 = vpop.eup %1829 }
 0x6f5   :  { %v1128_v0 = vmul.f32 %v1830_v62, %v1828_v59  ;;  %v1832_v2 = vpop.eup %1831  ;;  %v1127_v43 = vmul.f32 %v1830_v62, %v1037_v28 }
 0x6f6   :  { %v1124_v14 = vadd.f32 1.0, %v1832_v2 }
 0x6f7   :  { %1130 = vrot.lane.b32.xlu1 %v1128_v0, %s1887_s23 }
 0x6f8   :  { %1833 = vrcp.f32 %v1124_v14 }
 0x702   :  { %v1834_v48 = vpop.eup %1833 }
 0x769   :  { %v1131_v3 = vpop.permute.xlu1 %1130 }
 0x76a   :  { %v1133_v18 = vadd.f32 %v1131_v3, %v1127_v43 }
 0x76c   :  { %1835 = vtanh.f32 %v1133_v18 }
 0x776   :  { %v1836_v4 = vpop.eup %1835 }
 0x777   :  { %v1135_v53 = vmul.f32 %v1836_v4, %v1834_v48 }
 0x779   :  { %v2230_v6 = vpack.c.bf16 %v1135_v53, %v1135_v53 }
 0x77b   :  { %1150 = vrot.lane.b32.xlu0 %v2230_v6, %s1887_s23 }
 0x7ed   :  { %v1151_v7 = vpop.permute.xlu0 %1150 }
 0x7ee   :  { %1670 = vmatmul.mubr.msk.bf16.vlgmr.msra.gmra.mrb[24].mxu0 %vm100_vm0, %v1151_v7 }
 0x7ef   :  { %1344 = vmatpush1.bf16.msra.mxu0 %v2058_v30  ;;  %1375 = vmatprep.mubr.bf16.mxu0 %v1885_v1 }
 0x7f0   :  { %1345 = vmatprep.subr.bf16.mxu0 %v2063_v31 }
 0x7f3   :  { %1346 = vmatpush1.bf16.msra.mxu0 %v2072_v32 }
 0x7f4   :  { %1347 = vmatprep.subr.bf16.mxu0 %v2079_v33 }
 0x7f7   :  { %1348 = vmatpush1.bf16.msra.mxu0 %v2094_v36 }
 0x7f8   :  { %1349 = vmatprep.subr.bf16.mxu0 %v2099_v37 }
 0x7fb   :  { %1350 = vmatpush1.bf16.msra.mxu0 %v2110_v38 }
 0x8c1   :  { %v1189_v8 = vpop.f32.mrb[24].mxu0 }
 0x8c2   :  { %v1206_v52 = vadd.f32 %v2161_v26, %v1189_v8  ;;  %v1191_v9 = vpop.f32.mrb[25].mxu0 }
 0x8c3   :  { %v1207_v10 = vadd.f32 %v2165_v29, %v1191_v9  ;;  %v1193_v57 = vpop.f32.mrb[26].mxu0 }
 0x8c4   :  { %v1671_v55 = vmul.f32 -1.442695, %v1206_v52  ;;  %v1194_v60 = vpop.f32.mrb[27].mxu0 }
 0x8c5   :  { %v1672_v15 = vmul.f32 -1.442695, %v1207_v10 }
 0x8c6   :  { %1837 = vpow2.f32 %v1671_v55 }
 0x8c7   :  { %1839 = vtanh.f32 %v1207_v10 }
 0x8d0   :  { %v1838_v11 = vpop.eup %1837 }
 0x8d1   :  { %v1211_v51 = vadd.f32 1.0, %v1838_v11  ;;  %v1840_v54 = vpop.eup %1839 }
 0x8d3   :  { %1841 = vrcp.f32 %v1211_v51 }
 0x8d4   :  { %1843 = vpow2.f32 %v1672_v15 }
 0x8dd   :  { %v1842_v12 = vpop.eup %1841 }
 0x8de   :  { %v1222_v13 = vmul.f32 %v1842_v12, %v1840_v54  ;;  %v1844_v16 = vpop.eup %1843  ;;  %v1221_v23 = vmul.f32 %v1842_v12, %v1133_v18 }
 0x8df   :  { %v1218_v26 = vadd.f32 1.0, %v1844_v16 }
 0x8e0   :  { %1224 = vrot.lane.b32.xlu1 %v1222_v13, %s1887_s23 }
 0x8e1   :  { %1845 = vrcp.f32 %v1218_v26 }
 0x8eb   :  { %v1846_v19 = vpop.eup %1845 }
 0x952   :  { %v1225_v17 = vpop.permute.xlu1 %1224 }
 0x953   :  { %v1227_v29 = vadd.f32 %v1225_v17, %v1221_v23 }
 0x955   :  { %1847 = vtanh.f32 %v1227_v29 }
 0x95f   :  { %v1848_v28 = vpop.eup %1847 }
 0x960   :  { %v1229_v20 = vmul.f32 %v1848_v28, %v1846_v19 }
 0x962   :  { %v2246_v21 = vpack.c.bf16 %v1229_v20, %v1229_v20 }
 0x964   :  { %1244 = vrot.lane.b32.xlu0 %v2246_v21, %s1887_s23 }
 0x9d6   :  { %v1245_v25 = vpop.permute.xlu0 %1244 }
 0x9d7   :  { %1676 = vmatmul.mubr.msk.bf16.vlgmr.msra.gmra.mrb[24].mxu1 %vm100_vm0, %v1245_v25 }
 0x9d8   :  { %1438 = vmatpush1.bf16.msra.mxu1 %v2058_v30  ;;  %1469 = vmatprep.mubr.bf16.mxu1 %v1885_v1 }
 0x9d9   :  { %1439 = vmatprep.subr.bf16.mxu1 %v2063_v31 }
 0x9dc   :  { %1440 = vmatpush1.bf16.msra.mxu1 %v2072_v32 }
 0x9dd   :  { %1441 = vmatprep.subr.bf16.mxu1 %v2079_v33 }
 0x9e0   :  { %1442 = vmatpush1.bf16.msra.mxu1 %v2094_v36 }
 0x9e1   :  { %1443 = vmatprep.subr.bf16.mxu1 %v2099_v37 }
 0x9e4   :  { %1444 = vmatpush1.bf16.msra.mxu1 %v2110_v38 }
 0xaaa   :  { %v1283_v39 = vpop.f32.mrb[24].mxu1 }
 0xaab   :  { %v1300_v40 = vadd.f32 %v2167_v34, %v1283_v39  ;;  %v1285_v41 = vpop.f32.mrb[25].mxu1 }
 0xaac   :  { %v1301_v30 = vadd.f32 %v2169_v35, %v1285_v41  ;;  %v1287_v42 = vpop.f32.mrb[26].mxu1 }
 0xaad   :  { %v1677_v1 = vmul.f32 -1.442695, %v1300_v40  ;;  %v1288_v44 = vpop.f32.mrb[27].mxu1 }
 0xaae   :  { %v1678_v37 = vmul.f32 -1.442695, %v1301_v30 }
 0xaaf   :  { %1849 = vpow2.f32 %v1677_v1 }
 0xab0   :  { %1851 = vtanh.f32 %v1301_v30 }
 0xab9   :  { %v1850_v31 = vpop.eup %1849 }
 0xaba   :  { %v1305_v32 = vadd.f32 1.0, %v1850_v31  ;;  %v1852_v33 = vpop.eup %1851 }
 0xabc   :  { %1853 = vrcp.f32 %v1305_v32 }
 0xabd   :  { %1855 = vpow2.f32 %v1678_v37 }
 0xac6   :  { %v1854_v36 = vpop.eup %1853 }
 0xac7   :  { %v1316_v45 = vmul.f32 %v1854_v36, %v1852_v33  ;;  %v1856_v38 = vpop.eup %1855  ;;  %v1315_v46 = vmul.f32 %v1854_v36, %v1227_v29 }
 0xac8   :  { %v1312_v34 = vadd.f32 1.0, %v1856_v38 }
 0xac9   :  { %1318 = vrot.lane.b32.xlu1 %v1316_v45, %s1887_s23 }
 0xaca   :  { %1857 = vrcp.f32 %v1312_v34 }
 0xad4   :  { %v1858_v49 = vpop.eup %1857 }
 0xb3b   :  { %v1319_v47 = vpop.permute.xlu1 %1318 }
 0xb3c   :  { %v1321_v35 = vadd.f32 %v1319_v47, %v1315_v46 }
 0xb3e   :  { %1859 = vtanh.f32 %v1321_v35 }
 0xb48   :  { %v1860_v56 = vpop.eup %1859 }
 0xb49   :  { %v1323_v59 = vmul.f32 %v1860_v56, %v1858_v49 }
 0xb4b   :  { %v2262_v62 = vpack.c.bf16 %v1323_v59, %v1323_v59 }
 0xb4d   :  { %1338 = vrot.lane.b32.xlu0 %v2262_v62, %s1887_s23 }
 0xbbf   :  { %v1339_v0 = vpop.permute.xlu0 %1338 }
 0xbc0   :  { %1682 = vmatmul.mubr.msk.bf16.vlgmr.msra.gmra.mrb[28].mxu0 %vm100_vm0, %v1339_v0 }
 0xc93   :  { %v1377_v22 = vpop.f32.mrb[28].mxu0 }
 0xc94   :  { %v1394_v2 = vadd.f32 %v2171_v63, %v1377_v22  ;;  %v1379_v14 = vpop.f32.mrb[29].mxu0 }
 0xc95   :  { %v1395_v43 = vadd.f32 %v2173_v5, %v1379_v14  ;;  %v1381_v3 = vpop.f32.mrb[30].mxu0 }
 0xc96   :  { %v1683_v18 = vmul.f32 -1.442695, %v1394_v2  ;;  %v1382_v48 = vpop.f32.mrb[31].mxu0 }
 0xc97   :  { %v1684_v9 = vmul.f32 -1.442695, %v1395_v43 }
 0xc98   :  { %1861 = vpow2.f32 %v1683_v18 }
 0xc99   :  { %1863 = vtanh.f32 %v1395_v43 }
 0xca2   :  { %v1862_v4 = vpop.eup %1861 }
 0xca3   :  { %v1399_v53 = vadd.f32 1.0, %v1862_v4  ;;  %v1864_v7 = vpop.eup %1863 }
 0xca5   :  { %1865 = vrcp.f32 %v1399_v53 }
 0xca6   :  { %1867 = vpow2.f32 %v1684_v9 }
 0xcaf   :  { %v1866_v8 = vpop.eup %1865 }
 0xcb0   :  { %v1410_v52 = vmul.f32 %v1866_v8, %v1864_v7  ;;  %v1868_v10 = vpop.eup %1867  ;;  %v1409_v57 = vmul.f32 %v1866_v8, %v1321_v35 }
 0xcb1   :  { %v1406_v63 = vadd.f32 1.0, %v1868_v10 }
 0xcb2   :  { %1412 = vrot.lane.b32.xlu1 %v1410_v52, %s1887_s23 }
 0xcb3   :  { %1869 = vrcp.f32 %v1406_v63 }
 0xcbd   :  { %v1870_v60 = vpop.eup %1869 }
 0xd24   :  { %v1413_v55 = vpop.permute.xlu1 %1412 }
 0xd25   :  { %v1415_v5 = vadd.f32 %v1413_v55, %v1409_v57 }
 0xd27   :  { %1871 = vtanh.f32 %v1415_v5 }
 0xd31   :  { %v1872_v11 = vpop.eup %1871 }
 0xd32   :  { %v1417_v51 = vmul.f32 %v1872_v11, %v1870_v60 }
 0xd34   :  { %v1418_v54 = vpack.c.bf16 %v1417_v51, %v1417_v51 }
 0xd36   :  { %1432 = vrot.lane.b32.xlu0 %v1418_v54, %s1887_s23 }
 0xd3a   :  { %852 = vrot.lane.b32.xlu0 %v2181_v24, %s1887_s23 }
 0xd3e   :  { %948 = vrot.lane.b32.xlu0 %v2196_v61, %s1887_s23 }
 0xd42   :  { %1044 = vrot.lane.b32.xlu0 %v2213_v27, %s1887_s23 }
 0xd46   :  { %1140 = vrot.lane.b32.xlu0 %v2230_v6, %s1887_s23 }
 0xd4a   :  { %1234 = vrot.lane.b32.xlu0 %v2246_v21, %s1887_s23 }
 0xd4e   :  { %1328 = vrot.lane.b32.xlu0 %v2262_v62, %s1887_s23 }
 0xd52   :  { %1422 = vrot.lane.b32.xlu0 %v1418_v54, %s1887_s23 }
 0xda8   :  { %v1433_v12 = vpop.permute.xlu0 %1432 }
 0xda9   :  { %1688 = vmatmul.mubr.msk.bf16.vlgmr.msra.gmra.mrb[28].mxu1 %vm100_vm0, %v1433_v12 }
 0xdac   :  { %v853_v13 = vpop.permute.xlu0 %852 }
 0xdad   :  { %856 = vst.msk [vmem:[%s2381_s10] sm:$0xf] %vm855_vm2, %v853_v13 }
 0xdb0   :  { %v949_v15 = vpop.permute.xlu0 %948 }
 0xdb1   :  { %1656 = vst.msk [vmem:[%s2381_s10 + $0x4] sm:$0xf] %vm855_vm2, %v949_v15 }
 0xdb4   :  { %v1045_v16 = vpop.permute.xlu0 %1044 }
 0xdb5   :  { %1662 = vst.msk [vmem:[%s2381_s10 + $0x8] sm:$0xf] %vm855_vm2, %v1045_v16 }
 0xdb8   :  { %v1141_v26 = vpop.permute.xlu0 %1140 }
 0xdb9   :  { %1668 = vst.msk [vmem:[%s2381_s10 + $0xc] sm:$0xf] %vm855_vm2, %v1141_v26 }
 0xdbc   :  { %v1235_v23 = vpop.permute.xlu0 %1234 }
 0xdbd   :  { %1674 = vst.msk [vmem:[%s2381_s10 + $0x10] sm:$0xf] %vm855_vm2, %v1235_v23 }
 0xdc0   :  { %v1329_v17 = vpop.permute.xlu0 %1328 }
 0xdc1   :  { %1680 = vst.msk [vmem:[%s2381_s10 + $0x14] sm:$0xf] %vm855_vm2, %v1329_v17 }
 0xdc4   :  { %v1423_v29 = vpop.permute.xlu0 %1422 }
 0xdc5   :  { %1686 = vst.msk [vmem:[%s2381_s10 + $0x18] sm:$0xf] %vm855_vm2, %v1423_v29 }
 0xe7c   :  { %v1471_v19 = vpop.f32.mrb[28].mxu1 }
 0xe7d   :  { %v1488_v28 = vadd.f32 %v2176_v50, %v1471_v19  ;;  %v1473_v20 = vpop.f32.mrb[29].mxu1 }
 0xe7e   :  { %v1489_v25 = vadd.f32 %v2178_v58, %v1473_v20  ;;  %v1475_v39 = vpop.f32.mrb[30].mxu1 }
 0xe7f   :  { %v1689_v40 = vmul.f32 -1.442695, %v1488_v28  ;;  %v1476_v41 = vpop.f32.mrb[31].mxu1 }
 0xe80   :  { %v1690_v50 = vmul.f32 -1.442695, %v1489_v25 }
 0xe81   :  { %1873 = vpow2.f32 %v1689_v40 }
 0xe82   :  { %1875 = vtanh.f32 %v1489_v25 }
 0xe8b   :  { %v1874_v30 = vpop.eup %1873 }
 0xe8c   :  { %v1493_v42 = vadd.f32 1.0, %v1874_v30  ;;  %v1876_v1 = vpop.eup %1875 }
 0xe8e   :  { %1877 = vrcp.f32 %v1493_v42 }
 0xe8f   :  { %1879 = vpow2.f32 %v1690_v50 }
 0xe98   :  { %v1878_v44 = vpop.eup %1877 }
 0xe99   :  { %v1504_v31 = vmul.f32 %v1878_v44, %v1876_v1  ;;  %v1880_v58 = vpop.eup %1879  ;;  %v1503_v32 = vmul.f32 %v1878_v44, %v1415_v5 }
 0xe9b   :  { %1506 = vrot.lane.b32.xlu1 %v1504_v31, %s1887_s23 }
 0xe9f   :  { %857 = vrot.lane.b32.xlu1 %v2181_v24, %s1888_s6  ;;  %v1500_v24 = vadd.f32 1.0, %v1880_v58 }
 0xea1   :  { %1881 = vrcp.f32 %v1500_v24 }
 0xea3   :  { %953 = vrot.lane.b32.xlu1 %v2196_v61, %s1888_s6 }
 0xea7   :  { %1049 = vrot.lane.b32.xlu1 %v2213_v27, %s1888_s6 }
 0xeab   :  { %1145 = vrot.lane.b32.xlu1 %v2230_v6, %s1888_s6 }
 0xeaf   :  { %1239 = vrot.lane.b32.xlu1 %v2246_v21, %s1888_s6  ;;  %v1882_v21 = vpop.eup %1881 }
 0xeb3   :  { %1333 = vrot.lane.b32.xlu1 %v2262_v62, %s1888_s6 }
 0xeb7   :  { %1427 = vrot.lane.b32.xlu1 %v1418_v54, %s1888_s6 }
 0xf0d   :  { %v1507_v61 = vpop.permute.xlu1 %1506 }
 0xf0e   :  { %v1509_v33 = vadd.f32 %v1507_v61, %v1503_v32 }
 0xf10   :  { %1883 = vtanh.f32 %v1509_v33 }
 0xf11   :  { %v858_v27 = vpop.permute.xlu1 %857 }
 0xf12   :  { %1651 = vst.msk [vmem:[%s2382_s11 + $0x1c] sm:$0xf] %vm855_vm2, %v858_v27 }
 0xf15   :  { %v954_v6 = vpop.permute.xlu1 %953 }
 0xf16   :  { %1657 = vst.msk [vmem:[%s2382_s11 + $0x18] sm:$0xf] %vm855_vm2, %v954_v6 }
 0xf19   :  { %v1050_v36 = vpop.permute.xlu1 %1049 }
 0xf1a   :  { %v1884_v45 = vpop.eup %1883  ;;  %1663 = vst.msk [vmem:[%s2382_s11 + $0x14] sm:$0xf] %vm855_vm2, %v1050_v36 }
 0xf1b   :  { %v1511_v37 = vmul.f32 %v1884_v45, %v1882_v21 }
 0xf1d   :  { %v1146_v38 = vpop.permute.xlu1 %1145  ;;  %v1700_v34 = vpack.c.bf16 %v1511_v37, %v1511_v37 }
 0xf1e   :  { %1669 = vst.msk [vmem:[%s2382_s11 + $0x10] sm:$0xf] %vm855_vm2, %v1146_v38 }
 0xf1f   :  { %1521 = vrot.lane.b32.xlu1 %v1700_v34, %s1888_s6  ;;  %1516 = vrot.lane.b32.xlu0 %v1700_v34, %s1887_s23 }
 0xf21   :  { %v1240_v46 = vpop.permute.xlu1 %1239 }
 0xf22   :  { %1675 = vst.msk [vmem:[%s2382_s11 + $0xc] sm:$0xf] %vm855_vm2, %v1240_v46 }
 0xf23   :  { %1531 = vrot.lane.b32.xlu1 %v1509_v33, %s1887_s23  ;;  %1526 = vrot.lane.b32.xlu0 %v1511_v37, %s1887_s23 }
 0xf25   :  { %v1334_v47 = vpop.permute.xlu1 %1333 }
 0xf26   :  { %1681 = vst.msk [vmem:[%s2382_s11 + $0x8] sm:$0xf] %vm855_vm2, %v1334_v47 }
 0xf29   :  { %v1428_v35 = vpop.permute.xlu1 %1427 }
 0xf2a   :  { %1687 = vst.msk [vmem:[%s2382_s11 + $0x4] sm:$0xf] %vm855_vm2, %v1428_v35 }
 0xf91   :  { %v1517_v49 = vpop.permute.xlu0 %1516  ;;  %v1522_v56 = vpop.permute.xlu1 %1521 }
 0xf92   :  { %1692 = vst.msk [vmem:[%s2381_s10 + $0x1c] sm:$0xf] %vm855_vm2, %v1517_v49  ;;  %1524 = vst.msk [vmem:[%s2382_s11] sm:$0xf] %vm855_vm2, %v1522_v56 }
 0xf95   :  { %v1527_v59 = vpop.permute.xlu0 %1526  ;;  %v1532_v62 = vpop.permute.xlu1 %1531 }
 0xf96   :  { %1529 = vst.msk [vmem:[#allocation2] sm:$0xff] %vm100_vm0, %v1527_v59  ;;  %1534 = vst.msk [vmem:[#allocation3] sm:$0xff] %vm100_vm0, %v1532_v62 }

</bundles_post_ra>
